<compile_context>
chip_gen: v7x
topology: tpu7x:2x2x1
jax: 0.10.0
libtpu: 0.0.40
codegen_flags: <defaults>
</compile_context>

<pallas_src>
import functools
import math

import jax
import jax.numpy as jnp
from jax import lax
from jax.experimental import pallas as pl
from jax.experimental.pallas import tpu as pltpu

_NEG = -1e30  # max-pool "padding" value; never escapes (window always covers a real pixel)


# ----------------------------------------------------------------------------
# In-kernel helpers
# ----------------------------------------------------------------------------
def _silu(x):
    # x * sigmoid(x); the divide runs on the EUP via the approximate reciprocal.
    return x * pl.reciprocal(1.0 + jnp.exp(-x), approx=True)


def _maxpool5_flat(v, H, W):
    """5x5 / stride 1 / pad 2 max pool of one image stored flat as (H*W, C) f32.

    Separable: +-1,+-2 shifts along the fast (W) axis with row-wrap masks, then
    +-W,+-2W shifts along the slow (H) axis with boundary masks.  All shifts are
    sublane rotations (pltpu.roll) of the flat slab.
    """
    HW, C = v.shape
    p = lax.broadcasted_iota(jnp.int32, (HW, C), 0)          # flat pixel index
    if (W & (W - 1)) == 0:                                   # W power of two -> bit mask
        j = jnp.bitwise_and(p, W - 1)
    else:
        j = p % W                                            # column index

    # --- W (fast) direction -------------------------------------------------
    m = v
    for d in (1, 2):
        right = pltpu.roll(v, shift=HW - d, axis=0)          # right[p] = v[p + d]
        right = jnp.where(j < W - d, right, _NEG)
        left = pltpu.roll(v, shift=d, axis=0)                # left[p]  = v[p - d]
        left = jnp.where(j >= d, left, _NEG)
        m = jnp.maximum(m, jnp.maximum(right, left))

    # --- H (slow) direction -------------------------------------------------
    out = m
    for d in (1, 2):
        s = d * W
        down = pltpu.roll(m, shift=HW - s, axis=0)           # down[p] = m[p + d*W]
        down = jnp.where(p < HW - s, down, _NEG)
        up = pltpu.roll(m, shift=s, axis=0)                  # up[p]   = m[p - d*W]
        up = jnp.where(p >= s, up, _NEG)
        out = jnp.maximum(out, jnp.maximum(down, up))
    return out


def _sppf_kernel(x_ref, w1_ref, b1_ref, w2x_ref, w2y1_ref, w2y2_ref, w2y3_ref,
                 b2_ref, o_ref, *, H, W):
    # cv1: 1x1 conv (+ folded BN) + SiLU.  bf16 MXU inputs, f32 accumulation.
    a = jnp.dot(x_ref[...], w1_ref[...], preferred_element_type=jnp.float32)
    a = _silu(a + b1_ref[...])                               # (HW, c_) f32

    # SPP pyramid: three chained 5x5/s1/p2 max pools, entirely on-chip.
    y1 = _maxpool5_flat(a, H, W)
    y2 = _maxpool5_flat(y1, H, W)
    y3 = _maxpool5_flat(y2, H, W)

    # cv2 over concat([a, y1, y2, y3]) == sum of four matmuls against the
    # row-chunks of the folded cv2 weight (no lane-dim concat needed).
    def _mm(feat, w_ref):
        return jnp.dot(feat.astype(jnp.bfloat16), w_ref[...],
                       preferred_element_type=jnp.float32)

    acc = _mm(a, w2x_ref) + _mm(y1, w2y1_ref) + _mm(y2, w2y2_ref) + _mm(y3, w2y3_ref)
    out = _silu(acc + b2_ref[...])
    o_ref[...] = out.astype(o_ref.dtype)


# ----------------------------------------------------------------------------
# Parameter prep (hoisted out of the forward) and the Pallas forward pass
# ----------------------------------------------------------------------------
def fold_bn(w, gamma, beta, mean, var, eps=1e-5):
    """Fold eval-mode BatchNorm2d into conv weight (OIHW) + bias."""
    scale = gamma / jnp.sqrt(var + eps)
    return w * scale[:, None, None, None], beta - mean * scale


def prepare_sppf(params):
    """One-time prep: fold BN, transpose 1x1 weights to (Cin, Cout), split cv2 by
    concat source, cast weights to bf16 (biases stay f32)."""
    w1, b1 = fold_bn(**params["cv1"])             # (c_, c1, 1, 1), (c_,)
    w2, b2 = fold_bn(**params["cv2"])             # (c2, 4c_, 1, 1), (c2,)
    c_hid = w1.shape[0]
    w1_t = jnp.transpose(w1[:, :, 0, 0], (1, 0)).astype(jnp.bfloat16)   # (c1, c_)
    w2_t = jnp.transpose(w2[:, :, 0, 0], (1, 0)).astype(jnp.bfloat16)   # (4c_, c2)
    return dict(
        w1=w1_t,
        b1=b1.reshape(1, -1).astype(jnp.float32),
        w2_x=w2_t[0 * c_hid:1 * c_hid],           # rows multiplying a  (torch cat order)
        w2_y1=w2_t[1 * c_hid:2 * c_hid],          # rows multiplying y1
        w2_y2=w2_t[2 * c_hid:3 * c_hid],          # rows multiplying y2
        w2_y3=w2_t[3 * c_hid:4 * c_hid],          # rows multiplying y3
        b2=b2.reshape(1, -1).astype(jnp.float32),
    )


def sppf_forward_pallas(x_nchw, prep):
    """SPPF forward.  x_nchw: (N, c1, H, W) f32 -> (N, c2, H, W) f32."""
    N, c1, H, W = x_nchw.shape
    HW = H * W
    c_hid = prep["w1"].shape[1]
    c2 = prep["b2"].shape[1]
    assert HW % 8 == 0, "H*W must be a multiple of 8 for this blocking"
    # TODO(synk): tile H*W with a 6-pixel halo for feature maps too large for VMEM;
    # this kernel keeps one image's activations resident per grid step.

    # NCHW -> flat NHWC slab, bf16 at the pallas_call boundary (halves input DMA).
    x2d = jnp.transpose(x_nchw, (0, 2, 3, 1)).reshape(N * HW, c1).astype(jnp.bfloat16)

    kernel = functools.partial(_sppf_kernel, H=H, W=W)
    wspec = lambda shape: pl.BlockSpec(shape, lambda n: (0, 0))
    out2d = pl.pallas_call(
        kernel,
        grid=(N,),
        in_specs=[
            pl.BlockSpec((HW, c1), lambda n: (n, 0)),
            wspec((c1, c_hid)),
            wspec((1, c_hid)),
            wspec((c_hid, c2)),
            wspec((c_hid, c2)),
            wspec((c_hid, c2)),
            wspec((c_hid, c2)),
            wspec((1, c2)),
        ],
        out_specs=pl.BlockSpec((HW, c2), lambda n: (n, 0)),
        out_shape=jax.ShapeDtypeStruct((N * HW, c2), jnp.float32),
        compiler_params=pltpu.CompilerParams(dimension_semantics=("parallel",)),
    )(x2d, prep["w1"], prep["b1"], prep["w2_x"], prep["w2_y1"], prep["w2_y2"],
      prep["w2_y3"], prep["b2"])

    return jnp.transpose(out2d.reshape(N, H, W, c2), (0, 3, 1, 2))


# ----------------------------------------------------------------------------
# Pure-JAX (XLA) reference for verification
# ----------------------------------------------------------------------------
def sppf_forward_ref(params, x_nchw):
    w1, b1 = fold_bn(**params["cv1"])
    w2, b2 = fold_bn(**params["cv2"])

    def conv1x1(x, w, b):
        y = lax.conv_general_dilated(
            x, w, window_strides=(1, 1), padding="VALID",
            dimension_numbers=("NCHW", "OIHW", "NCHW"),
            precision=lax.Precision.HIGHEST)
        return jax.nn.silu(y + b[None, :, None, None])

    def pool(t):  # MaxPool2d(kernel=5, stride=1, padding=2)
        return lax.reduce_window(t, -jnp.inf, lax.max, (1, 1, 5, 5), (1, 1, 1, 1),
                                 ((0, 0), (0, 0), (2, 2), (2, 2)))

    a = conv1x1(x_nchw, w1, b1)
    y1 = pool(a)
    y2 = pool(y1)
    y3 = pool(y2)
    return conv1x1(jnp.concatenate([a, y1, y2, y3], axis=1), w2, b2)


# ----------------------------------------------------------------------------
# Deterministic parameter construction (matches PyTorch module shapes, eval-mode BN)
# ----------------------------------------------------------------------------
def init_conv_bn(key, c_in, c_out, k):
    k1, k2, k3, k4, k5 = jax.random.split(key, 5)
    w = jax.random.normal(k1, (c_out, c_in, k, k), jnp.float32) / math.sqrt(c_in * k * k)
    gamma = jax.random.uniform(k2, (c_out,), jnp.float32, 0.8, 1.2)
    beta = jax.random.normal(k3, (c_out,), jnp.float32) * 0.05
    mean = jax.random.normal(k4, (c_out,), jnp.float32) * 0.05
    var = jax.random.uniform(k5, (c_out,), jnp.float32, 0.8, 1.2)
    return dict(w=w, gamma=gamma, beta=beta, mean=mean, var=var)


def init_sppf(key, c1, c2):
    c_ = c1 // 2
    k1, k2 = jax.random.split(key)
    return dict(cv1=init_conv_bn(k1, c1, c_, 1), cv2=init_conv_bn(k2, 4 * c_, c2, 1))


# ----------------------------------------------------------------------------
if __name__ == "__main__":
    key = jax.random.PRNGKey(0)
    kx, kp = jax.random.split(key)

    N, c1, H, W = 2, 128, 16, 16      # SPPF(c1=128, c2=128) -> hidden c_ = 64
    c2 = 128
    x = jax.random.normal(kx, (N, c1, H, W), jnp.float32)
    params = init_sppf(kp, c1, c2)
    prep = prepare_sppf(params)       # fold BN / transpose / bf16-cast once, off the hot path

    fwd = jax.jit(sppf_forward_pallas)
    out = jax.block_until_ready(fwd(x, prep))
    assert out.shape == (N, c2, H, W), out.shape

    ref = sppf_forward_ref(params, x)
    err = float(jnp.max(jnp.abs(out - ref)))
    if not err < 5e-2:
        raise AssertionError(f"max abs err {err}")
    print("KERNEL_OK")
</pallas_src>

<mosaic_0001>
module attributes {stable_mosaic.version = 11 : i64} {
  func.func @_sppf_kernel(%arg0: i32, %arg1: memref<256x128xbf16, #tpu.memory_space<vmem>>, %arg2: memref<128x64xbf16, #tpu.memory_space<vmem>>, %arg3: memref<1x64xf32, #tpu.memory_space<vmem>>, %arg4: memref<64x128xbf16, #tpu.memory_space<vmem>>, %arg5: memref<64x128xbf16, #tpu.memory_space<vmem>>, %arg6: memref<64x128xbf16, #tpu.memory_space<vmem>>, %arg7: memref<64x128xbf16, #tpu.memory_space<vmem>>, %arg8: memref<1x128xf32, #tpu.memory_space<vmem>>, %arg9: memref<256x128xf32, #tpu.memory_space<vmem>>) attributes {dimension_semantics = [#tpu.dimension_semantics<parallel>], iteration_bounds = array<i64: 2>, scalar_prefetch = 0 : i64, scratch_operands = 0 : i64, tpu.core_type = #tpu.core_type<tc>, window_params = [{transform_indices = @transform_0, window_bounds = array<i64: 256, 128>}, {pipeline_mode = #tpu.pipeline_mode<synchronous>, transform_indices = @transform_1, window_bounds = array<i64: 128, 64>}, {pipeline_mode = #tpu.pipeline_mode<synchronous>, transform_indices = @transform_2, window_bounds = array<i64: 1, 64>}, {pipeline_mode = #tpu.pipeline_mode<synchronous>, transform_indices = @transform_3, window_bounds = array<i64: 64, 128>}, {pipeline_mode = #tpu.pipeline_mode<synchronous>, transform_indices = @transform_4, window_bounds = array<i64: 64, 128>}, {pipeline_mode = #tpu.pipeline_mode<synchronous>, transform_indices = @transform_5, window_bounds = array<i64: 64, 128>}, {pipeline_mode = #tpu.pipeline_mode<synchronous>, transform_indices = @transform_6, window_bounds = array<i64: 64, 128>}, {pipeline_mode = #tpu.pipeline_mode<synchronous>, transform_indices = @transform_7, window_bounds = array<i64: 1, 128>}, {transform_indices = @transform_8, window_bounds = array<i64: 256, 128>}]} {
    %c0 = arith.constant 0 : index
    %c0_0 = arith.constant 0 : index
    %0 = vector.load %arg1[%c0, %c0_0] : memref<256x128xbf16, #tpu.memory_space<vmem>>, vector<256x128xbf16>
    %c0_1 = arith.constant 0 : index
    %c0_2 = arith.constant 0 : index
    %1 = vector.load %arg2[%c0_1, %c0_2] : memref<128x64xbf16, #tpu.memory_space<vmem>>, vector<128x64xbf16>
    %cst = arith.constant dense<0.000000e+00> : vector<256x64xf32>
    %2 = tpu.matmul %0, %1, %cst {dimension_numbers = #tpu.dot_dimension_numbers<[1], [0], [0], [1], [0, 0, 1, 1], [], []>} : vector<256x128xbf16>, vector<128x64xbf16>, vector<256x64xf32> -> vector<256x64xf32>
    %c0_3 = arith.constant 0 : index
    %c0_4 = arith.constant 0 : index
    %3 = vector.load %arg3[%c0_3, %c0_4] : memref<1x64xf32, #tpu.memory_space<vmem>>, vector<1x64xf32>
    %4 = vector.broadcast %3 : vector<1x64xf32> to vector<256x64xf32>
    %5 = arith.addf %2, %4 : vector<256x64xf32>
    %cst_5 = arith.constant 0.000000e+00 : f32
    %6 = vector.broadcast %cst_5 : f32 to vector<256x64xf32>
    %7 = arith.subf %6, %5 : vector<256x64xf32>
    %8 = math.exp %7 : vector<256x64xf32>
    %cst_6 = arith.constant 1.000000e+00 : f32
    %9 = vector.broadcast %cst_6 : f32 to vector<256x64xf32>
    %10 = arith.addf %9, %8 : vector<256x64xf32>
    %11 = tpu.reciprocal %10 {approx = true} : vector<256x64xf32> -> vector<256x64xf32>
    %12 = arith.mulf %5, %11 : vector<256x64xf32>
    %13 = tpu.iota {dimensions = array<i32: 0>} : vector<256x64xi32>
    %c15_i32 = arith.constant 15 : i32
    %14 = vector.broadcast %c15_i32 : i32 to vector<256x64xi32>
    %15 = arith.andi %13, %14 : vector<256x64xi32>
    %c255_i32 = arith.constant 255 : i32
    %16 = tpu.dynamic_rotate %12 by %c255_i32 dim 0 : vector<256x64xf32>, i32 -> vector<256x64xf32>
    %c15_i32_7 = arith.constant 15 : i32
    %17 = vector.broadcast %c15_i32_7 : i32 to vector<256x64xi32>
    %18 = arith.cmpi slt, %15, %17 : vector<256x64xi32>
    %cst_8 = arith.constant -1.000000e+30 : f32
    %19 = vector.broadcast %cst_8 : f32 to vector<256x64xf32>
    %20 = arith.select %18, %16, %19 : vector<256x64xi1>, vector<256x64xf32>
    %c1_i32 = arith.constant 1 : i32
    %21 = tpu.dynamic_rotate %12 by %c1_i32 dim 0 : vector<256x64xf32>, i32 -> vector<256x64xf32>
    %c1_i32_9 = arith.constant 1 : i32
    %22 = vector.broadcast %c1_i32_9 : i32 to vector<256x64xi32>
    %23 = arith.cmpi sge, %15, %22 : vector<256x64xi32>
    %cst_10 = arith.constant -1.000000e+30 : f32
    %24 = vector.broadcast %cst_10 : f32 to vector<256x64xf32>
    %25 = arith.select %23, %21, %24 : vector<256x64xi1>, vector<256x64xf32>
    %26 = arith.maximumf %20, %25 : vector<256x64xf32>
    %27 = arith.maximumf %12, %26 : vector<256x64xf32>
    %c254_i32 = arith.constant 254 : i32
    %28 = tpu.dynamic_rotate %12 by %c254_i32 dim 0 : vector<256x64xf32>, i32 -> vector<256x64xf32>
    %c14_i32 = arith.constant 14 : i32
    %29 = vector.broadcast %c14_i32 : i32 to vector<256x64xi32>
    %30 = arith.cmpi slt, %15, %29 : vector<256x64xi32>
    %cst_11 = arith.constant -1.000000e+30 : f32
    %31 = vector.broadcast %cst_11 : f32 to vector<256x64xf32>
    %32 = arith.select %30, %28, %31 : vector<256x64xi1>, vector<256x64xf32>
    %c2_i32 = arith.constant 2 : i32
    %33 = tpu.dynamic_rotate %12 by %c2_i32 dim 0 : vector<256x64xf32>, i32 -> vector<256x64xf32>
    %c2_i32_12 = arith.constant 2 : i32
    %34 = vector.broadcast %c2_i32_12 : i32 to vector<256x64xi32>
    %35 = arith.cmpi sge, %15, %34 : vector<256x64xi32>
    %cst_13 = arith.constant -1.000000e+30 : f32
    %36 = vector.broadcast %cst_13 : f32 to vector<256x64xf32>
    %37 = arith.select %35, %33, %36 : vector<256x64xi1>, vector<256x64xf32>
    %38 = arith.maximumf %32, %37 : vector<256x64xf32>
    %39 = arith.maximumf %27, %38 : vector<256x64xf32>
    %c240_i32 = arith.constant 240 : i32
    %40 = tpu.dynamic_rotate %39 by %c240_i32 dim 0 : vector<256x64xf32>, i32 -> vector<256x64xf32>
    %c240_i32_14 = arith.constant 240 : i32
    %41 = vector.broadcast %c240_i32_14 : i32 to vector<256x64xi32>
    %42 = arith.cmpi slt, %13, %41 : vector<256x64xi32>
    %cst_15 = arith.constant -1.000000e+30 : f32
    %43 = vector.broadcast %cst_15 : f32 to vector<256x64xf32>
    %44 = arith.select %42, %40, %43 : vector<256x64xi1>, vector<256x64xf32>
    %c16_i32 = arith.constant 16 : i32
    %45 = tpu.dynamic_rotate %39 by %c16_i32 dim 0 : vector<256x64xf32>, i32 -> vector<256x64xf32>
    %c16_i32_16 = arith.constant 16 : i32
    %46 = vector.broadcast %c16_i32_16 : i32 to vector<256x64xi32>
    %47 = arith.cmpi sge, %13, %46 : vector<256x64xi32>
    %cst_17 = arith.constant -1.000000e+30 : f32
    %48 = vector.broadcast %cst_17 : f32 to vector<256x64xf32>
    %49 = arith.select %47, %45, %48 : vector<256x64xi1>, vector<256x64xf32>
    %50 = arith.maximumf %44, %49 : vector<256x64xf32>
    %51 = arith.maximumf %39, %50 : vector<256x64xf32>
    %c224_i32 = arith.constant 224 : i32
    %52 = tpu.dynamic_rotate %39 by %c224_i32 dim 0 : vector<256x64xf32>, i32 -> vector<256x64xf32>
    %c224_i32_18 = arith.constant 224 : i32
    %53 = vector.broadcast %c224_i32_18 : i32 to vector<256x64xi32>
    %54 = arith.cmpi slt, %13, %53 : vector<256x64xi32>
    %cst_19 = arith.constant -1.000000e+30 : f32
    %55 = vector.broadcast %cst_19 : f32 to vector<256x64xf32>
    %56 = arith.select %54, %52, %55 : vector<256x64xi1>, vector<256x64xf32>
    %c32_i32 = arith.constant 32 : i32
    %57 = tpu.dynamic_rotate %39 by %c32_i32 dim 0 : vector<256x64xf32>, i32 -> vector<256x64xf32>
    %c32_i32_20 = arith.constant 32 : i32
    %58 = vector.broadcast %c32_i32_20 : i32 to vector<256x64xi32>
    %59 = arith.cmpi sge, %13, %58 : vector<256x64xi32>
    %cst_21 = arith.constant -1.000000e+30 : f32
    %60 = vector.broadcast %cst_21 : f32 to vector<256x64xf32>
    %61 = arith.select %59, %57, %60 : vector<256x64xi1>, vector<256x64xf32>
    %62 = arith.maximumf %56, %61 : vector<256x64xf32>
    %63 = arith.maximumf %51, %62 : vector<256x64xf32>
    %64 = tpu.iota {dimensions = array<i32: 0>} : vector<256x64xi32>
    %c15_i32_22 = arith.constant 15 : i32
    %65 = vector.broadcast %c15_i32_22 : i32 to vector<256x64xi32>
    %66 = arith.andi %64, %65 : vector<256x64xi32>
    %c255_i32_23 = arith.constant 255 : i32
    %67 = tpu.dynamic_rotate %63 by %c255_i32_23 dim 0 : vector<256x64xf32>, i32 -> vector<256x64xf32>
    %c15_i32_24 = arith.constant 15 : i32
    %68 = vector.broadcast %c15_i32_24 : i32 to vector<256x64xi32>
    %69 = arith.cmpi slt, %66, %68 : vector<256x64xi32>
    %cst_25 = arith.constant -1.000000e+30 : f32
    %70 = vector.broadcast %cst_25 : f32 to vector<256x64xf32>
    %71 = arith.select %69, %67, %70 : vector<256x64xi1>, vector<256x64xf32>
    %c1_i32_26 = arith.constant 1 : i32
    %72 = tpu.dynamic_rotate %63 by %c1_i32_26 dim 0 : vector<256x64xf32>, i32 -> vector<256x64xf32>
    %c1_i32_27 = arith.constant 1 : i32
    %73 = vector.broadcast %c1_i32_27 : i32 to vector<256x64xi32>
    %74 = arith.cmpi sge, %66, %73 : vector<256x64xi32>
    %cst_28 = arith.constant -1.000000e+30 : f32
    %75 = vector.broadcast %cst_28 : f32 to vector<256x64xf32>
    %76 = arith.select %74, %72, %75 : vector<256x64xi1>, vector<256x64xf32>
    %77 = arith.maximumf %71, %76 : vector<256x64xf32>
    %78 = arith.maximumf %63, %77 : vector<256x64xf32>
    %c254_i32_29 = arith.constant 254 : i32
    %79 = tpu.dynamic_rotate %63 by %c254_i32_29 dim 0 : vector<256x64xf32>, i32 -> vector<256x64xf32>
    %c14_i32_30 = arith.constant 14 : i32
    %80 = vector.broadcast %c14_i32_30 : i32 to vector<256x64xi32>
    %81 = arith.cmpi slt, %66, %80 : vector<256x64xi32>
    %cst_31 = arith.constant -1.000000e+30 : f32
    %82 = vector.broadcast %cst_31 : f32 to vector<256x64xf32>
    %83 = arith.select %81, %79, %82 : vector<256x64xi1>, vector<256x64xf32>
    %c2_i32_32 = arith.constant 2 : i32
    %84 = tpu.dynamic_rotate %63 by %c2_i32_32 dim 0 : vector<256x64xf32>, i32 -> vector<256x64xf32>
    %c2_i32_33 = arith.constant 2 : i32
    %85 = vector.broadcast %c2_i32_33 : i32 to vector<256x64xi32>
    %86 = arith.cmpi sge, %66, %85 : vector<256x64xi32>
    %cst_34 = arith.constant -1.000000e+30 : f32
    %87 = vector.broadcast %cst_34 : f32 to vector<256x64xf32>
    %88 = arith.select %86, %84, %87 : vector<256x64xi1>, vector<256x64xf32>
    %89 = arith.maximumf %83, %88 : vector<256x64xf32>
    %90 = arith.maximumf %78, %89 : vector<256x64xf32>
    %c240_i32_35 = arith.constant 240 : i32
    %91 = tpu.dynamic_rotate %90 by %c240_i32_35 dim 0 : vector<256x64xf32>, i32 -> vector<256x64xf32>
    %c240_i32_36 = arith.constant 240 : i32
    %92 = vector.broadcast %c240_i32_36 : i32 to vector<256x64xi32>
    %93 = arith.cmpi slt, %64, %92 : vector<256x64xi32>
    %cst_37 = arith.constant -1.000000e+30 : f32
    %94 = vector.broadcast %cst_37 : f32 to vector<256x64xf32>
    %95 = arith.select %93, %91, %94 : vector<256x64xi1>, vector<256x64xf32>
    %c16_i32_38 = arith.constant 16 : i32
    %96 = tpu.dynamic_rotate %90 by %c16_i32_38 dim 0 : vector<256x64xf32>, i32 -> vector<256x64xf32>
    %c16_i32_39 = arith.constant 16 : i32
    %97 = vector.broadcast %c16_i32_39 : i32 to vector<256x64xi32>
    %98 = arith.cmpi sge, %64, %97 : vector<256x64xi32>
    %cst_40 = arith.constant -1.000000e+30 : f32
    %99 = vector.broadcast %cst_40 : f32 to vector<256x64xf32>
    %100 = arith.select %98, %96, %99 : vector<256x64xi1>, vector<256x64xf32>
    %101 = arith.maximumf %95, %100 : vector<256x64xf32>
    %102 = arith.maximumf %90, %101 : vector<256x64xf32>
    %c224_i32_41 = arith.constant 224 : i32
    %103 = tpu.dynamic_rotate %90 by %c224_i32_41 dim 0 : vector<256x64xf32>, i32 -> vector<256x64xf32>
    %c224_i32_42 = arith.constant 224 : i32
    %104 = vector.broadcast %c224_i32_42 : i32 to vector<256x64xi32>
    %105 = arith.cmpi slt, %64, %104 : vector<256x64xi32>
    %cst_43 = arith.constant -1.000000e+30 : f32
    %106 = vector.broadcast %cst_43 : f32 to vector<256x64xf32>
    %107 = arith.select %105, %103, %106 : vector<256x64xi1>, vector<256x64xf32>
    %c32_i32_44 = arith.constant 32 : i32
    %108 = tpu.dynamic_rotate %90 by %c32_i32_44 dim 0 : vector<256x64xf32>, i32 -> vector<256x64xf32>
    %c32_i32_45 = arith.constant 32 : i32
    %109 = vector.broadcast %c32_i32_45 : i32 to vector<256x64xi32>
    %110 = arith.cmpi sge, %64, %109 : vector<256x64xi32>
    %cst_46 = arith.constant -1.000000e+30 : f32
    %111 = vector.broadcast %cst_46 : f32 to vector<256x64xf32>
    %112 = arith.select %110, %108, %111 : vector<256x64xi1>, vector<256x64xf32>
    %113 = arith.maximumf %107, %112 : vector<256x64xf32>
    %114 = arith.maximumf %102, %113 : vector<256x64xf32>
    %115 = tpu.iota {dimensions = array<i32: 0>} : vector<256x64xi32>
    %c15_i32_47 = arith.constant 15 : i32
    %116 = vector.broadcast %c15_i32_47 : i32 to vector<256x64xi32>
    %117 = arith.andi %115, %116 : vector<256x64xi32>
    %c255_i32_48 = arith.constant 255 : i32
    %118 = tpu.dynamic_rotate %114 by %c255_i32_48 dim 0 : vector<256x64xf32>, i32 -> vector<256x64xf32>
    %c15_i32_49 = arith.constant 15 : i32
    %119 = vector.broadcast %c15_i32_49 : i32 to vector<256x64xi32>
    %120 = arith.cmpi slt, %117, %119 : vector<256x64xi32>
    %cst_50 = arith.constant -1.000000e+30 : f32
    %121 = vector.broadcast %cst_50 : f32 to vector<256x64xf32>
    %122 = arith.select %120, %118, %121 : vector<256x64xi1>, vector<256x64xf32>
    %c1_i32_51 = arith.constant 1 : i32
    %123 = tpu.dynamic_rotate %114 by %c1_i32_51 dim 0 : vector<256x64xf32>, i32 -> vector<256x64xf32>
    %c1_i32_52 = arith.constant 1 : i32
    %124 = vector.broadcast %c1_i32_52 : i32 to vector<256x64xi32>
    %125 = arith.cmpi sge, %117, %124 : vector<256x64xi32>
    %cst_53 = arith.constant -1.000000e+30 : f32
    %126 = vector.broadcast %cst_53 : f32 to vector<256x64xf32>
    %127 = arith.select %125, %123, %126 : vector<256x64xi1>, vector<256x64xf32>
    %128 = arith.maximumf %122, %127 : vector<256x64xf32>
    %129 = arith.maximumf %114, %128 : vector<256x64xf32>
    %c254_i32_54 = arith.constant 254 : i32
    %130 = tpu.dynamic_rotate %114 by %c254_i32_54 dim 0 : vector<256x64xf32>, i32 -> vector<256x64xf32>
    %c14_i32_55 = arith.constant 14 : i32
    %131 = vector.broadcast %c14_i32_55 : i32 to vector<256x64xi32>
    %132 = arith.cmpi slt, %117, %131 : vector<256x64xi32>
    %cst_56 = arith.constant -1.000000e+30 : f32
    %133 = vector.broadcast %cst_56 : f32 to vector<256x64xf32>
    %134 = arith.select %132, %130, %133 : vector<256x64xi1>, vector<256x64xf32>
    %c2_i32_57 = arith.constant 2 : i32
    %135 = tpu.dynamic_rotate %114 by %c2_i32_57 dim 0 : vector<256x64xf32>, i32 -> vector<256x64xf32>
    %c2_i32_58 = arith.constant 2 : i32
    %136 = vector.broadcast %c2_i32_58 : i32 to vector<256x64xi32>
    %137 = arith.cmpi sge, %117, %136 : vector<256x64xi32>
    %cst_59 = arith.constant -1.000000e+30 : f32
    %138 = vector.broadcast %cst_59 : f32 to vector<256x64xf32>
    %139 = arith.select %137, %135, %138 : vector<256x64xi1>, vector<256x64xf32>
    %140 = arith.maximumf %134, %139 : vector<256x64xf32>
    %141 = arith.maximumf %129, %140 : vector<256x64xf32>
    %c240_i32_60 = arith.constant 240 : i32
    %142 = tpu.dynamic_rotate %141 by %c240_i32_60 dim 0 : vector<256x64xf32>, i32 -> vector<256x64xf32>
    %c240_i32_61 = arith.constant 240 : i32
    %143 = vector.broadcast %c240_i32_61 : i32 to vector<256x64xi32>
    %144 = arith.cmpi slt, %115, %143 : vector<256x64xi32>
    %cst_62 = arith.constant -1.000000e+30 : f32
    %145 = vector.broadcast %cst_62 : f32 to vector<256x64xf32>
    %146 = arith.select %144, %142, %145 : vector<256x64xi1>, vector<256x64xf32>
    %c16_i32_63 = arith.constant 16 : i32
    %147 = tpu.dynamic_rotate %141 by %c16_i32_63 dim 0 : vector<256x64xf32>, i32 -> vector<256x64xf32>
    %c16_i32_64 = arith.constant 16 : i32
    %148 = vector.broadcast %c16_i32_64 : i32 to vector<256x64xi32>
    %149 = arith.cmpi sge, %115, %148 : vector<256x64xi32>
    %cst_65 = arith.constant -1.000000e+30 : f32
    %150 = vector.broadcast %cst_65 : f32 to vector<256x64xf32>
    %151 = arith.select %149, %147, %150 : vector<256x64xi1>, vector<256x64xf32>
    %152 = arith.maximumf %146, %151 : vector<256x64xf32>
    %153 = arith.maximumf %141, %152 : vector<256x64xf32>
    %c224_i32_66 = arith.constant 224 : i32
    %154 = tpu.dynamic_rotate %141 by %c224_i32_66 dim 0 : vector<256x64xf32>, i32 -> vector<256x64xf32>
    %c224_i32_67 = arith.constant 224 : i32
    %155 = vector.broadcast %c224_i32_67 : i32 to vector<256x64xi32>
    %156 = arith.cmpi slt, %115, %155 : vector<256x64xi32>
    %cst_68 = arith.constant -1.000000e+30 : f32
    %157 = vector.broadcast %cst_68 : f32 to vector<256x64xf32>
    %158 = arith.select %156, %154, %157 : vector<256x64xi1>, vector<256x64xf32>
    %c32_i32_69 = arith.constant 32 : i32
    %159 = tpu.dynamic_rotate %141 by %c32_i32_69 dim 0 : vector<256x64xf32>, i32 -> vector<256x64xf32>
    %c32_i32_70 = arith.constant 32 : i32
    %160 = vector.broadcast %c32_i32_70 : i32 to vector<256x64xi32>
    %161 = arith.cmpi sge, %115, %160 : vector<256x64xi32>
    %cst_71 = arith.constant -1.000000e+30 : f32
    %162 = vector.broadcast %cst_71 : f32 to vector<256x64xf32>
    %163 = arith.select %161, %159, %162 : vector<256x64xi1>, vector<256x64xf32>
    %164 = arith.maximumf %158, %163 : vector<256x64xf32>
    %165 = arith.maximumf %153, %164 : vector<256x64xf32>
    %166 = arith.truncf %12 : vector<256x64xf32> to vector<256x64xbf16>
    %c0_72 = arith.constant 0 : index
    %c0_73 = arith.constant 0 : index
    %167 = vector.load %arg4[%c0_72, %c0_73] : memref<64x128xbf16, #tpu.memory_space<vmem>>, vector<64x128xbf16>
    %cst_74 = arith.constant dense<0.000000e+00> : vector<256x128xf32>
    %168 = tpu.matmul %166, %167, %cst_74 {dimension_numbers = #tpu.dot_dimension_numbers<[1], [0], [0], [1], [0, 0, 1, 1], [], []>} : vector<256x64xbf16>, vector<64x128xbf16>, vector<256x128xf32> -> vector<256x128xf32>
    %169 = arith.truncf %63 : vector<256x64xf32> to vector<256x64xbf16>
    %c0_75 = arith.constant 0 : index
    %c0_76 = arith.constant 0 : index
    %170 = vector.load %arg5[%c0_75, %c0_76] : memref<64x128xbf16, #tpu.memory_space<vmem>>, vector<64x128xbf16>
    %cst_77 = arith.constant dense<0.000000e+00> : vector<256x128xf32>
    %171 = tpu.matmul %169, %170, %cst_77 {dimension_numbers = #tpu.dot_dimension_numbers<[1], [0], [0], [1], [0, 0, 1, 1], [], []>} : vector<256x64xbf16>, vector<64x128xbf16>, vector<256x128xf32> -> vector<256x128xf32>
    %172 = arith.addf %168, %171 : vector<256x128xf32>
    %173 = arith.truncf %114 : vector<256x64xf32> to vector<256x64xbf16>
    %c0_78 = arith.constant 0 : index
    %c0_79 = arith.constant 0 : index
    %174 = vector.load %arg6[%c0_78, %c0_79] : memref<64x128xbf16, #tpu.memory_space<vmem>>, vector<64x128xbf16>
    %cst_80 = arith.constant dense<0.000000e+00> : vector<256x128xf32>
    %175 = tpu.matmul %173, %174, %cst_80 {dimension_numbers = #tpu.dot_dimension_numbers<[1], [0], [0], [1], [0, 0, 1, 1], [], []>} : vector<256x64xbf16>, vector<64x128xbf16>, vector<256x128xf32> -> vector<256x128xf32>
    %176 = arith.addf %172, %175 : vector<256x128xf32>
    %177 = arith.truncf %165 : vector<256x64xf32> to vector<256x64xbf16>
    %c0_81 = arith.constant 0 : index
    %c0_82 = arith.constant 0 : index
    %178 = vector.load %arg7[%c0_81, %c0_82] : memref<64x128xbf16, #tpu.memory_space<vmem>>, vector<64x128xbf16>
    %cst_83 = arith.constant dense<0.000000e+00> : vector<256x128xf32>
    %179 = tpu.matmul %177, %178, %cst_83 {dimension_numbers = #tpu.dot_dimension_numbers<[1], [0], [0], [1], [0, 0, 1, 1], [], []>} : vector<256x64xbf16>, vector<64x128xbf16>, vector<256x128xf32> -> vector<256x128xf32>
    %180 = arith.addf %176, %179 : vector<256x128xf32>
    %c0_84 = arith.constant 0 : index
    %c0_85 = arith.constant 0 : index
    %181 = vector.load %arg8[%c0_84, %c0_85] : memref<1x128xf32, #tpu.memory_space<vmem>>, vector<1x128xf32>
    %182 = vector.broadcast %181 : vector<1x128xf32> to vector<256x128xf32>
    %183 = arith.addf %180, %182 : vector<256x128xf32>
    %cst_86 = arith.constant 0.000000e+00 : f32
    %184 = vector.broadcast %cst_86 : f32 to vector<256x128xf32>
    %185 = arith.subf %184, %183 : vector<256x128xf32>
    %186 = math.exp %185 : vector<256x128xf32>
    %cst_87 = arith.constant 1.000000e+00 : f32
    %187 = vector.broadcast %cst_87 : f32 to vector<256x128xf32>
    %188 = arith.addf %187, %186 : vector<256x128xf32>
    %189 = tpu.reciprocal %188 {approx = true} : vector<256x128xf32> -> vector<256x128xf32>
    %190 = arith.mulf %183, %189 : vector<256x128xf32>
    %c0_88 = arith.constant 0 : index
    %c0_89 = arith.constant 0 : index
    %191 = vector.load %arg9[%c0_88, %c0_89] : memref<256x128xf32, #tpu.memory_space<vmem>>, vector<256x128xf32>
    tpu.vector_store %arg9[%c0_88, %c0_89], %190 {strides = array<i32>} : memref<256x128xf32, #tpu.memory_space<vmem>>, vector<256x128xf32>,
    return
  }
  func.func @transform_0(%arg0: i32) -> (i32, i32) {
    %c0_i32 = arith.constant 0 : i32
    %c0_i32_0 = arith.constant 0 : i32
    return %arg0, %c0_i32 : i32, i32
  }
  func.func @transform_1(%arg0: i32) -> (i32, i32) {
    %c0_i32 = arith.constant 0 : i32
    %c0_i32_0 = arith.constant 0 : i32
    %c0_i32_1 = arith.constant 0 : i32
    return %c0_i32, %c0_i32_0 : i32, i32
  }
  func.func @transform_2(%arg0: i32) -> (i32, i32) {
    %c0_i32 = arith.constant 0 : i32
    %c0_i32_0 = arith.constant 0 : i32
    %c0_i32_1 = arith.constant 0 : i32
    return %c0_i32, %c0_i32_0 : i32, i32
  }
  func.func @transform_3(%arg0: i32) -> (i32, i32) {
    %c0_i32 = arith.constant 0 : i32
    %c0_i32_0 = arith.constant 0 : i32
    %c0_i32_1 = arith.constant 0 : i32
    return %c0_i32, %c0_i32_0 : i32, i32
  }
  func.func @transform_4(%arg0: i32) -> (i32, i32) {
    %c0_i32 = arith.constant 0 : i32
    %c0_i32_0 = arith.constant 0 : i32
    %c0_i32_1 = arith.constant 0 : i32
    return %c0_i32, %c0_i32_0 : i32, i32
  }
  func.func @transform_5(%arg0: i32) -> (i32, i32) {
    %c0_i32 = arith.constant 0 : i32
    %c0_i32_0 = arith.constant 0 : i32
    %c0_i32_1 = arith.constant 0 : i32
    return %c0_i32, %c0_i32_0 : i32, i32
  }
  func.func @transform_6(%arg0: i32) -> (i32, i32) {
    %c0_i32 = arith.constant 0 : i32
    %c0_i32_0 = arith.constant 0 : i32
    %c0_i32_1 = arith.constant 0 : i32
    return %c0_i32, %c0_i32_0 : i32, i32
  }
  func.func @transform_7(%arg0: i32) -> (i32, i32) {
    %c0_i32 = arith.constant 0 : i32
    %c0_i32_0 = arith.constant 0 : i32
    %c0_i32_1 = arith.constant 0 : i32
    return %c0_i32, %c0_i32_0 : i32, i32
  }
  func.func @transform_8(%arg0: i32) -> (i32, i32) {
    %c0_i32 = arith.constant 0 : i32
    %c0_i32_0 = arith.constant 0 : i32
    return %arg0, %c0_i32 : i32, i32
  }
}

</mosaic_0001>

<bundles_post_ra>
// kernel: sppf_forward_pallas.1
= control target key start
LH: loop header
LB: loop body
LE: loop exit
PB: predicated region body
PF: predicated region fallthrough
CT: control target
= control target key end

     0   :  { %13 = vsyncpa [#allocation3], 0  ;;  %s10570_s0 = inlined_call_operand.vmem [shape: bf16[512,128], index: 0, kind: input, shape index: {}]   ;;  %s10571_s1 = inlined_call_operand.vmem [shape: bf16[128,64], index: 1, kind: input, shape index: {}]   ;;  %s10572_s2 = inlined_call_operand.vmem [shape: f32[1,64], index: 2, kind: input, shape index: {}]   ;;  %s10573_s3 = inlined_call_operand.vmem [shape: bf16[64,128], index: 3, kind: input, shape index: {}]   ;;  %s10574_s4 = inlined_call_operand.vmem [shape: bf16[64,128], index: 4, kind: input, shape index: {}]   ;;  %s10575_s5 = inlined_call_operand.vmem [shape: bf16[64,128], index: 5, kind: input, shape index: {}]   ;;  %s10576_s6 = inlined_call_operand.vmem [shape: bf16[64,128], index: 6, kind: input, shape index: {}]   ;;  %s10577_s7 = inlined_call_operand.vmem [shape: f32[1,128], index: 7, kind: input, shape index: {}]   ;;  %s10578_s8 = inlined_call_operand.hbm [shape: f32[512,128], index: 8, kind: output, shape index: {}]  }
   0x1   :  { %15 = vsyncpa [#allocation3 + $0x1], 0  ;;  %s5910_s27 = smov 0   ;;  %s5912_s28 = smov 0  }
   0x2   :  { %s5914_s29 = smov 0   ;;  %s5916_s30 = smov 0  }
   0x3 LB: > { %s5931_s9 = sadd.s32 4294967295, %s5860_s30   ;;  %s4921_s10 = sadd.s32 4294967294, %s5860_s30   ;;  %s5860_s30 = sphi %s5916_s30, %s12260_s30   ;;  %s5856_s29 = sphi %s5914_s29, %s12259_s29   ;;  %s5852_s28 = sphi %s5912_s28, %s12258_s28   ;;  %s5848_s27 = sphi %s5910_s27, %s12257_s27  }
   0x4   : > { %s5935_s11 = sadd.s32 1, %s5860_s30   ;;  %s201_s12 = sadd.s32 1, %s5856_s29 }
   0x5   : > { %s198_s13 = ssub.s32 %s5860_s30, %s5935_s11  ;;  %p211_p0 = scmp.ne.s32.totalorder %s5856_s29, %s5852_s28 }
   0x6   : > { %p199_p1 = scmp.eq.s32.totalorder %s198_s13, 0  ;;  %p212_p2 = scmp.eq.s32.totalorder %s5931_s9, 1 }
   0x7   : > { %p217_p3 = scmp.ne.s32.totalorder %s5852_s28, %s5848_s27  ;;  %p218_p4 = scmp.eq.s32.totalorder %s4921_s10, 1 }
   0x8   : > { %s5946_s14 = scalar_select %p199_p1, %s5856_s29, %s201_s12  }
   0x9   : > { %p5948_p5 = por %p212_p2, %p211_p0  ;;  %p5952_p6 = por %p218_p4, %p217_p3 }
   0xa   : > { %p4924_p7 = scmp.ge.s32.totalorder %s5860_s30, 1  ;;  %p266_p8 = scmp.lt.s32.totalorder %s5860_s30, 3 }
   0xc   : > { %p267_p9 = pnand %p4924_p7, %p266_p8 }
   0xe   : > { %270 = sbr.rel (%p267_p9) target bundleno = 1241 (0x4d9), region = 52 }
  0x15   : > { %v5497_v0 = vld [vmem:[%s10571_s1] sm:$0xff]   ;;  %s4926_s19 = sshll.u32 %s5931_s9, 5  ;;  %v5498_v1 = vld [vmem:[%s10571_s1 + $0x8] sm:$0xff]   ;;  %v5499_v2 = vld [vmem:[%s10571_s1 + $0x10] sm:$0xff]   ;;  %v860_v33 = vlaneseq  ;;  %s5039_s22 = sshll.u32 %s5931_s9, 12 }
  0x16   : > { %p301_p10 = scmp.lt.s32.totalorder %s4926_s19, 63  ;;  %5144 = vmatprep.subr.bf16.mxu0 %v5497_v0  ;;  %v5500_v3 = vld [vmem:[%s10571_s1 + $0x18] sm:$0xff]   ;;  %v5501_v5 = vld [vmem:[%s10571_s1 + $0x20] sm:$0xff]   ;;  %v5502_v6 = vld [vmem:[%s10571_s1 + $0x28] sm:$0xff]   ;;  %s10519_s26 = scalar_lea.hbm %s10578_s8, %s5039_s22 }
  0x17   : > { %5145 = vmatpush3.bf16.msra.mxu0 %v5497_v0  ;;  %v5503_v7 = vld [vmem:[%s10571_s1 + $0x30] sm:$0xff]   ;;  %v5504_v8 = vld [vmem:[%s10571_s1 + $0x38] sm:$0xff]   ;;  %v6007_v24 = vld [vmem:[%s10573_s3] sm:$0xff]   ;;  %v6035_v43 = vshrl.u32 %v860_v33, 7  ;;  %s5862_s13 = smov [#allocation2]  }
  0x18   : > { %s12262_s19 = smov (!%p301_p10, %s4926_s19), 63  ;;  %5146 = vmatprep.subr.bf16.mxu0 %v5498_v1  ;;  %10935 = vst [vmem:[#allocation5_spill] sm:$0xff] %v6007_v24  ;;  %5352 = vmatprep.subr.bf16.mxu1 %v6007_v24  ;;  %v6014_v25 = vld [vmem:[%s10572_s2] ss:$0 sm:$0xff]  ;;  %v5522_v35 = vld [vmem:[%s10573_s3 + $0x8] sm:$0xff]   ;;  %v5523_v44 = vld [vmem:[%s10573_s3 + $0x10] sm:$0xff]  }
  0x19   : > { %s4927_s24 = sshll.u32 %s12262_s19, 2  ;;  %5356 = vmatpush3.bf16.msra.mxu1 %v6007_v24  ;;  %v6047_v51 = vadd.s32 8, %v6035_v43  ;;  %v6050_v52 = vadd.s32 16, %v6035_v43  ;;  %v6058_v57 = vadd.s32 24, %v6035_v43  ;;  %v6061_v58 = vadd.s32 32, %v6035_v43  ;;  %s297_s19 = sand.u32 1, %s5852_s28  }
  0x1a   : > { %s5971_s10 = scalar_lea.vmem %s10570_s0, %s4927_s24  ;;  %5353 = vmatprep.subr.bf16.mxu1 %v5522_v35  ;;  %v6068_v62 = vadd.s32 40, %v6035_v43  ;;  %v6071_v63 = vadd.s32 48, %v6035_v43  ;;  %vm10638_vm0 = vcmp.lt.s32.totalorder %v6035_v43, 7  ;;  %vm10635_vm1 = vcmp.lt.s32.totalorder %v6035_v43, 1  ;;  %s4925_s20 = sshll.u32 %s297_s19, 8 }
  0x1b   : > { %5147 = vmatpush3.bf16.msra.mxu0 %v5498_v1  ;;  %v5505_v4 = vld [vmem:[%s5971_s10] sm:$0xff]   ;;  %v5506_v9 = vld [vmem:[%s5971_s10 + $0x8] sm:$0xff]   ;;  %v5507_v10 = vld [vmem:[%s5971_s10 + $0x10] sm:$0xff]   ;;  %vm10637_vm3 = vcmp.lt.s32.totalorder %v6035_v43, 6  ;;  %vm10636_vm5 = vcmp.lt.s32.totalorder %v6035_v43, 2  ;;  %s10336_s21 = scalar_lea.vmem [#allocation2], %s4925_s20 }
  0x1c   : > { %5148 = vmatprep.subr.bf16.mxu0 %v5499_v2  ;;  %5160 = vmatprep.mubr.bf16.mxu0 %v5505_v4  ;;  %v5508_v11 = vld [vmem:[%s5971_s10 + $0x18] sm:$0xff]   ;;  %v5509_v12 = vld [vmem:[%s5971_s10 + $0x20] sm:$0xff]   ;;  %v5510_v13 = vld [vmem:[%s5971_s10 + $0x28] sm:$0xff]   ;;  %v894_v4 = vand.u32 15, %v6047_v51  ;;  %s4859_s23 = sshll.u32 %s10336_s21, 4  ;;  %s10529_s9 = scalar_lea.sflag [#allocation3], %s297_s19  ;;  %s10521_s23 = int_to_ptr.vmem [resolvable:$true] %s4859_s23 }
  0x1d   : > { %v5511_v14 = vld [vmem:[%s5971_s10 + $0x30] sm:$0xff]   ;;  %v5512_v15 = vld [vmem:[%s5971_s10 + $0x38] sm:$0xff]   ;;  %v5513_v16 = vld [vmem:[%s5971_s10 + $0x40] sm:$0xff]   ;;  %5357 = vmatpush3.bf16.msra.mxu1 %v5522_v35  ;;  %v6104_v35 = vadd.s32 88, %v6035_v43  ;;  %s5798_s12 = scalar_lea.vmem %s10521_s23, 4096 }
  0x1e   : > { %v5514_v17 = vld [vmem:[%s5971_s10 + $0x48] sm:$0xff]   ;;  %v5515_v18 = vld [vmem:[%s5971_s10 + $0x50] sm:$0xff]   ;;  %v5516_v19 = vld [vmem:[%s5971_s10 + $0x58] sm:$0xff]   ;;  %5354 = vmatprep.subr.bf16.mxu1 %v5523_v44  ;;  %vm6163_vm2 = vcmp.lt.s32.totalorder %v894_v4, 15  ;;  %vm6203_vm6 = vcmp.lt.s32.totalorder %v894_v4, 14  ;;  %p5799_p11 = scmp.ne.s32.totalorder %s10521_s23, %s5798_s12 }
  0x1f   : > { %5149 = vmatpush3.bf16.msra.mxu0 %v5499_v2  ;;  %v5517_v20 = vld [vmem:[%s5971_s10 + $0x60] sm:$0xff]   ;;  %v5518_v21 = vld [vmem:[%s5971_s10 + $0x68] sm:$0xff]   ;;  %v5519_v22 = vld [vmem:[%s5971_s10 + $0x70] sm:$0xff]   ;;  %v6075_v2 = vadd.s32 56, %v6035_v43  ;;  %10937 = vst [vmem:[#allocation7_spill] sm:$0xff] %v6104_v35 }
  0x20   : > { %5150 = vmatprep.subr.bf16.mxu0 %v5500_v3  ;;  %v5520_v23 = vld [vmem:[%s5971_s10 + $0x78] sm:$0xff]   ;;  %p5800_p12 = pnand %p5799_p11, %p5948_p5  ;;  %s5802_s10 = sshll.u32 %s5862_s13, 4  ;;  %s5803_s10 = int_to_ptr.vmem [resolvable:$false] %s5802_s10 }
  0x21   : > { %5358 = vmatpush3.bf16.msra.mxu1 %v5523_v44  ;;  %s5804_s17 = scalar_lea.vmem %s5803_s10, 8192  ;;  %p5805_p0 = scmp.lt.s32.totalorder %s10521_s23, %s5803_s10 }
  0x22   : > { %p5801_p13 = pneg %p5800_p12  ;;  %p5806_p1 = scmp.lt.s32.totalorder %s5804_s17, %s5798_s12 }
  0x23   : > { %5151 = vmatpush3.bf16.msra.mxu0 %v5500_v3  ;;  %v6078_v3 = vadd.s32 64, %v6035_v43 }
  0x24   : > { %5152 = vmatprep.subr.bf16.mxu0 %v5501_v5  ;;  %p5807_p2 = por %p5806_p1, %p5805_p0 }
  0x26   : > { %p5808_p3 = pnand %p5807_p2, %p5801_p13 }
  0x27   : > { %5153 = vmatpush3.bf16.msra.mxu0 %v5501_v5 }
  0x28   : > { %5154 = vmatprep.subr.bf16.mxu0 %v5502_v6 }
  0x2b   : > { %5155 = vmatpush3.bf16.msra.mxu0 %v5502_v6  ;;  %v895_v6 = vand.u32 15, %v6050_v52 }
  0x2c   : > { %5156 = vmatprep.subr.bf16.mxu0 %v5503_v7 }
  0x2d   : > { %vm6176_vm4 = vcmp.ge.s32.totalorder %v895_v6, 1  ;;  %vm6216_vm7 = vcmp.ge.s32.totalorder %v895_v6, 2 }
  0x2f   : > { %5157 = vmatpush3.bf16.msra.mxu0 %v5503_v7 }
  0x30   : > { %5158 = vmatprep.subr.bf16.mxu0 %v5504_v8 }
  0x33   : > { %5159 = vmatpush3.bf16.msra.mxu0 %v5504_v8 }
  0x36   : > { %5161 = vmatmul.mubr.bf16.vlgmr.msra.gmra.mrb[0].mxu0 %v5506_v9 }
  0x37   : > { %5164 = vmatprep.mubr.bf16.mxu0 %v5507_v10 }
  0x3e   : > { %5165 = vmatmul.mubr.bf16.gmra.mrb[4].mxu0 %v5508_v11 }
  0x3f   : > { %5168 = vmatprep.mubr.bf16.mxu0 %v5509_v12 }
  0x46   : > { %5169 = vmatmul.mubr.bf16.gmra.mrb[8].mxu0 %v5510_v13 }
  0x47   : > { %5172 = vmatprep.mubr.bf16.mxu0 %v5511_v14 }
  0x4e   : > { %5173 = vmatmul.mubr.bf16.gmra.mrb[12].mxu0 %v5512_v15 }
  0x4f   : > { %5176 = vmatprep.mubr.bf16.mxu0 %v5513_v16 }
  0x56   : > { %5177 = vmatmul.mubr.bf16.gmra.mrb[16].mxu0 %v5514_v17 }
  0x57   : > { %5180 = vmatprep.mubr.bf16.mxu0 %v5515_v18 }
  0x5e   : > { %5181 = vmatmul.mubr.bf16.gmra.mrb[20].mxu0 %v5516_v19 }
  0x5f   : > { %5184 = vmatprep.mubr.bf16.mxu0 %v5517_v20 }
  0x66   : > { %5185 = vmatmul.mubr.bf16.gmra.mrb[24].mxu0 %v5518_v21 }
  0x67   : > { %5188 = vmatprep.mubr.bf16.mxu0 %v5519_v22 }
  0x6e   : > { %5189 = vmatmul.mubr.bf16.gmra.mrb[28].mxu0 %v5520_v23 }
 0x109   : > { %v5162_v26 = vpop.f32.mrb[0].mxu0 }
 0x10a   : > { %v6017_v27 = vadd.f32 %v5162_v26, %v6014_v25  ;;  %v541_v28 = vpop.f32.mrb[1].mxu0 }
 0x10b   : > { %v6020_v29 = vadd.f32 %v6014_v25, %v541_v28  ;;  %v5163_v30 = vpop.f32.mrb[2].mxu0  ;;  %v6095_v28 = vadd.s32 72, %v6035_v43 }
 0x10c   : > { %v670_v31 = vsub.f32 0.0, %v6017_v27  ;;  %v6024_v32 = vadd.f32 %v5163_v30, %v6014_v25  ;;  %v544_v34 = vpop.f32.mrb[3].mxu0 }
 0x10d   : > { %v668_v36 = vsub.f32 0.0, %v6020_v29  ;;  %v6031_v37 = vadd.f32 %v6014_v25, %v544_v34  ;;  %v6101_v34 = vadd.s32 80, %v6035_v43 }
 0x10e   : > { %v704_v38 = vmul.f32 1.442695, %v670_v31  ;;  %v671_v39 = vsub.f32 0.0, %v6024_v32 }
 0x10f   : > { %v700_v40 = vmul.f32 1.442695, %v668_v36  ;;  %v669_v41 = vsub.f32 0.0, %v6031_v37 }
 0x110   : > { %5537 = vpow2.f32 %v704_v38  ;;  %v706_v42 = vmul.f32 1.442695, %v671_v39  ;;  %v6108_v39 = vadd.s32 96, %v6035_v43 }
 0x111   : > { %5539 = vpow2.f32 %v700_v40  ;;  %v702_v45 = vmul.f32 1.442695, %v669_v41  ;;  %v5166_v46 = vpop.f32.mrb[4].mxu0  ;;  %v6114_v41 = vadd.s32 104, %v6035_v43 }
 0x112   : > { %5541 = vpow2.f32 %v706_v42  ;;  %v6041_v47 = vadd.f32 %v5166_v46, %v6014_v25  ;;  %v557_v48 = vpop.f32.mrb[5].mxu0  ;;  %10938 = vst [vmem:[#allocation8_spill] sm:$0xff] %v6108_v39  ;;  %v6117_v42 = vadd.s32 112, %v6035_v43  ;;  %v6124_v46 = vadd.s32 128, %v6035_v43 }
 0x113   : > { %5543 = vpow2.f32 %v702_v45  ;;  %v6044_v49 = vadd.f32 %v6014_v25, %v557_v48  ;;  %v5167_v50 = vpop.f32.mrb[6].mxu0  ;;  %10939 = vst [vmem:[#allocation9_spill] sm:$0xff] %v6114_v41  ;;  %v6121_v45 = vadd.s32 120, %v6035_v43  ;;  %v10975_v41 = vmov 0 }
 0x114   : > { %v674_v53 = vsub.f32 0.0, %v6041_v47  ;;  %v6054_v54 = vadd.f32 %v5167_v50, %v6014_v25  ;;  %v560_v55 = vpop.f32.mrb[7].mxu0  ;;  %10940 = vst [vmem:[#allocation10_spill] sm:$0xff] %v6117_v42  ;;  %10942 = vst [vmem:[#allocation12_spill] sm:$0xff] %v6124_v46 }
 0x115   : > { %v672_v56 = vsub.f32 0.0, %v6044_v49  ;;  %v6064_v59 = vadd.f32 %v6014_v25, %v560_v55  ;;  %10941 = vst [vmem:[#allocation11_spill] sm:$0xff] %v6121_v45  ;;  %v6129_v55 = vadd.s32 136, %v6035_v43 }
 0x116   : > { %v712_v60 = vmul.f32 1.442695, %v674_v53  ;;  %v675_v61 = vsub.f32 0.0, %v6054_v54 }
 0x117   : > { %v708_v0 = vmul.f32 1.442695, %v672_v56  ;;  %v673_v1 = vsub.f32 0.0, %v6064_v59  ;;  %10943 = vst [vmem:[#allocation13_spill] sm:$0xff] %v6129_v55 }
 0x118   : > { %5545 = vpow2.f32 %v712_v60  ;;  %v714_v5 = vmul.f32 1.442695, %v675_v61 }
 0x119   : > { %5547 = vpow2.f32 %v708_v0  ;;  %v710_v8 = vmul.f32 1.442695, %v673_v1  ;;  %v5170_v9 = vpop.f32.mrb[8].mxu0 }
 0x11a   : > { %v5538_v10 = vpop.eup %5537  ;;  %v6087_v14 = vadd.f32 %v5170_v9, %v6014_v25  ;;  %v573_v15 = vpop.f32.mrb[9].mxu0 }
 0x11b   : > { %v5540_v16 = vpop.eup %5539  ;;  %v766_v17 = vadd.f32 1.0, %v5538_v10  ;;  %5549 = vpow2.f32 %v710_v8  ;;  %v5171_v20 = vpop.f32.mrb[10].mxu0  ;;  %v6092_v23 = vadd.f32 %v6014_v25, %v573_v15 }
 0x11c   : > { %v5542_v21 = vpop.eup %5541  ;;  %v764_v22 = vadd.f32 1.0, %v5540_v16  ;;  %5551 = vpow2.f32 %v714_v5  ;;  %v576_v26 = vpop.f32.mrb[11].mxu0  ;;  %v6098_v33 = vadd.f32 %v5171_v20, %v6014_v25  ;;  %v678_v38 = vsub.f32 0.0, %v6087_v14 }
 0x11d   : > { %v5544_v30 = vpop.eup %5543  ;;  %v767_v31 = vadd.f32 1.0, %v5542_v21  ;;  %5553 = vrcp.f32 %v766_v17  ;;  %v6111_v40 = vadd.f32 %v6014_v25, %v576_v26  ;;  %v676_v44 = vsub.f32 0.0, %v6092_v23 }
 0x11e   : > { %10936 = vst [vmem:[#allocation6_spill] sm:$0xff] %v6098_v33  ;;  %v765_v36 = vadd.f32 1.0, %v5544_v30  ;;  %5555 = vrcp.f32 %v764_v22  ;;  %v679_v48 = vsub.f32 0.0, %v6098_v33  ;;  %v720_v60 = vmul.f32 1.442695, %v678_v38 }
 0x11f   : > { %v677_v9 = vsub.f32 0.0, %v6111_v40  ;;  %v716_v21 = vmul.f32 1.442695, %v676_v44  ;;  %v6159_v26 = vadd.s32 160, %v6035_v43  ;;  %v10950_v17 = vmov 0 }
 0x120   : > { %5557 = vrcp.f32 %v765_v36  ;;  %v722_v36 = vmul.f32 1.442695, %v679_v48  ;;  %v10951_v17 = vsel %vm6163_vm2, 4294967295, %v10950_v17 }
 0x121   : > { %5559 = vrcp.f32 %v767_v31  ;;  %v5174_v53 = vpop.f32.mrb[12].mxu0  ;;  %v718_v48 = vmul.f32 1.442695, %v677_v9  ;;  %10949 = vst [vmem:[#allocation19_spill] sm:$0xff] %v6159_v26  ;;  %10952 = vst [vmem:[#allocation20_spill] sm:$0xff] %v10951_v17  ;;  %v6171_v9 = vadd.s32 168, %v6035_v43 }
 0x122   : > { %v5546_v56 = vpop.eup %5545  ;;  %v6133_v0 = vadd.f32 %v5174_v53, %v6014_v25  ;;  %v589_v1 = vpop.f32.mrb[13].mxu0  ;;  %v6146_v53 = vadd.s32 144, %v6035_v43  ;;  %5561 = vpow2.f32 %v720_v60 }
 0x123   : > { %v5548_v8 = vpop.eup %5547  ;;  %v5175_v15 = vpop.f32.mrb[14].mxu0  ;;  %v6143_v38 = vadd.f32 %v6014_v25, %v589_v1  ;;  %v770_v44 = vadd.f32 1.0, %v5546_v56  ;;  %v6156_v1 = vadd.s32 152, %v6035_v43  ;;  %10954 = vst [vmem:[#allocation22_spill] sm:$0xff] %v6171_v9 }
 0x124   : > { %10944 = vst [vmem:[#allocation14_spill] sm:$0xff] %v6133_v0  ;;  %v768_v20 = vadd.f32 1.0, %v5548_v8  ;;  %v592_v22 = vpop.f32.mrb[15].mxu0  ;;  %10946 = vst [vmem:[#allocation16_spill] sm:$0xff] %v6146_v53  ;;  %v682_v8 = vsub.f32 0.0, %v6133_v0  ;;  %v6153_v30 = vadd.f32 %v5175_v15, %v6014_v25 }
 0x125   : > { %v5550_v31 = vpop.eup %5549  ;;  %10945 = vst [vmem:[#allocation15_spill] sm:$0xff] %v6143_v38  ;;  %10948 = vst [vmem:[#allocation18_spill] sm:$0xff] %v6156_v1  ;;  %v6168_v60 = vadd.f32 %v6014_v25, %v592_v22  ;;  %v6184_v22 = vadd.s32 176, %v6035_v43 }
 0x126   : > { %v5552_v16 = vpop.eup %5551  ;;  %10947 = vst [vmem:[#allocation17_spill] sm:$0xff] %v6153_v30  ;;  %5563 = vrcp.f32 %v768_v20  ;;  %v769_v56 = vadd.f32 1.0, %v5550_v31  ;;  %v10955_v20 = vmov 0  ;;  %v680_v31 = vsub.f32 0.0, %v6143_v38 }
 0x127   : > { %v5554_v10 = vpop.eup %5553  ;;  %5565 = vpow2.f32 %v716_v21  ;;  %10953 = vst [vmem:[#allocation21_spill] sm:$0xff] %v6168_v60  ;;  %v10956_v20 = vsel %vm6176_vm4, 4294967295, %v10955_v20  ;;  %v771_v5 = vadd.f32 1.0, %v5552_v16  ;;  %10958 = vst [vmem:[#allocation24_spill] sm:$0xff] %v6184_v22  ;;  %v728_v50 = vmul.f32 1.442695, %v682_v8 }
 0x128   : > { %v5556_v15 = vpop.eup %5555  ;;  %10957 = vst [vmem:[#allocation23_spill] sm:$0xff] %v10956_v20  ;;  %5567 = vpow2.f32 %v722_v36  ;;  %v683_v19 = vsub.f32 0.0, %v6153_v30  ;;  %v6192_v36 = vmul.f32 %v5554_v10, %v6017_v27  ;;  %v10961_v8 = vmov 0 }
 0x129   : > { %v6181_v21 = vpop.f32.mrb[16].mxu0  ;;  %5569 = vrcp.f32 %v770_v44  ;;  %v10962_v8 = vsel %vm6203_vm6, 4294967295, %v10961_v8  ;;  %v681_v27 = vsub.f32 0.0, %v6168_v60  ;;  %v6212_v11 = vmul.f32 %v5556_v15, %v6020_v29  ;;  %v5524_v29 = vld [vmem:[%s10573_s3 + $0x18] sm:$0xff]  }
 0x12a   : > { %v5558_v61 = vpop.eup %5557  ;;  %v6188_v18 = vpop.f32.mrb[17].mxu0  ;;  %10959 = vst [vmem:[#allocation25_spill] sm:$0xff] %v6192_v36  ;;  %5571 = vpow2.f32 %v718_v48  ;;  %10963 = vst [vmem:[#allocation27_spill] sm:$0xff] %v10962_v8  ;;  %v724_v51 = vmul.f32 1.442695, %v680_v31  ;;  %v6225_v48 = vadd.s32 184, %v6035_v43  ;;  %5355 = vmatprep.subr.bf16.mxu1 %v5524_v29 }
 0x12b   : > { %v5560_v16 = vpop.eup %5559  ;;  %v6194_v12 = vpop.f32.mrb[18].mxu0  ;;  %v6199_v44 = vmul.f32 %v5558_v61, %v6031_v37  ;;  %5573 = vrcp.f32 %v769_v56  ;;  %10964 = vst [vmem:[#allocation28_spill] sm:$0xff] %v6212_v11  ;;  %v10965_v37 = vmov 0  ;;  %v730_v56 = vmul.f32 1.442695, %v683_v19  ;;  %5359 = vmatpush3.bf16.msra.mxu1 %v5524_v29 }
 0x12c   : > { %v6208_v10 = vpop.f32.mrb[19].mxu0  ;;  %v10966_v37 = vsel %vm6216_vm7, 4294967295, %v10965_v37  ;;  %5575 = vrcp.f32 %v771_v5  ;;  %v6222_v61 = vmul.f32 %v5560_v16, %v6024_v32  ;;  %10969 = vst [vmem:[#allocation31_spill] sm:$0xff] %v6225_v48  ;;  %v927_v52 = vrot.slane %v6192_v36, 1  ;;  %v5562_v31 = vpop.eup %5561 }
 0x12d   : > { %10960 = vst [vmem:[#allocation26_spill] sm:$0xff] %v6199_v44  ;;  %10967 = vst [vmem:[#allocation29_spill] sm:$0xff] %v10966_v37  ;;  %5577 = vpow2.f32 %v728_v50  ;;  %v1056_v6 = vrot.slane %v6192_v36, 7  ;;  %v10589_v5 = vrot.slane %v6199_v44, 1  ;;  %v1055_v15 = vrot.slane %v6199_v44, 7 }
 0x12e   : > { %10968 = vst [vmem:[#allocation30_spill] sm:$0xff] %v6222_v61  ;;  %v1249_v32 = vrot.slane %v6192_v36, 2  ;;  %v6236_v50 = vmul.f32 1.442695, %v681_v27  ;;  %v6239_v16 = vadd.s32 192, %v6035_v43  ;;  %v1377_v9 = vrot.slane %v6199_v44, 6 }
 0x12f   : > { %v987_v13 = vsel %vm10638_vm0, %v10589_v5, %v927_v52  ;;  %v1116_v22 = vsel %vm10635_vm1, %v1055_v15, %v1056_v6  ;;  %v928_v26 = vrot.slane %v6222_v61, 1  ;;  %v10971_v29 = vrot.slane %v6212_v11, 7 }
 0x130   : > { %10970 = vst [vmem:[#allocation32_spill] sm:$0xff] %v6239_v16  ;;  %v5564_v4 = vpop.eup %5563  ;;  %v1378_v16 = vrot.slane %v6192_v36, 6  ;;  %v1023_v55 = vsel %vm6163_vm2, %v987_v13, -1e+30  ;;  %v774_v45 = vadd.f32 1.0, %v5562_v31  ;;  %v10972_v42 = vrot.slane %v6199_v44, 2 }
 0x131   : > { %v6249_v19 = vpop.f32.mrb[20].mxu0  ;;  %v5566_v27 = vpop.eup %5565  ;;  %v1117_v46 = vsel %vm10635_vm1, %v10971_v29, %v1055_v15  ;;  %v1153_v60 = vsel %vm6176_vm4, %v1116_v22, -1e+30  ;;  %v6275_v17 = vmul.f32 %v5564_v4, %v6044_v49  ;;  %v10974_v13 = vand.u32 15, %v6058_v57 }
 0x132   : > { %v6255_v1 = vpop.f32.mrb[21].mxu0  ;;  %v6257_v5 = vpop.eup %5567  ;;  %v1309_v53 = vsel %vm10637_vm3, %v10972_v42, %v1249_v32  ;;  %v10978_v15 = vand.u32 15, %v6061_v58  ;;  %v10979_v31 = vmov 0  ;;  %5579 = vpow2.f32 %v724_v51 }
 0x133   : > { %v6266_v48 = vpop.f32.mrb[22].mxu0  ;;  %v5570_v7 = vpop.eup %5569  ;;  %10973 = vst [vmem:[#allocation33_spill] sm:$0xff] %v6275_v17  ;;  %vm6279_vm8 = vcmp.lt.s32.totalorder %v10974_v13, 15  ;;  %v1057_v49 = vrot.slane %v6222_v61, 7  ;;  %v1250_v42 = vrot.slane %v6222_v61, 2  ;;  %v1438_v4 = vsel %vm10636_vm5, %v1377_v9, %v1378_v16 }
 0x134   : > { %v10976_v41 = vsel %vm6279_vm8, 4294967295, %v10975_v41  ;;  %vm6285_vm9 = vcmp.ge.s32.totalorder %v10978_v15, 1  ;;  %v6289_v22 = vpop.f32.mrb[23].mxu0  ;;  %v6291_v29 = vpop.eup %5571  ;;  %v10983_v13 = vand.u32 15, %v6068_v62  ;;  %v10984_v20 = vmov 0 }
 0x135   : > { %10977 = vst [vmem:[#allocation34_spill] sm:$0xff] %v10976_v41  ;;  %v10980_v31 = vsel %vm6285_vm9, 4294967295, %v10979_v31  ;;  %10982 = vst [vmem:[#allocation36_spill] sm:$0xff] %v6289_v22  ;;  %v6303_v15 = vadd.f32 1.0, %v5566_v27  ;;  %v5574_v51 = vpop.eup %5573  ;;  %v986_v39 = vsel %vm10638_vm0, %v927_v52, %v928_v26  ;;  %v10618_v24 = vrot.slane %v6222_v61, 6 }
 0x136   : > { %10981 = vst [vmem:[#allocation35_spill] sm:$0xff] %v10980_v31  ;;  %vm6299_vm10 = vcmp.lt.s32.totalorder %v10983_v13, 15  ;;  %v1184_v0 = vmax.f32 %v1023_v55, %v1117_v46  ;;  %5581 = vpow2.f32 %v730_v56  ;;  %v5576_v30 = vpop.eup %5575  ;;  %v1185_v38 = vmax.f32 %v986_v39, %v1153_v60 }
 0x137   : > { %v10985_v20 = vsel %vm6299_vm10, 4294967295, %v10984_v20  ;;  %v1345_v35 = vsel %vm6203_vm6, %v1309_v53, -1e+30  ;;  %v6311_v13 = vmul.f32 %v5570_v7, %v6041_v47  ;;  %v6315_v27 = vadd.f32 %v6181_v21, %v6014_v25  ;;  %v6317_v33 = vpop.eup %5577 }
 0x138   : > { %10986 = vst [vmem:[#allocation37_spill] sm:$0xff] %v10985_v20  ;;  %v10988_v52 = vrot.slane %v6212_v11, 6  ;;  %v1475_v39 = vsel %vm6216_vm7, %v1438_v4, -1e+30  ;;  %v929_v55 = vrot.slane %v6275_v17, 1  ;;  %v1058_v53 = vrot.slane %v6275_v17, 7 }
 0x139   : > { %10987 = vst [vmem:[#allocation38_spill] sm:$0xff] %v6311_v13  ;;  %v10989_v47 = vand.u32 15, %v6071_v63  ;;  %v10990_v7 = vmov 0  ;;  %v1115_v60 = vsel %vm10635_vm1, %v1056_v6, %v1057_v49  ;;  %v1308_v21 = vsel %vm10637_vm3, %v1249_v32, %v1250_v42  ;;  %v6356_v32 = vpop.f32.mrb[24].mxu0 }
 0x13a   : > { %v1439_v46 = vsel %vm10636_vm5, %v10988_v52, %v1377_v9  ;;  %v10993_v9 = vand.u32 15, %v6058_v57  ;;  %v10994_v56 = vmov 0  ;;  %v6344_v4 = vmul.f32 %v5574_v51, %v6064_v59  ;;  %11002 = vst [vmem:[#allocation43_spill] sm:$0xff] %v6356_v32  ;;  %v6387_v8 = vpop.f32.mrb[25].mxu0 }
 0x13b   : > { %vm6329_vm11 = vcmp.ge.s32.totalorder %v10989_v47, 1  ;;  %v10998_v52 = vand.u32 15, %v6068_v62  ;;  %v10999_v47 = vmov 0  ;;  %v6354_v6 = vadd.f32 %v6014_v25, %v6188_v18  ;;  %11013 = vst [vmem:[#allocation47_spill] sm:$0xff] %v6387_v8 }
 0x13c   : > { %v10991_v7 = vsel %vm6329_vm11, 4294967295, %v10990_v7  ;;  %vm6339_vm12 = vcmp.lt.s32.totalorder %v10993_v9, 14  ;;  %10997 = vst [vmem:[#allocation41_spill] sm:$0xff] %v6344_v4  ;;  %v6362_v57 = vsel %vm10636_vm5, %v1378_v16, %v10618_v24  ;;  %v11003_v59 = vrot.slane %v6199_v44, 1 }
 0x13d   : > { %10992 = vst [vmem:[#allocation39_spill] sm:$0xff] %v10991_v7  ;;  %v10995_v56 = vsel %vm6339_vm12, 4294967295, %v10994_v56  ;;  %vm6348_vm13 = vcmp.lt.s32.totalorder %v10998_v52, 14  ;;  %v11004_v62 = vrot.slane %v6212_v11, 1  ;;  %v1216_v9 = vmax.f32 %v6199_v44, %v1184_v0 }
 0x13e   : > { %10996 = vst [vmem:[#allocation40_spill] sm:$0xff] %v10995_v56  ;;  %v11000_v47 = vsel %vm6348_vm13, 4294967295, %v10999_v47  ;;  %v11006_v18 = vrot.slane %v6199_v44, 2  ;;  %v11007_v52 = vrot.slane %v6212_v11, 2  ;;  %v11009_v16 = vand.u32 15, %v6061_v58 }
 0x13f   : > { %11001 = vst [vmem:[#allocation42_spill] sm:$0xff] %v11000_v47  ;;  %v6370_v51 = vsel %vm10638_vm0, %v11004_v62, %v11003_v59  ;;  %v11010_v24 = vmov 0  ;;  %v1217_v59 = vmax.f32 %v6192_v36, %v1185_v38  ;;  %v1506_v62 = vmax.f32 %v1345_v35, %v1439_v46 }
 0x140   : > { %11005 = vst [vmem:[#allocation44_spill] sm:$0xff] %v6370_v51  ;;  %v6379_v37 = vsel %vm10637_vm3, %v11007_v52, %v11006_v18  ;;  %vm6383_vm14 = vcmp.ge.s32.totalorder %v11009_v16, 2  ;;  %v1507_v0 = vmax.f32 %v1308_v21, %v1475_v39  ;;  %v931_v44 = vrot.slane %v6311_v13, 1  ;;  %v6391_v51 = vpop.f32.mrb[26].mxu0  ;;  %v5580_v39 = vpop.eup %5579 }
 0x141   : > { %11008 = vst [vmem:[#allocation45_spill] sm:$0xff] %v6379_v37  ;;  %v11011_v24 = vsel %vm6383_vm14, 4294967295, %v11010_v24  ;;  %11014 = vst [vmem:[#allocation48_spill] sm:$0xff] %v6391_v51  ;;  %v985_v18 = vsel %vm10638_vm0, %v928_v26, %v929_v55  ;;  %v1114_v58 = vsel %vm10635_vm1, %v1057_v49, %v1058_v53  ;;  %v1251_v52 = vrot.slane %v6275_v17, 2  ;;  %v6398_v16 = vpop.f32.mrb[27].mxu0  ;;  %v5582_v8 = vpop.eup %5581 }
 0x142   : > { %11012 = vst [vmem:[#allocation46_spill] sm:$0xff] %v11011_v24  ;;  %5583 = vrcp.f32 %v774_v45  ;;  %11015 = vst [vmem:[#allocation49_spill] sm:$0xff] %v6398_v16  ;;  %v1060_v37 = vrot.slane %v6311_v13, 7  ;;  %v6402_v35 = vmul.f32 %v5576_v30, %v6054_v54  ;;  %v930_v38 = vrot.slane %v6344_v4, 1  ;;  %v6437_v32 = vpop.f32.mrb[28].mxu0 }
 0x143   : > { %v1059_v46 = vrot.slane %v6344_v4, 7  ;;  %v1253_v26 = vrot.slane %v6311_v13, 2  ;;  %v1382_v21 = vrot.slane %v6311_v13, 6  ;;  %v1380_v49 = vrot.slane %v6275_v17, 6 }
 0x144   : > { %11016 = vst [vmem:[#allocation50_spill] sm:$0xff] %v6402_v35  ;;  %v1252_v45 = vrot.slane %v6344_v4, 2  ;;  %v6410_v36 = vmax.f32 %v1216_v9, %v1506_v62  ;;  %v1025_v11 = vsel %vm6279_vm8, %v985_v18, -1e+30  ;;  %v1155_v54 = vsel %vm6285_vm9, %v1114_v58, -1e+30 }
 0x145   : > { %v983_v30 = vsel %vm10638_vm0, %v930_v38, %v931_v44  ;;  %v11018_v16 = vand.u32 15, %v6071_v63  ;;  %v11019_v51 = vmov 0  ;;  %v1307_v9 = vsel %vm10637_vm3, %v1250_v42, %v1251_v52 }
 0x146   : > { %11017 = vst [vmem:[#allocation51_spill] sm:$0xff] %v6410_v36  ;;  %v1027_v62 = vsel %vm6299_vm10, %v983_v30, -1e+30  ;;  %v1112_v18 = vsel %vm10635_vm1, %v1059_v46, %v1060_v37  ;;  %v1113_v58 = vsel %vm10635_vm1, %v1058_v53, %v1059_v46  ;;  %v932_v31 = vrot.slane %v6402_v35, 1  ;;  %v6446_v46 = vpop.f32.mrb[29].mxu0 }
 0x147   : > { %vm6420_vm15 = vcmp.ge.s32.totalorder %v11018_v16, 2  ;;  %v984_v63 = vsel %vm10638_vm0, %v929_v55, %v930_v38  ;;  %v1188_v16 = vmax.f32 %v1027_v62, %v1113_v58  ;;  %v1305_v41 = vsel %vm10637_vm3, %v1252_v45, %v1253_v26 }
 0x148   : > { %v11020_v51 = vsel %vm6420_vm15, 4294967295, %v11019_v51  ;;  %v6439_v42 = vmax.f32 %v1217_v59, %v1507_v0  ;;  %v1186_v30 = vmax.f32 %v1025_v11, %v1115_v60  ;;  %v11023_v20 = vrot.slane %v6222_v61, 6  ;;  %v6453_v0 = vpop.f32.mrb[30].mxu0 }
 0x149   : > { %11021 = vst [vmem:[#allocation52_spill] sm:$0xff] %v11020_v51  ;;  %v1381_v53 = vrot.slane %v6344_v4, 6  ;;  %v1157_v55 = vsel %vm6329_vm11, %v1112_v18, -1e+30  ;;  %5585 = vrcp.f32 %v6303_v15  ;;  %v775_v38 = vadd.f32 1.0, %v6257_v5  ;;  %v6461_v58 = vpop.f32.mrb[31].mxu0 }
 0x14a   : > { %11022 = vst [vmem:[#allocation53_spill] sm:$0xff] %v6439_v42  ;;  %v1436_v22 = vsel %vm10636_vm5, %v11023_v20, %v1380_v49  ;;  %v773_v59 = vadd.f32 1.0, %v6291_v29  ;;  %v1347_v11 = vsel %vm6339_vm12, %v1307_v9, -1e+30  ;;  %v1187_v60 = vmax.f32 %v984_v63, %v1155_v54 }
 0x14b   : > { %v1349_v20 = vsel %vm6348_vm13, %v1305_v41, -1e+30  ;;  %v1435_v62 = vsel %vm10636_vm5, %v1380_v49, %v1381_v53  ;;  %v1477_v15 = vsel %vm6383_vm14, %v1436_v22, -1e+30  ;;  %v982_v5 = vsel %vm10638_vm0, %v931_v44, %v932_v31 }
 0x14c   : > { %v10647_v29 = vrot.slane %v6402_v35, 7  ;;  %v1220_v54 = vmax.f32 %v6344_v4, %v1188_v16  ;;  %v5584_v9 = vpop.eup %5583  ;;  %v1218_v41 = vmax.f32 %v6222_v61, %v1186_v30  ;;  %v1254_v18 = vrot.slane %v6402_v35, 2 }
 0x14d   : > { %v10646_v49 = vrot.slane %v6402_v35, 6  ;;  %v1189_v63 = vmax.f32 %v982_v5, %v1157_v55  ;;  %v1306_v22 = vsel %vm10637_vm3, %v1251_v52, %v1252_v45  ;;  %v1434_v24 = vsel %vm10636_vm5, %v1381_v53, %v1382_v21 }
 0x14e   : > { %v1510_v47 = vmax.f32 %v1349_v20, %v1435_v62  ;;  %5587 = vrcp.f32 %v773_v59  ;;  %v1508_v44 = vmax.f32 %v1347_v11, %v6362_v57  ;;  %v1219_v16 = vmax.f32 %v6275_v17, %v1187_v60 }
 0x14f   : > { %5589 = vrcp.f32 %v775_v38  ;;  %v778_v30 = vadd.f32 1.0, %v6317_v33  ;;  %v6485_v55 = vsel %vm10635_vm1, %v1060_v37, %v10647_v29  ;;  %v6490_v52 = vmul.f32 %v5584_v9, %v6087_v14 }
 0x150   : > { %v6487_v5 = vmax.f32 %v1220_v54, %v1510_v47  ;;  %v776_v45 = vadd.f32 1.0, %v5580_v39  ;;  %v1304_v57 = vsel %vm10637_vm3, %v1253_v26, %v1254_v18  ;;  %v1479_v33 = vsel %vm6420_vm15, %v1434_v24, -1e+30 }
 0x151   : > { %11025 = vst [vmem:[#allocation55_spill] sm:$0xff] %v6490_v52  ;;  %v1509_v53 = vmax.f32 %v1306_v22, %v1477_v15  ;;  %v6500_v38 = vadd.f32 %v6194_v12, %v6014_v25  ;;  %v6502_v37 = vmax.f32 %v1218_v41, %v1508_v44  ;;  %v6508_v14 = vsel %vm10636_vm5, %v1382_v21, %v10646_v49 }
 0x152   : > { %11024 = vst [vmem:[#allocation54_spill] sm:$0xff] %v6487_v5  ;;  %v1221_v47 = vmax.f32 %v6311_v13, %v1189_v63  ;;  %v11027_v39 = vand.u32 15, %v6075_v2  ;;  %v11028_v26 = vmov 0  ;;  %v779_v24 = vadd.f32 1.0, %v5582_v8  ;;  %v11061_v13 = vld [vmem:[#allocation7_spill] sm:$0xff] }
 0x153   : > { %11026 = vst [vmem:[#allocation56_spill] sm:$0xff] %v6502_v37  ;;  %v6517_v59 = vmax.f32 %v1219_v16, %v1509_v53  ;;  %5591 = vrcp.f32 %v778_v30  ;;  %v686_v12 = vsub.f32 0.0, %v6315_v27  ;;  %v6522_v11 = vadd.f32 %v6014_v25, %v6208_v10  ;;  %v5586_v21 = vpop.eup %5585 }
 0x154   : > { %vm6513_vm1 = vcmp.lt.s32.totalorder %v11027_v39, 15  ;;  %v1511_v60 = vmax.f32 %v1304_v57, %v1479_v33  ;;  %v1700_v20 = vmax.f32 %v6487_v5, %v6410_v36  ;;  %v11032_v15 = vmov %v11027_v39  ;;  %v11128_v5 = vld [vmem:[#allocation47_spill] sm:$0xff] }
 0x155   : > { %v11029_v26 = vsel %vm6513_vm1, 4294967295, %v11028_v26  ;;  %11031 = vst [vmem:[#allocation58_spill] sm:$0xff] %v6517_v59  ;;  %vm6529_vm5 = vcmp.lt.s32.totalorder %v11032_v15, 14  ;;  %v11033_v8 = vmov 0  ;;  %5593 = vrcp.f32 %v776_v45 }
 0x156   : > { %11030 = vst [vmem:[#allocation57_spill] sm:$0xff] %v11029_v26  ;;  %v11034_v8 = vsel %vm6529_vm5, 4294967295, %v11033_v8  ;;  %v6534_v54 = vmul.f32 %v5586_v21, %v6092_v23  ;;  %v684_v10 = vsub.f32 0.0, %v6354_v6  ;;  %v687_v9 = vsub.f32 0.0, %v6500_v38 }
 0x157   : > { %11035 = vst [vmem:[#allocation59_spill] sm:$0xff] %v11034_v8  ;;  %v6540_v41 = vadd.f32 %v6249_v19, %v6014_v25  ;;  %5595 = vrcp.f32 %v779_v24  ;;  %v6546_v22 = vadd.f32 %v6014_v25, %v6255_v1  ;;  %v11037_v44 = vand.u32 15, %v6078_v3  ;;  %v5526_v1 = vld [vmem:[%s10574_s4] sm:$0xff]  }
 0x158   : > { %11036 = vst [vmem:[#allocation60_spill] sm:$0xff] %v6534_v54  ;;  %v10645_v23 = vrot.slane %v6534_v54, 1  ;;  %v11038_v16 = vmov 0  ;;  %v736_v30 = vmul.f32 1.442695, %v686_v12  ;;  %v685_v19 = vsub.f32 0.0, %v6522_v11  ;;  %v5588_v57 = vpop.eup %5587  ;;  %5192 = vmatprep.subr.bf16.mxu0 %v5526_v1 }
 0x159   : > { %vm6551_vm3 = vcmp.ge.s32.totalorder %v11037_v44, 1  ;;  %v6558_v45 = vadd.f32 %v6266_v48, %v6014_v25  ;;  %v6563_v33 = vmax.f32 %v1221_v47, %v1511_v60  ;;  %v6566_v53 = vmax.f32 %v6502_v37, %v1700_v20  ;;  %v5590_v48 = vpop.eup %5589  ;;  %5193 = vmatpush3.bf16.msra.mxu0 %v5526_v1  ;;  %v11059_v1 = vld [vmem:[#allocation6_spill] sm:$0xff] }
 0x15a   : > { %v11039_v16 = vsel %vm6551_vm3, 4294967295, %v11038_v16  ;;  %v10649_v24 = vrot.slane %v6534_v54, 2  ;;  %v11043_v12 = vand.u32 15, %v6095_v28  ;;  %v11044_v21 = vmov 0 }
 0x15b   : > { %11040 = vst [vmem:[#allocation61_spill] sm:$0xff] %v11039_v16  ;;  %11041 = vst [vmem:[#allocation62_spill] sm:$0xff] %v6563_v33  ;;  %v11047_v15 = vand.u32 15, %v6101_v34  ;;  %v11048_v44 = vmov 0  ;;  %5597 = vpow2.f32 %v6236_v50  ;;  %v732_v47 = vmul.f32 1.442695, %v684_v10 }
 0x15c   : > { %11042 = vst [vmem:[#allocation63_spill] sm:$0xff] %v6566_v53  ;;  %vm6572_vm0 = vcmp.lt.s32.totalorder %v11043_v12, 15  ;;  %v738_v60 = vmul.f32 1.442695, %v687_v9  ;;  %v690_v20 = vsub.f32 0.0, %v6540_v41  ;;  %vm11051_vm7 = vcmp.lt.s32.totalorder %v6035_v43, 7 }
 0x15d   : > { %v11045_v21 = vsel %vm6572_vm0, 4294967295, %v11044_v21  ;;  %vm6578_vm14 = vcmp.ge.s32.totalorder %v11047_v15, 1  ;;  %v981_v12 = vsel %vm11051_vm7, %v932_v31, %v10645_v23  ;;  %v11052_v39 = vand.u32 15, %v6078_v3  ;;  %v11057_v9 = vld [vmem:[#allocation36_spill] sm:$0xff] }
 0x15e   : > { %11046 = vst [vmem:[#allocation64_spill] sm:$0xff] %v11045_v21  ;;  %v11049_v44 = vsel %vm6578_vm14, 4294967295, %v11048_v44  ;;  %v11053_v15 = vmov 0  ;;  %v6597_v50 = vmul.f32 %v5588_v57, %v6111_v40  ;;  %v688_v10 = vsub.f32 0.0, %v6546_v22 }
 0x15f   : > { %11050 = vst [vmem:[#allocation65_spill] sm:$0xff] %v11049_v44  ;;  %vm6592_vm13 = vcmp.ge.s32.totalorder %v11052_v39, 2  ;;  %v6602_v2 = vadd.f32 %v6014_v25, %v11057_v9  ;;  %v1062_v63 = vrot.slane %v6534_v54, 7  ;;  %5599 = vpow2.f32 %v736_v30  ;;  %v5528_v39 = vld [vmem:[%s10574_s4 + $0x8] sm:$0xff]  }
 0x160   : > { %v11054_v15 = vsel %vm6592_vm13, 4294967295, %v11053_v15  ;;  %11056 = vst [vmem:[#allocation67_spill] sm:$0xff] %v6597_v50  ;;  %v734_v31 = vmul.f32 1.442695, %v685_v19  ;;  %v691_v3 = vsub.f32 0.0, %v6558_v45  ;;  %vm11058_vm7 = vcmp.lt.s32.totalorder %v6035_v43, 6  ;;  %v5592_v19 = vpop.eup %5591  ;;  %5194 = vmatprep.subr.bf16.mxu0 %v5528_v39 }
 0x161   : > { %11055 = vst [vmem:[#allocation66_spill] sm:$0xff] %v11054_v15  ;;  %v1303_v40 = vsel %vm11058_vm7, %v1254_v18, %v10649_v24  ;;  %v6617_v9 = vmul.f32 %v5590_v48, %v11059_v1  ;;  %v934_v30 = vrot.slane %v6597_v50, 1  ;;  %v1029_v23 = vsel %vm6513_vm1, %v981_v12, -1e+30  ;;  %v5594_v29 = vpop.eup %5593  ;;  %v11066_v12 = vld [vmem:[#allocation43_spill] sm:$0xff]  ;;  %5195 = vmatpush3.bf16.msra.mxu0 %v5528_v39 }
 0x162   : > { %v1063_v62 = vrot.slane %v6597_v50, 7  ;;  %5601 = vpow2.f32 %v732_v47  ;;  %v6623_v49 = vmul.f32 1.442695, %v690_v20  ;;  %v11062_v18 = vand.u32 15, %v11061_v13  ;;  %v5529_v39 = vld [vmem:[%s10574_s4 + $0x10] sm:$0xff]  }
 0x163   : > { %11060 = vst [vmem:[#allocation36_spill] sm:$0xff] %v6617_v9  ;;  %v11063_v24 = vmov 0  ;;  %5603 = vpow2.f32 %v738_v60  ;;  %v6631_v48 = vmul.f32 1.442695, %v688_v10  ;;  %v6636_v57 = vadd.f32 %v11066_v12, %v6014_v25  ;;  %v5596_v12 = vpop.eup %5595  ;;  %5196 = vmatprep.subr.bf16.mxu0 %v5529_v39 }
 0x164   : > { %vm6627_vm7 = vcmp.lt.s32.totalorder %v11062_v18, 15  ;;  %v11067_v47 = vrot.slane %v6402_v35, 7  ;;  %vm11068_vm12 = vcmp.lt.s32.totalorder %v6035_v43, 1  ;;  %v1351_v18 = vsel %vm6529_vm5, %v1303_v40, -1e+30 }
 0x165   : > { %v11064_v24 = vsel %vm6627_vm7, 4294967295, %v11063_v24  ;;  %v11069_v4 = vand.u32 15, %v11061_v13  ;;  %v11070_v60 = vmov 0  ;;  %5605 = vpow2.f32 %v734_v31  ;;  %5197 = vmatpush3.bf16.msra.mxu0 %v5529_v39  ;;  %v5530_v39 = vld [vmem:[%s10574_s4 + $0x18] sm:$0xff]  }
 0x166   : > { %11065 = vst [vmem:[#allocation6_spill] sm:$0xff] %v11064_v24  ;;  %v1110_v20 = vsel %vm11068_vm12, %v11067_v47, %v1062_v63  ;;  %v6650_v10 = vmul.f32 1.442695, %v691_v3  ;;  %v6656_v1 = vmax.f32 %v1029_v23, %v6485_v55  ;;  %v11073_v47 = vrot.slane %v6534_v54, 6  ;;  %5198 = vmatprep.subr.bf16.mxu0 %v5530_v39 }
 0x167   : > { %vm6646_vm6 = vcmp.lt.s32.totalorder %v11069_v4, 14  ;;  %v11074_v40 = vrot.slane %v6402_v35, 6  ;;  %vm11075_vm12 = vcmp.lt.s32.totalorder %v6035_v43, 2  ;;  %v936_v4 = vrot.slane %v6617_v9, 1 }
 0x168   : > { %v11071_v60 = vsel %vm6646_vm6, 4294967295, %v11070_v60  ;;  %v11076_v31 = vrot.slane %v6490_v52, 1  ;;  %vm11077_vm9 = vcmp.lt.s32.totalorder %v6035_v43, 7  ;;  %v1258_v55 = vrot.slane %v6617_v9, 2 }
 0x169   : > { %11072 = vst [vmem:[#allocation7_spill] sm:$0xff] %v11071_v60  ;;  %v6664_v13 = vsel %vm11075_vm12, %v11074_v40, %v11073_v47  ;;  %v11078_v61 = vrot.slane %v6490_v52, 7  ;;  %vm11079_vm4 = vcmp.lt.s32.totalorder %v6035_v43, 1  ;;  %v1159_v47 = vsel %vm6551_vm3, %v1110_v20, -1e+30  ;;  %5199 = vmatpush3.bf16.msra.mxu0 %v5530_v39 }
 0x16a   : > { %v979_v3 = vsel %vm11077_vm9, %v934_v30, %v11076_v31  ;;  %v6681_v40 = vmax.f32 %v1351_v18, %v6508_v14  ;;  %v11080_v31 = vrot.slane %v6534_v54, 1  ;;  %v1256_v8 = vrot.slane %v6597_v50, 2  ;;  %v11085_v18 = vld [vmem:[#allocation15_spill] sm:$0xff] }
 0x16b   : > { %v1108_v56 = vsel %vm11079_vm4, %v1063_v62, %v11078_v61  ;;  %v11081_v23 = vand.u32 15, %v6095_v28  ;;  %v11082_v26 = vmov 0  ;;  %v5598_v61 = vpop.eup %5597  ;;  %v1031_v20 = vsel %vm6572_vm0, %v979_v3, -1e+30  ;;  %v6707_v28 = vld [vmem:[%s10575_s5] sm:$0xff]  }
 0x16c   : > { %v980_v17 = vsel %vm11077_vm9, %v11080_v31, %v934_v30  ;;  %v1109_v14 = vsel %vm11079_vm4, %v1062_v63, %v1063_v62  ;;  %v6699_v16 = vmul.f32 %v5594_v29, %v11085_v18  ;;  %v11086_v30 = vld [vmem:[#allocation17_spill] sm:$0xff]  ;;  %v11087_v62 = vrot.slane %v6490_v52, 1  ;;  %v5600_v18 = vpop.eup %5599  ;;  %5272 = vmatprep.subr.bf16.mxu1 %v6707_v28 }
 0x16d   : > { %vm6690_vm12 = vcmp.lt.s32.totalorder %v11081_v23, 14  ;;  %v6702_v31 = vmul.f32 %v5596_v12, %v11086_v30  ;;  %v1161_v63 = vsel %vm6578_vm14, %v1108_v56, -1e+30  ;;  %v11088_v12 = vld [vmem:[#allocation14_spill] sm:$0xff]  ;;  %v1481_v30 = vsel %vm6592_vm13, %v6664_v13, -1e+30  ;;  %v5602_v7 = vpop.eup %5601 }
 0x16e   : > { %v11083_v26 = vsel %vm6690_vm12, 4294967295, %v11082_v26  ;;  %v978_v29 = vsel %vm11077_vm9, %v11087_v62, %v936_v4  ;;  %v6721_v23 = vmul.f32 %v5592_v19, %v11088_v12  ;;  %v11089_v21 = vrot.slane %v6617_v9, 7 }
 0x16f   : > { %11084 = vst [vmem:[#allocation43_spill] sm:$0xff] %v11083_v26  ;;  %v11090_v3 = vrot.slane %v6490_v52, 7  ;;  %v11091_v62 = vrot.slane %v6490_v52, 2  ;;  %vm11092_vm9 = vcmp.lt.s32.totalorder %v6035_v43, 6  ;;  %v11093_v19 = vrot.slane %v6617_v9, 6 }
 0x170   : > { %v11094_v12 = vrot.slane %v6490_v52, 6  ;;  %vm11095_vm14 = vcmp.lt.s32.totalorder %v6035_v43, 2  ;;  %v6745_v44 = vmax.f32 %v980_v17, %v1159_v47  ;;  %v6747_v15 = vmax.f32 %v1031_v20, %v1109_v14  ;;  %v11100_v14 = vld [vmem:[#allocation5_spill] sm:$0xff] }
 0x171   : > { %v1107_v51 = vsel %vm11079_vm4, %v11090_v3, %v11089_v21  ;;  %v6736_v56 = vsel %vm11092_vm9, %v11091_v62, %v1258_v55  ;;  %v11096_v21 = vmov %v11091_v62  ;;  %vm11097_vm4 = vmmov %vm11092_vm9  ;;  %v6756_v53 = vmax.f32 %v978_v29, %v1161_v63  ;;  %5232 = vmatprep.subr.bf16.mxu0 %v11100_v14 }
 0x172   : > { %v1429_v13 = vsel %vm11095_vm14, %v11094_v12, %v11093_v19  ;;  %v6753_v3 = vsel %vm11097_vm4, %v1256_v8, %v11096_v21  ;;  %v11098_v19 = vrot.slane %v6534_v54, 2  ;;  %vm11099_vm14 = vmmov %vm11097_vm4  ;;  %v10686_v47 = vrot.slane %v6699_v16, 2  ;;  %v5604_v12 = vpop.eup %5603 }
 0x173   : > { %v1385_v21 = vrot.slane %v6597_v50, 6  ;;  %v11101_v39 = vrot.slane %v6699_v16, 1  ;;  %vm11102_vm9 = vcmp.lt.s32.totalorder %v6035_v43, 7  ;;  %v5606_v36 = vpop.eup %5605  ;;  %v11108_v14 = vrot.slane %v6721_v23, 1 }
 0x174   : > { %v1302_v17 = vsel %vm11099_vm14, %v11098_v19, %v1256_v8  ;;  %v11103_v8 = vand.u32 15, %v6101_v34  ;;  %v11104_v19 = vmov 0  ;;  %v11109_v24 = vrot.slane %v6702_v31, 7 }
 0x175   : > { %v977_v29 = vsel %vm11102_vm9, %v936_v4, %v11101_v39  ;;  %v1299_v4 = vsel %vm11099_vm14, %v1258_v55, %v10686_v47  ;;  %v11110_v33 = vrot.slane %v6721_v23, 7  ;;  %vm11111_vm14 = vcmp.lt.s32.totalorder %v6035_v43, 1 }
 0x176   : > { %vm6774_vm4 = vcmp.ge.s32.totalorder %v11103_v8, 2  ;;  %v1033_v62 = vsel %vm6627_vm7, %v977_v29, -1e+30  ;;  %v1355_v34 = vsel %vm6646_vm6, %v1299_v4, -1e+30  ;;  %v11107_v8 = vrot.slane %v6702_v31, 1 }
 0x177   : > { %v11105_v19 = vsel %vm6774_vm4, 4294967295, %v11104_v19  ;;  %v1194_v63 = vmax.f32 %v1033_v62, %v1107_v51  ;;  %v1516_v29 = vmax.f32 %v1355_v34, %v1429_v13  ;;  %v6803_v55 = vsel %vm11111_vm14, %v11110_v33, %v11109_v24 }
 0x178   : > { %11106 = vst [vmem:[#allocation15_spill] sm:$0xff] %v11105_v19  ;;  %v6795_v20 = vsel %vm11102_vm9, %v11108_v14, %v11107_v8  ;;  %v10695_v51 = vrot.slane %v6702_v31, 2  ;;  %v10698_v62 = vrot.slane %v6702_v31, 6  ;;  %v777_v47 = vadd.f32 1.0, %v5598_v61  ;;  %v11112_v14 = vld [vmem:[#allocation8_spill] sm:$0xff] }
 0x179   : > { %v1226_v4 = vmax.f32 %v6617_v9, %v1194_v63  ;;  %v782_v39 = vadd.f32 1.0, %v5600_v18  ;;  %v780_v60 = vadd.f32 1.0, %v5602_v7  ;;  %v1353_v13 = vsel %vm6690_vm12, %v6753_v3, -1e+30 }
 0x17a   : > { %v11113_v34 = vand.u32 15, %v11112_v14  ;;  %v11114_v8 = vmov 0  ;;  %v11118_v24 = vmov 0  ;;  %v11121_v7 = vrot.slane %v6721_v23, 2 }
 0x17b   : > { %vm11122_vm6 = vcmp.lt.s32.totalorder %v6035_v43, 6  ;;  %v11123_v18 = vrot.slane %v6721_v23, 6  ;;  %vm11124_vm7 = vcmp.lt.s32.totalorder %v6035_v43, 2  ;;  %v783_v63 = vadd.f32 1.0, %v5604_v12 }
 0x17c   : > { %vm6813_vm9 = vcmp.ge.s32.totalorder %v11113_v34, 1  ;;  %v11117_v33 = vmov %v11113_v34  ;;  %v6829_v61 = vsel %vm11122_vm6, %v11121_v7, %v10695_v51  ;;  %v1223_v14 = vmax.f32 %v6534_v54, %v6745_v44  ;;  %vm11127_vm6 = vmmov %vm11124_vm7 }
 0x17d   : > { %v11115_v8 = vsel %vm6813_vm9, 4294967295, %v11114_v8  ;;  %vm6819_vm14 = vcmp.ge.s32.totalorder %v11117_v33, 2  ;;  %v6837_v3 = vsel %vm11124_vm7, %v11123_v18, %v10698_v62  ;;  %v6841_v34 = vmax.f32 %v1226_v4, %v1516_v29  ;;  %vm11130_vm7 = vmmov %vm11127_vm6  ;;  %v11133_v29 = vld [vmem:[#allocation49_spill] sm:$0xff]  ;;  %v11141_v4 = vld [vmem:[#allocation10_spill] sm:$0xff] }
 0x17e   : > { %11116 = vst [vmem:[#allocation17_spill] sm:$0xff] %v11115_v8  ;;  %v11119_v24 = vsel %vm6819_vm14, 4294967295, %v11118_v24  ;;  %5607 = vrcp.f32 %v777_v47  ;;  %v781_v33 = vadd.f32 1.0, %v5606_v36  ;;  %v11126_v26 = vrot.slane %v6490_v52, 6  ;;  %v11131_v36 = vld [vmem:[#allocation48_spill] sm:$0xff] }
 0x17f   : > { %11120 = vst [vmem:[#allocation14_spill] sm:$0xff] %v11119_v24  ;;  %11125 = vst [vmem:[#allocation5_spill] sm:$0xff] %v6841_v34  ;;  %5609 = vrcp.f32 %v782_v39  ;;  %v694_v51 = vsub.f32 0.0, %v6636_v57  ;;  %v6850_v18 = vadd.f32 %v6014_v25, %v11128_v5  ;;  %v11129_v12 = vrot.slane %v6534_v54, 6  ;;  %v11136_v54 = vld [vmem:[#allocation9_spill] sm:$0xff] }
 0x180   : > { %v1430_v7 = vsel %vm11127_vm6, %v1385_v21, %v11126_v26  ;;  %5611 = vrcp.f32 %v780_v60  ;;  %v6858_v47 = vadd.f32 %v11131_v36, %v6014_v25  ;;  %v6862_v26 = vadd.f32 %v6014_v25, %v11133_v29 }
 0x181   : > { %v1431_v44 = vsel %vm11130_vm7, %v11129_v12, %v1385_v21  ;;  %5613 = vrcp.f32 %v783_v63  ;;  %v692_v5 = vsub.f32 0.0, %v6850_v18  ;;  %v1513_v62 = vmax.f32 %v1302_v17, %v1481_v30 }
 0x182   : > { %11132 = vst [vmem:[#allocation8_spill] sm:$0xff] %v6858_v47  ;;  %11134 = vst [vmem:[#allocation47_spill] sm:$0xff] %v6862_v26  ;;  %5615 = vrcp.f32 %v781_v33  ;;  %v11135_v21 = vsub.f32 0.0, %v6602_v2  ;;  %v695_v12 = vsub.f32 0.0, %v6858_v47  ;;  %v1224_v36 = vmax.f32 %v6597_v50, %v6747_v15 }
 0x183   : > { %v11137_v25 = vand.u32 15, %v11136_v54  ;;  %v11138_v29 = vmov 0  ;;  %v11142_v63 = vand.u32 15, %v11141_v4  ;;  %v11143_v39 = vmov 0 }
 0x184   : > { %v742_v60 = vmul.f32 1.442695, %v11135_v21  ;;  %5617 = vpow2.f32 %v6623_v49  ;;  %v752_v30 = vmul.f32 1.442695, %v694_v51  ;;  %v693_v17 = vsub.f32 0.0, %v6862_v26 }
 0x185   : > { %vm6874_vm6 = vcmp.lt.s32.totalorder %v11137_v25, 15  ;;  %vm6880_vm7 = vcmp.ge.s32.totalorder %v11142_v63, 1  ;;  %v1483_v15 = vsel %vm6774_vm4, %v1430_v7, -1e+30  ;;  %v1514_v33 = vmax.f32 %v1353_v13, %v1431_v44 }
 0x186   : > { %v11139_v29 = vsel %vm6874_vm6, 4294967295, %v11138_v29  ;;  %v11144_v39 = vsel %vm6880_vm7, 4294967295, %v11143_v39  ;;  %v11146_v21 = vmov %v11137_v25  ;;  %v11147_v25 = vmov 0 }
 0x187   : > { %11140 = vst [vmem:[#allocation48_spill] sm:$0xff] %v11139_v29  ;;  %11145 = vst [vmem:[#allocation49_spill] sm:$0xff] %v11144_v39  ;;  %vm6890_vm13 = vcmp.lt.s32.totalorder %v11146_v21, 14  ;;  %5619 = vpow2.f32 %v6631_v48  ;;  %v748_v63 = vmul.f32 1.442695, %v692_v5  ;;  %v11150_v50 = vrot.slane %v6699_v16, 7 }
 0x188   : > { %v11148_v25 = vsel %vm6890_vm13, 4294967295, %v11147_v25  ;;  %v11151_v49 = vrot.slane %v6617_v9, 7  ;;  %vm11152_vm12 = vcmp.lt.s32.totalorder %v6035_v43, 1  ;;  %v11153_v19 = vrot.slane %v6699_v16, 6  ;;  %v11170_v5 = vld [vmem:[#allocation12_spill] sm:$0xff] }
 0x189   : > { %11149 = vst [vmem:[#allocation9_spill] sm:$0xff] %v11148_v25  ;;  %v11154_v13 = vrot.slane %v6617_v9, 6  ;;  %vm11155_vm4 = vcmp.lt.s32.totalorder %v6035_v43, 2  ;;  %5621 = vpow2.f32 %v6650_v10  ;;  %v754_v7 = vmul.f32 1.442695, %v695_v12 }
 0x18a   : > { %v1106_v51 = vsel %vm11152_vm12, %v11151_v49, %v11150_v50  ;;  %v11156_v48 = vmax.f32 %v6402_v35, %v6656_v1  ;;  %v11158_v50 = vand.u32 15, %v11141_v4  ;;  %v11159_v21 = vmov 0  ;;  %v5608_v1 = vpop.eup %5607 }
 0x18b   : > { %v1428_v54 = vsel %vm11155_vm4, %v11154_v13, %v11153_v19  ;;  %5623 = vpow2.f32 %v742_v60  ;;  %v750_v19 = vmul.f32 1.442695, %v693_v17  ;;  %v6923_v10 = vmax.f32 %v6736_v56, %v1483_v15  ;;  %v5610_v60 = vpop.eup %5609  ;;  %v11164_v17 = vld [vmem:[#allocation21_spill] sm:$0xff] }
 0x18c   : > { %v6912_v44 = vmax.f32 %v11156_v48, %v6681_v40  ;;  %vm6918_vm12 = vcmp.ge.s32.totalorder %v11158_v50, 2  ;;  %v6925_v12 = vmax.f32 %v1223_v14, %v1513_v62  ;;  %v6927_v49 = vmax.f32 %v1224_v36, %v1514_v33  ;;  %v6945_v14 = vld [vmem:[%s10572_s2] ss:$0 sm:$0xff] }
 0x18d   : > { %v11160_v21 = vsel %vm6918_vm12, 4294967295, %v11159_v21  ;;  %5625 = vpow2.f32 %v752_v30  ;;  %v1163_v40 = vsel %vm6813_vm9, %v1106_v51, -1e+30  ;;  %v1485_v4 = vsel %vm6819_vm14, %v1428_v54, -1e+30  ;;  %v5612_v30 = vpop.eup %5611 }
 0x18e   : > { %11157 = vst [vmem:[#allocation10_spill] sm:$0xff] %v6912_v44  ;;  %11161 = vst [vmem:[#allocation68_spill] sm:$0xff] %v11160_v21  ;;  %5627 = vpow2.f32 %v748_v63  ;;  %v6934_v13 = vadd.s32 200, %v6035_v43  ;;  %v6937_v56 = vmul.f32 %v5608_v1, %v11164_v17  ;;  %v6940_v62 = vadd.s32 208, %v6035_v43  ;;  %v5614_v51 = vpop.eup %5613 }
 0x18f   : > { %11162 = vst [vmem:[#allocation69_spill] sm:$0xff] %v6925_v12  ;;  %11163 = vst [vmem:[#allocation70_spill] sm:$0xff] %v6927_v49  ;;  %5629 = vpow2.f32 %v754_v7  ;;  %v6949_v36 = vadd.f32 %v6945_v14, %v6437_v32  ;;  %v6952_v15 = vmul.f32 %v5610_v60, %v6315_v27  ;;  %v6956_v33 = vadd.f32 %v6945_v14, %v6446_v46  ;;  %v5616_v27 = vpop.eup %5615 }
 0x190   : > { %5631 = vpow2.f32 %v750_v19  ;;  %v6960_v63 = vadd.f32 %v6945_v14, %v6453_v0  ;;  %v938_v54 = vrot.slane %v6937_v56, 1  ;;  %v1067_v7 = vrot.slane %v6937_v56, 7  ;;  %v11165_v0 = vld [vmem:[#allocation11_spill] sm:$0xff]  ;;  %v5618_v46 = vpop.eup %5617 }
 0x191   : > { %v1260_v32 = vrot.slane %v6937_v56, 2  ;;  %v1389_v48 = vrot.slane %v6937_v56, 6  ;;  %v11166_v60 = vand.u32 15, %v11165_v0  ;;  %v11167_v17 = vmov 0 }
 0x192   : > { %v11171_v9 = vand.u32 15, %v11170_v5  ;;  %v11172_v35 = vmov 0  ;;  %v11176_v19 = vmov 0  ;;  %v11179_v1 = vrot.slane %v6721_v23, 1 }
 0x193   : > { %vm6972_vm4 = vcmp.lt.s32.totalorder %v11166_v60, 15  ;;  %v11175_v50 = vmov %v11166_v60  ;;  %vm11180_vm3 = vcmp.lt.s32.totalorder %v6035_v43, 7  ;;  %v11181_v24 = vrot.slane %v6699_v16, 1 }
 0x194   : > { %v11168_v17 = vsel %vm6972_vm4, 4294967295, %v11167_v17  ;;  %vm6978_vm14 = vcmp.ge.s32.totalorder %v11171_v9, 1  ;;  %vm6984_vm9 = vcmp.lt.s32.totalorder %v11175_v50, 14  ;;  %v975_v60 = vsel %vm11180_vm3, %v938_v54, %v11179_v1  ;;  %vm11182_vm0 = vmmov %vm11180_vm3  ;;  %v5620_v1 = vpop.eup %5619 }
 0x195   : > { %11169 = vst [vmem:[#allocation21_spill] sm:$0xff] %v11168_v17  ;;  %v11173_v35 = vsel %vm6978_vm14, 4294967295, %v11172_v35  ;;  %v11177_v19 = vsel %vm6984_vm9, 4294967295, %v11176_v19  ;;  %v976_v9 = vsel %vm11182_vm0, %v11181_v24, %v938_v54  ;;  %v11183_v8 = vrot.slane %v6721_v23, 7 }
 0x196   : > { %11174 = vst [vmem:[#allocation11_spill] sm:$0xff] %v11173_v35  ;;  %11178 = vst [vmem:[#allocation12_spill] sm:$0xff] %v11177_v19  ;;  %vm11184_vm10 = vcmp.lt.s32.totalorder %v6035_v43, 1  ;;  %v11185_v50 = vrot.slane %v6699_v16, 7  ;;  %v11187_v12 = vand.u32 15, %v11170_v5  ;;  %v11188_v49 = vmov 0 }
 0x197   : > { %v1104_v0 = vsel %vm11184_vm10, %v1067_v7, %v11183_v8  ;;  %vm11186_vm8 = vmmov %vm11184_vm10  ;;  %v1035_v24 = vsel %vm6874_vm6, %v975_v60, -1e+30  ;;  %v1195_v44 = vmax.f32 %v976_v9, %v1163_v40  ;;  %v11191_v8 = vrot.slane %v6721_v23, 2 }
 0x198   : > { %v1105_v34 = vsel %vm11186_vm8, %v11185_v50, %v1067_v7  ;;  %vm7006_vm2 = vcmp.ge.s32.totalorder %v11187_v12, 2  ;;  %v1165_v54 = vsel %vm6880_vm7, %v1104_v0, -1e+30  ;;  %vm11192_vm0 = vcmp.lt.s32.totalorder %v6035_v43, 6  ;;  %v5622_v7 = vpop.eup %5621 }
 0x199   : > { %v11189_v49 = vsel %vm7006_vm2, 4294967295, %v11188_v49  ;;  %v1297_v59 = vsel %vm11192_vm0, %v1260_v32, %v11191_v8  ;;  %v1196_v50 = vmax.f32 %v1035_v24, %v1105_v34  ;;  %v1197_v5 = vmax.f32 %v6795_v20, %v1165_v54  ;;  %vm11194_vm3 = vmmov %vm11192_vm0  ;;  %v7025_v39 = vpop.eup %5623 }
 0x19a   : > { %11190 = vst [vmem:[#allocation71_spill] sm:$0xff] %v11189_v49  ;;  %v11193_v12 = vrot.slane %v6699_v16, 2  ;;  %v1357_v60 = vsel %vm6890_vm13, %v1297_v59, -1e+30  ;;  %v1227_v40 = vmax.f32 %v6699_v16, %v1195_v44  ;;  %v11195_v9 = vrot.slane %v6721_v23, 6  ;;  %v7036_v54 = vpop.eup %5625 }
 0x19b   : > { %vm11196_vm8 = vcmp.lt.s32.totalorder %v6035_v43, 2  ;;  %v11197_v34 = vrot.slane %v6699_v16, 6  ;;  %v1229_v59 = vmax.f32 %v6721_v23, %v1197_v5  ;;  %v7048_v29 = vpop.eup %5627  ;;  %v11205_v5 = vld [vmem:[#allocation16_spill] sm:$0xff]  ;;  %vm11223_vm7 = vcmp.lt.s32.totalorder %v6035_v43, 1 }
 0x19c   : > { %v1298_v37 = vsel %vm11194_vm3, %v11193_v12, %v1260_v32  ;;  %v1426_v0 = vsel %vm11196_vm8, %v1389_v48, %v11195_v9  ;;  %vm11198_vm10 = vmmov %vm11196_vm8  ;;  %v1228_v32 = vmax.f32 %v6937_v56, %v1196_v50  ;;  %v11199_v12 = vld [vmem:[#allocation13_spill] sm:$0xff]  ;;  %v11201_v9 = vmov 0 }
 0x19d   : > { %v1427_v20 = vsel %vm11198_vm10, %v11197_v34, %v1389_v48  ;;  %v1517_v24 = vmax.f32 %v1298_v37, %v1485_v4  ;;  %v1487_v44 = vsel %vm6918_vm12, %v1426_v0, -1e+30  ;;  %v11200_v25 = vand.u32 15, %v11199_v12 }
 0x19e   : > { %v1518_v8 = vmax.f32 %v1357_v60, %v1427_v20  ;;  %v1519_v37 = vmax.f32 %v6829_v61, %v1487_v44  ;;  %v7054_v48 = vmul.f32 %v5612_v30, %v6354_v6  ;;  %v7057_v50 = vmul.f32 %v5614_v51, %v6500_v38 }
 0x19f   : > { %vm7044_vm0 = vcmp.lt.s32.totalorder %v11200_v25, 15  ;;  %v7051_v4 = vmax.f32 %v1227_v40, %v1517_v24  ;;  %v11206_v60 = vand.u32 15, %v11205_v5  ;;  %v11207_v0 = vmov 0  ;;  %v7065_v25 = vpop.eup %5629 }
 0x1a0   : > { %v11202_v9 = vsel %vm7044_vm0, 4294967295, %v11201_v9  ;;  %v7067_v34 = vmax.f32 %v1228_v32, %v1518_v8  ;;  %v7070_v61 = vmul.f32 %v5616_v27, %v6522_v11  ;;  %v11211_v40 = vand.u32 15, %v11199_v12  ;;  %v7078_v51 = vpop.eup %5631 }
 0x1a1   : > { %11203 = vst [vmem:[#allocation13_spill] sm:$0xff] %v11202_v9  ;;  %11204 = vst [vmem:[#allocation72_spill] sm:$0xff] %v7051_v4  ;;  %vm7061_vm3 = vcmp.ge.s32.totalorder %v11206_v60, 1  ;;  %v11212_v6 = vmov 0  ;;  %v786_v38 = vadd.f32 1.0, %v5618_v46  ;;  %v784_v30 = vadd.f32 1.0, %v5620_v1 }
 0x1a2   : > { %v11208_v0 = vsel %vm7061_vm3, 4294967295, %v11207_v0  ;;  %11210 = vst [vmem:[#allocation73_spill] sm:$0xff] %v7067_v34  ;;  %vm7074_vm8 = vcmp.lt.s32.totalorder %v11211_v40, 14  ;;  %v7080_v20 = vmax.f32 %v1229_v59, %v1519_v37  ;;  %v941_v24 = vrot.slane %v7054_v48, 1 }
 0x1a3   : > { %11209 = vst [vmem:[#allocation16_spill] sm:$0xff] %v11208_v0  ;;  %v11213_v6 = vsel %vm7074_vm8, 4294967295, %v11212_v6  ;;  %v1070_v32 = vrot.slane %v7054_v48, 7  ;;  %v1263_v44 = vrot.slane %v7054_v48, 2  ;;  %v11216_v11 = vmov %v11206_v60 }
 0x1a4   : > { %11214 = vst [vmem:[#allocation74_spill] sm:$0xff] %v11213_v6  ;;  %11215 = vst [vmem:[#allocation75_spill] sm:$0xff] %v7080_v20  ;;  %vm7087_vm10 = vcmp.ge.s32.totalorder %v11216_v11, 2  ;;  %v11217_v27 = vmov 0  ;;  %v1392_v8 = vrot.slane %v7054_v48, 6  ;;  %v11220_v12 = vrot.slane %v6702_v31, 1 }
 0x1a5   : > { %v11218_v27 = vsel %vm7087_vm10, 4294967295, %v11217_v27  ;;  %vm11221_vm12 = vcmp.lt.s32.totalorder %v6035_v43, 7  ;;  %v11222_v60 = vrot.slane %v6702_v31, 7  ;;  %v11224_v40 = vrot.slane %v6702_v31, 2 }
 0x1a6   : > { %11219 = vst [vmem:[#allocation76_spill] sm:$0xff] %v11218_v27  ;;  %v973_v37 = vsel %vm11221_vm12, %v11220_v12, %v941_v24  ;;  %vm11225_vm13 = vcmp.lt.s32.totalorder %v6035_v43, 6  ;;  %v11226_v21 = vrot.slane %v6702_v31, 6  ;;  %v11229_v35 = vrot.slane %v6952_v15, 1 }
 0x1a7   : > { %v1102_v5 = vsel %vm11223_vm7, %v11222_v60, %v1070_v32  ;;  %v1295_v11 = vsel %vm11225_vm13, %v11224_v40, %v1263_v44  ;;  %v1037_v59 = vsel %vm6972_vm4, %v973_v37, -1e+30  ;;  %vm11227_vm7 = vcmp.lt.s32.totalorder %v6035_v43, 2  ;;  %vm11230_vm13 = vmmov %vm11221_vm12 }
 0x1a8   : > { %v1167_v1 = vsel %vm6978_vm14, %v1102_v5, -1e+30  ;;  %v1359_v12 = vsel %vm6984_vm9, %v1295_v11, -1e+30  ;;  %v1424_v60 = vsel %vm11227_vm7, %v11226_v21, %v1392_v8  ;;  %v1198_v20 = vmax.f32 %v1037_v59, %v6803_v55 }
 0x1a9   : > { %v1489_v40 = vsel %vm7006_vm2, %v1424_v60, -1e+30  ;;  %v1520_v46 = vmax.f32 %v1359_v12, %v6837_v3  ;;  %v11228_v37 = vrot.slane %v7057_v50, 1  ;;  %v11231_v11 = vrot.slane %v7057_v50, 7 }
 0x1aa   : > { %v11232_v19 = vrot.slane %v6952_v15, 7  ;;  %vm11233_vm12 = vcmp.lt.s32.totalorder %v6035_v43, 1  ;;  %v11234_v55 = vrot.slane %v7057_v50, 2  ;;  %v11235_v59 = vrot.slane %v6952_v15, 2 }
 0x1ab   : > { %v970_v5 = vsel %vm11230_vm13, %v11229_v35, %v11228_v37  ;;  %vm11236_vm7 = vcmp.lt.s32.totalorder %v6035_v43, 6  ;;  %v11237_v12 = vrot.slane %v7057_v50, 6  ;;  %v11238_v60 = vrot.slane %v6952_v15, 6 }
 0x1ac   : > { %v7134_v21 = vsel %vm11233_vm12, %v11232_v19, %v11231_v11  ;;  %v1292_v3 = vsel %vm11236_vm7, %v11235_v59, %v11234_v55  ;;  %vm11239_vm13 = vcmp.lt.s32.totalorder %v6035_v43, 2  ;;  %v942_v37 = vrot.slane %v7070_v61, 1 }
 0x1ad   : > { %v7148_v35 = vsel %vm11239_vm13, %v11238_v60, %v11237_v12  ;;  %v1230_v19 = vmax.f32 %v6702_v31, %v1198_v20  ;;  %v1071_v11 = vrot.slane %v7070_v61, 7  ;;  %v1264_v49 = vrot.slane %v7070_v61, 2 }
 0x1ae   : > { %v1393_v17 = vrot.slane %v7070_v61, 6  ;;  %v11240_v55 = vrot.slane %v6952_v15, 1  ;;  %vm11241_vm12 = vcmp.lt.s32.totalorder %v6035_v43, 7  ;;  %5633 = vrcp.f32 %v786_v38 }
 0x1af   : > { %vm11242_vm7 = vmmov %vm11241_vm12  ;;  %v787_v12 = vadd.f32 1.0, %v5622_v7  ;;  %v7161_v60 = vmax.f32 %v1230_v19, %v1520_v46  ;;  %v11243_v4 = vrot.slane %v6952_v15, 7  ;;  %vm11244_vm13 = vcmp.lt.s32.totalorder %v6035_v43, 1 }
 0x1b0   : > { %v971_v59 = vsel %vm11241_vm12, %v942_v37, %v11240_v55  ;;  %v972_v34 = vsel %vm11242_vm7, %v941_v24, %v942_v37  ;;  %vm11245_vm2 = vmmov %vm11244_vm13  ;;  %v11246_v7 = vrot.slane %v6952_v15, 2  ;;  %vm11247_vm12 = vcmp.lt.s32.totalorder %v6035_v43, 6 }
 0x1b1   : > { %v1039_v20 = vsel %vm7044_vm0, %v971_v59, -1e+30  ;;  %v1100_v42 = vsel %vm11244_vm13, %v1071_v11, %v11243_v4  ;;  %v1101_v26 = vsel %vm11245_vm2, %v1070_v32, %v1071_v11  ;;  %v1199_v47 = vmax.f32 %v972_v34, %v1167_v1  ;;  %vm11248_vm7 = vmmov %vm11247_vm12 }
 0x1b2   : > { %v1169_v55 = vsel %vm7061_vm3, %v1100_v42, -1e+30  ;;  %v1200_v24 = vmax.f32 %v1039_v20, %v1101_v26  ;;  %v1293_v38 = vsel %vm11247_vm12, %v1264_v49, %v11246_v7  ;;  %v1294_v37 = vsel %vm11248_vm7, %v1263_v44, %v1264_v49 }
 0x1b3   : > { %v1201_v46 = vmax.f32 %v970_v5, %v1169_v55  ;;  %v1361_v4 = vsel %vm7074_vm8, %v1293_v38, -1e+30  ;;  %v11249_v19 = vrot.slane %v6952_v15, 6  ;;  %vm11250_vm2 = vcmp.lt.s32.totalorder %v6035_v43, 2 }
 0x1b4   : > { %v1231_v42 = vmax.f32 %v7054_v48, %v1199_v47  ;;  %v1232_v26 = vmax.f32 %v7070_v61, %v1200_v24  ;;  %vm11251_vm13 = vmmov %vm11250_vm2  ;;  %v1521_v44 = vmax.f32 %v1294_v37, %v1489_v40  ;;  %5635 = vrcp.f32 %v784_v30 }
 0x1b5   : > { %v1422_v32 = vsel %vm11250_vm2, %v1393_v17, %v11249_v19  ;;  %v1423_v34 = vsel %vm11251_vm13, %v1392_v8, %v1393_v17  ;;  %v1233_v49 = vmax.f32 %v6952_v15, %v1201_v46  ;;  %v785_v59 = vadd.f32 1.0, %v7025_v39  ;;  %v11253_v46 = vld [vmem:[#allocation18_spill] sm:$0xff]  ;;  %v11258_v19 = vld [vmem:[#allocation19_spill] sm:$0xff] }
 0x1b6   : > { %v1491_v1 = vsel %vm7087_vm10, %v1422_v32, -1e+30  ;;  %v1522_v5 = vmax.f32 %v1361_v4, %v1423_v34  ;;  %v790_v20 = vadd.f32 1.0, %v7036_v54  ;;  %v788_v47 = vadd.f32 1.0, %v7048_v29  ;;  %v11268_v34 = vld [vmem:[#allocation32_spill] sm:$0xff] }
 0x1b7   : > { %v1523_v11 = vmax.f32 %v1292_v3, %v1491_v1  ;;  %v7195_v55 = vmax.f32 %v1231_v42, %v1521_v44  ;;  %5637 = vrcp.f32 %v787_v12  ;;  %v791_v8 = vadd.f32 1.0, %v7065_v25 }
 0x1b8   : > { %v7197_v24 = vmax.f32 %v1232_v26, %v1522_v5  ;;  %5639 = vrcp.f32 %v785_v59  ;;  %v789_v40 = vadd.f32 1.0, %v7078_v51  ;;  %v698_v30 = vsub.f32 0.0, %v6949_v36  ;;  %v5634_v3 = vpop.eup %5633 }
 0x1b9   : > { %v7199_v17 = vmax.f32 %v1233_v49, %v1523_v11  ;;  %5641 = vrcp.f32 %v790_v20  ;;  %v696_v39 = vsub.f32 0.0, %v6956_v33  ;;  %v7206_v54 = vadd.s32 216, %v6035_v43 }
 0x1ba   : > { %v7209_v29 = vadd.s32 224, %v6035_v43  ;;  %v11252_v12 = vmax.f32 %v6490_v52, %v6756_v53  ;;  %5643 = vrcp.f32 %v788_v47  ;;  %v699_v25 = vsub.f32 0.0, %v6960_v63 }
 0x1bb   : > { %v7219_v51 = vadd.s32 248, %v6035_v43  ;;  %v7222_v38 = vmul.f32 %v5634_v3, %v6540_v41  ;;  %v11254_v37 = vand.u32 15, %v11253_v46  ;;  %v11255_v4 = vmov 0  ;;  %v11267_v41 = vld [vmem:[#allocation31_spill] sm:$0xff] }
 0x1bc   : > { %v7215_v7 = vmax.f32 %v11252_v12, %v6923_v10  ;;  %v11259_v32 = vand.u32 15, %v11258_v19  ;;  %v11260_v53 = vmov 0  ;;  %v11264_v42 = vmov 0 }
 0x1bd   : > { %vm7226_vm12 = vcmp.lt.s32.totalorder %v11254_v37, 15  ;;  %v11263_v10 = vmov %v11254_v37  ;;  %5645 = vrcp.f32 %v791_v8  ;;  %v11270_v44 = vmov 0  ;;  %v5527_v8 = vld [vmem:[%s10575_s5 + $0x8] sm:$0xff]  }
 0x1be   : > { %v11256_v4 = vsel %vm7226_vm12, 4294967295, %v11255_v4  ;;  %vm7232_vm7 = vcmp.ge.s32.totalorder %v11259_v32, 1  ;;  %vm7238_vm2 = vcmp.lt.s32.totalorder %v11263_v10, 14  ;;  %v11269_v49 = vmov %v11259_v32  ;;  %v5636_v19 = vpop.eup %5635 }
 0x1bf   : > { %11257 = vst [vmem:[#allocation18_spill] sm:$0xff] %v11256_v4  ;;  %v11261_v53 = vsel %vm7232_vm7, 4294967295, %v11260_v53  ;;  %v11265_v42 = vsel %vm7238_vm2, 4294967295, %v11264_v42  ;;  %vm7246_vm13 = vcmp.ge.s32.totalorder %v11269_v49, 2  ;;  %5647 = vrcp.f32 %v789_v40 }
 0x1c0   : > { %11262 = vst [vmem:[#allocation19_spill] sm:$0xff] %v11261_v53  ;;  %11266 = vst [vmem:[#allocation77_spill] sm:$0xff] %v11265_v42  ;;  %v11271_v44 = vsel %vm7246_vm13, 4294967295, %v11270_v44  ;;  %v760_v11 = vmul.f32 1.442695, %v698_v30  ;;  %v7253_v59 = vadd.f32 %v6945_v14, %v6461_v58  ;;  %v7261_v40 = vadd.s32 232, %v6035_v43 }
 0x1c1   : > { %11272 = vst [vmem:[#allocation31_spill] sm:$0xff] %v11271_v44  ;;  %v756_v47 = vmul.f32 1.442695, %v696_v39  ;;  %v762_v12 = vmul.f32 1.442695, %v699_v25  ;;  %v10790_v30 = vrot.slane %v7222_v38, 1  ;;  %v3495_v25 = vpack.c.bf16 %v6937_v56, %v6699_v16  ;;  %v5638_v10 = vpop.eup %5637 }
 0x1c2   : > { %v697_v39 = vsub.f32 0.0, %v7253_v59  ;;  %5649 = vpow2.f32 %v760_v11  ;;  %v7271_v49 = vmul.f32 %v5636_v19, %v6546_v22  ;;  %v7274_v46 = vadd.s32 240, %v6035_v43  ;;  %v5640_v11 = vpop.eup %5639  ;;  %v11273_v16 = vld [vmem:[#allocation22_spill] sm:$0xff] }
 0x1c3   : > { %5651 = vpow2.f32 %v756_v47  ;;  %v3496_v37 = vpack.c.bf16 %v6702_v31, %v6721_v23  ;;  %v7282_v3 = vmul.f32 %v5638_v10, %v6558_v45  ;;  %v11274_v56 = vand.u32 15, %v11273_v16  ;;  %v11278_v47 = vld [vmem:[#allocation24_spill] sm:$0xff]  ;;  %v5642_v23 = vpop.eup %5641 }
 0x1c4   : > { %v11275_v22 = vmov 0  ;;  %v11279_v19 = vand.u32 15, %v11278_v47  ;;  %v11280_v20 = vmov 0  ;;  %5653 = vpow2.f32 %v762_v12 }
 0x1c5   : > { %vm7286_vm10 = vcmp.lt.s32.totalorder %v11274_v56, 15  ;;  %v7296_v31 = vmul.f32 1.442695, %v697_v39  ;;  %vm11283_vm8 = vcmask 523264   ;;  %v3497_v45 = vpack.c.bf16 %v7070_v61, %v7054_v48  ;;  %v5644_v39 = vpop.eup %5643 }
 0x1c6   : > { %v11276_v22 = vsel %vm7286_vm10, 4294967295, %v11275_v22  ;;  %vm7292_vm3 = vcmp.ge.s32.totalorder %v11279_v19, 1  ;;  %5252 = vmatprep.mubr.msk.bf16.mxu1 %vm11283_vm8, %v3495_v25  ;;  %v945_v10 = vrot.slane %v7271_v49, 1  ;;  %v1074_v56 = vrot.slane %v7271_v49, 7  ;;  %vm11288_vm0 = vmmov %vm11283_vm8 }
 0x1c7   : > { %11277 = vst [vmem:[#allocation32_spill] sm:$0xff] %v11276_v22  ;;  %v11281_v20 = vsel %vm7292_vm3, 4294967295, %v11280_v20  ;;  %v10780_v5 = vrot.slane %v7271_v49, 2  ;;  %v10781_v19 = vrot.slane %v7271_v49, 6  ;;  %v11284_v1 = vand.u32 15, %v11273_v16  ;;  %5253 = vmatmul.mubr.msk.bf16.vlgmr.msra.gmra.mrb[0].mxu1 %vm11288_vm0, %v3496_v37  ;;  %vm11289_vm8 = vmmov %vm11288_vm0  ;;  %v5646_v16 = vpop.eup %5645 }
 0x1c8   : > { %11282 = vst [vmem:[#allocation22_spill] sm:$0xff] %v11281_v20  ;;  %v11285_v12 = vmov 0  ;;  %v10787_v48 = vrot.slane %v7282_v3, 1  ;;  %5256 = vmatprep.mubr.msk.bf16.mxu1 %vm11289_vm8, %v3497_v45  ;;  %5273 = vmatpush3.bf16.msra.mxu1 %v6707_v28  ;;  %vm11291_vm9 = vcmp.lt.s32.totalorder %v6035_v43, 7  ;;  %v11292_v37 = vrot.slane %v7057_v50, 7 }
 0x1c9   : > { %vm7307_vm14 = vcmp.lt.s32.totalorder %v11284_v1, 14  ;;  %v11290_v1 = vrot.slane %v7057_v50, 1  ;;  %vm11293_vm0 = vcmp.lt.s32.totalorder %v6035_v43, 1  ;;  %v11294_v25 = vrot.slane %v7057_v50, 2  ;;  %5274 = vmatprep.subr.bf16.mxu1 %v5527_v8  ;;  %v5648_v61 = vpop.eup %5647 }
 0x1ca   : > { %v11286_v12 = vsel %vm7307_vm14, 4294967295, %v11285_v12  ;;  %v1098_v14 = vsel %vm11293_vm0, %v11292_v37, %v1074_v56  ;;  %vm11295_vm4 = vcmp.lt.s32.totalorder %v6035_v43, 6  ;;  %v11296_v28 = vrot.slane %v7057_v50, 6  ;;  %v5531_v37 = vld [vmem:[%s10575_s5 + $0x10] sm:$0xff]  }
 0x1cb   : > { %11287 = vst [vmem:[#allocation24_spill] sm:$0xff] %v11286_v12  ;;  %v969_v32 = vsel %vm11291_vm9, %v11290_v1, %v945_v10  ;;  %v1291_v45 = vsel %vm11295_vm4, %v11294_v25, %v10780_v5  ;;  %vm11297_vm8 = vcmp.lt.s32.totalorder %v6035_v43, 2  ;;  %v11298_v1 = vand.u32 15, %v11278_v47 }
 0x1cc   : > { %v1420_v26 = vsel %vm11297_vm8, %v11296_v28, %v10781_v19  ;;  %v11299_v58 = vmov 0  ;;  %v1041_v25 = vsel %vm7226_vm12, %v969_v32, -1e+30  ;;  %v1171_v5 = vsel %vm7232_vm7, %v1098_v14, -1e+30  ;;  %5275 = vmatpush3.bf16.msra.mxu1 %v5527_v8  ;;  %v7410_v8 = vpop.eup %5649 }
 0x1cd   : > { %vm7340_vm9 = vcmp.ge.s32.totalorder %v11298_v1, 2  ;;  %v1363_v28 = vsel %vm7238_vm2, %v1291_v45, -1e+30  ;;  %vm11302_vm4 = vcmp.lt.s32.totalorder %v6035_v43, 7  ;;  %v1202_v1 = vmax.f32 %v1041_v25, %v7134_v21  ;;  %5276 = vmatprep.subr.bf16.mxu1 %v5531_v37  ;;  %v7434_v44 = vpop.eup %5651 }
 0x1ce   : > { %v11300_v58 = vsel %vm7340_vm9, 4294967295, %v11299_v58  ;;  %v966_v47 = vsel %vm11302_vm4, %v10790_v30, %v10787_v48  ;;  %v1493_v19 = vsel %vm7246_vm13, %v1420_v26, -1e+30  ;;  %v1524_v32 = vmax.f32 %v1363_v28, %v7148_v35 }
 0x1cf   : > { %11301 = vst [vmem:[#allocation78_spill] sm:$0xff] %v11300_v58  ;;  %v11303_v52 = vrot.slane %v7282_v3, 7  ;;  %v11304_v14 = vrot.slane %v7222_v38, 7  ;;  %v11305_v53 = vrot.slane %v7282_v3, 2  ;;  %v11306_v27 = vrot.slane %v7222_v38, 2 }
 0x1d0   : > { %vm11307_vm8 = vcmp.lt.s32.totalorder %v6035_v43, 6  ;;  %v11308_v25 = vrot.slane %v7282_v3, 6  ;;  %v11309_v26 = vrot.slane %v7222_v38, 6  ;;  %vm11310_vm4 = vcmp.lt.s32.totalorder %v6035_v43, 2  ;;  %5277 = vmatpush3.bf16.msra.mxu1 %v5531_v37 }
 0x1d1   : > { %v7369_v45 = vsel %vm11293_vm0, %v11304_v14, %v11303_v52  ;;  %v1288_v21 = vsel %vm11307_vm8, %v11306_v27, %v11305_v53  ;;  %v7386_v28 = vmul.f32 %v5640_v11, %v6602_v2  ;;  %v7389_v52 = vmul.f32 %v5642_v23, %v6636_v57  ;;  %v11316_v2 = vld [vmem:[#allocation47_spill] sm:$0xff]  ;;  %v5532_v57 = vld [vmem:[%s10575_s5 + $0x18] sm:$0xff]  }
 0x1d2   : > { %v7383_v35 = vsel %vm11310_vm4, %v11309_v26, %v11308_v25  ;;  %v1234_v14 = vmax.f32 %v7057_v50, %v1202_v1  ;;  %v7393_v48 = vmul.f32 %v5644_v39, %v6850_v18  ;;  %v11311_v27 = vand.u32 15, %v11267_v41  ;;  %v11315_v25 = vld [vmem:[#allocation8_spill] sm:$0xff]  ;;  %5278 = vmatprep.subr.bf16.mxu1 %v5532_v57 }
 0x1d3   : > { %v11312_v53 = vmov 0  ;;  %v7402_v26 = vmul.f32 %v5646_v16, %v11315_v25  ;;  %v7405_v11 = vmul.f32 %v5648_v61, %v11316_v2  ;;  %v946_v18 = vrot.slane %v7386_v28, 1 }
 0x1d4   : > { %vm7397_vm0 = vcmp.lt.s32.totalorder %v11311_v27, 15  ;;  %v1075_v23 = vrot.slane %v7386_v28, 7  ;;  %v1268_v39 = vrot.slane %v7386_v28, 2  ;;  %v1397_v1 = vrot.slane %v7386_v28, 6  ;;  %5279 = vmatpush3.bf16.msra.mxu1 %v5532_v57 }
 0x1d5   : > { %v11313_v53 = vsel %vm7397_vm0, 4294967295, %v11312_v53  ;;  %v11317_v16 = vand.u32 15, %v11268_v34  ;;  %v11318_v61 = vmov 0  ;;  %vm7424_vm4 = vcmp.lt.s32.totalorder %v11311_v27, 14  ;;  %v7441_v27 = vpop.eup %5653 }
 0x1d6   : > { %11314 = vst [vmem:[#allocation79_spill] sm:$0xff] %v11313_v53  ;;  %v11321_v25 = vmov 0  ;;  %v11325_v30 = vmov 0  ;;  %v7436_v42 = vmax.f32 %v1234_v14, %v1524_v32  ;;  %v11328_v4 = vrot.slane %v7222_v38, 1 }
 0x1d7   : > { %vm7418_vm8 = vcmp.ge.s32.totalorder %v11317_v16, 1  ;;  %v11322_v25 = vsel %vm7424_vm4, 4294967295, %v11321_v25  ;;  %v11324_v2 = vmov %v11317_v16  ;;  %vm11329_vm7 = vcmp.lt.s32.totalorder %v6035_v43, 7 }
 0x1d8   : > { %v11319_v61 = vsel %vm7418_vm8, 4294967295, %v11318_v61  ;;  %11323 = vst [vmem:[#allocation47_spill] sm:$0xff] %v11322_v25  ;;  %vm7430_vm13 = vcmp.ge.s32.totalorder %v11324_v2, 2  ;;  %v967_v34 = vsel %vm11329_vm7, %v946_v18, %v11328_v4  ;;  %vm11330_vm2 = vmmov %vm11329_vm7  ;;  %v11331_v6 = vrot.slane %v7222_v38, 7 }
 0x1d9   : > { %11320 = vst [vmem:[#allocation8_spill] sm:$0xff] %v11319_v61  ;;  %v11326_v30 = vsel %vm7430_vm13, 4294967295, %v11325_v30  ;;  %v968_v2 = vsel %vm11330_vm2, %v945_v10, %v946_v18  ;;  %vm11332_vm12 = vcmp.lt.s32.totalorder %v6035_v43, 1  ;;  %v1043_v41 = vsel %vm7286_vm10, %v967_v34, -1e+30 }
 0x1da   : > { %11327 = vst [vmem:[#allocation80_spill] sm:$0xff] %v11326_v30  ;;  %v1096_v32 = vsel %vm11332_vm12, %v1075_v23, %v11331_v6  ;;  %vm11333_vm6 = vmmov %vm11332_vm12  ;;  %v1203_v16 = vmax.f32 %v968_v2, %v1171_v5  ;;  %v11334_v4 = vrot.slane %v7222_v38, 2  ;;  %vm11335_vm7 = vcmp.lt.s32.totalorder %v6035_v43, 6  ;;  %v7466_v6 = vld [vmem:[%s10576_s6] sm:$0xff]  }
 0x1db   : > { %v1097_v14 = vsel %vm11333_vm6, %v1074_v56, %v1075_v23  ;;  %v1173_v0 = vsel %vm7292_vm3, %v1096_v32, -1e+30  ;;  %v11336_v18 = vrot.slane %v7271_v49, 2  ;;  %vm11337_vm6 = vmmov %vm11335_vm7  ;;  %v11338_v2 = vrot.slane %v7222_v38, 6  ;;  %5312 = vmatprep.subr.bf16.mxu1 %v7466_v6 }
 0x1dc   : > { %v1289_v10 = vsel %vm11335_vm7, %v1268_v39, %v11334_v4  ;;  %v1204_v56 = vmax.f32 %v1043_v41, %v1097_v14  ;;  %v1205_v37 = vmax.f32 %v966_v47, %v1173_v0  ;;  %v1235_v34 = vmax.f32 %v7271_v49, %v1203_v16 }
 0x1dd   : > { %v1290_v23 = vsel %vm11337_vm6, %v11336_v18, %v1268_v39  ;;  %v1365_v5 = vsel %vm7307_vm14, %v1289_v10, -1e+30  ;;  %vm11339_vm12 = vcmp.lt.s32.totalorder %v6035_v43, 2  ;;  %v11340_v4 = vrot.slane %v7271_v49, 6 }
 0x1de   : > { %v1418_v32 = vsel %vm11339_vm12, %v1397_v1, %v11338_v2  ;;  %vm11341_vm2 = vmmov %vm11339_vm12  ;;  %v1525_v47 = vmax.f32 %v1290_v23, %v1493_v19  ;;  %v11342_v41 = vand.u32 15, %v6934_v13  ;;  %v11343_v39 = vmov 0 }
 0x1df   : > { %v1419_v0 = vsel %vm11341_vm2, %v11340_v4, %v1397_v1  ;;  %v1236_v14 = vmax.f32 %v7386_v28, %v1204_v56  ;;  %v1237_v16 = vmax.f32 %v7222_v38, %v1205_v37  ;;  %v1495_v10 = vsel %vm7340_vm9, %v1418_v32, -1e+30 }
 0x1e0   : > { %vm7485_vm7 = vcmp.lt.s32.totalorder %v11342_v41, 15  ;;  %v1526_v18 = vmax.f32 %v1365_v5, %v1419_v0  ;;  %v11346_v2 = vand.u32 15, %v6940_v62  ;;  %v11347_v20 = vmov 0 }
 0x1e1   : > { %v11344_v39 = vsel %vm7485_vm7, 4294967295, %v11343_v39  ;;  %v1527_v19 = vmax.f32 %v1288_v21, %v1495_v10  ;;  %v7499_v1 = vmax.f32 %v1235_v34, %v1525_v47  ;;  %v1402_v23 = vrot.slane %v7389_v52, 6 }
 0x1e2   : > { %11345 = vst [vmem:[#allocation81_spill] sm:$0xff] %v11344_v39  ;;  %vm7495_vm6 = vcmp.ge.s32.totalorder %v11346_v2, 1  ;;  %v949_v56 = vrot.slane %v7393_v48, 1  ;;  %v11350_v37 = vmov %v11342_v41  ;;  %v11351_v4 = vmov 0 }
 0x1e3   : > { %v11348_v20 = vsel %vm7495_vm6, 4294967295, %v11347_v20  ;;  %vm7505_vm12 = vcmp.lt.s32.totalorder %v11350_v37, 14  ;;  %v7510_v5 = vmax.f32 %v1236_v14, %v1526_v18  ;;  %v1078_v32 = vrot.slane %v7393_v48, 7 }
 0x1e4   : > { %11349 = vst [vmem:[#allocation82_spill] sm:$0xff] %v11348_v20  ;;  %v11352_v4 = vsel %vm7505_vm12, 4294967295, %v11351_v4  ;;  %v1271_v21 = vrot.slane %v7393_v48, 2  ;;  %v1400_v57 = vrot.slane %v7393_v48, 6  ;;  %v11354_v34 = vmov %v11346_v2 }
 0x1e5   : > { %11353 = vst [vmem:[#allocation83_spill] sm:$0xff] %v11352_v4  ;;  %vm7517_vm2 = vcmp.ge.s32.totalorder %v11354_v34, 2  ;;  %v11355_v0 = vmov 0  ;;  %v7521_v13 = vmax.f32 %v1237_v16, %v1527_v19  ;;  %v11359_v47 = vrot.slane %v7282_v3, 1 }
 0x1e6   : > { %v11356_v0 = vsel %vm7517_vm2, 4294967295, %v11355_v0  ;;  %vm11360_vm9 = vcmp.lt.s32.totalorder %v6035_v43, 7  ;;  %v11361_v62 = vrot.slane %v7282_v3, 7  ;;  %vm11362_vm3 = vcmp.lt.s32.totalorder %v6035_v43, 1 }
 0x1e7   : > { %11357 = vst [vmem:[#allocation84_spill] sm:$0xff] %v11356_v0  ;;  %11358 = vst [vmem:[#allocation85_spill] sm:$0xff] %v7521_v13  ;;  %v965_v41 = vsel %vm11360_vm9, %v11359_v47, %v949_v56  ;;  %v11363_v16 = vrot.slane %v7282_v3, 2  ;;  %vm11364_vm14 = vcmp.lt.s32.totalorder %v6035_v43, 6  ;;  %v11365_v37 = vrot.slane %v7282_v3, 6 }
 0x1e8   : > { %v1045_v18 = vsel %vm7397_vm0, %v965_v41, -1e+30  ;;  %v1094_v2 = vsel %vm11362_vm3, %v11361_v62, %v1078_v32  ;;  %vm11366_vm9 = vcmp.lt.s32.totalorder %v6035_v43, 2  ;;  %v11368_v58 = vrot.slane %v7389_v52, 1 }
 0x1e9   : > { %v1287_v19 = vsel %vm11364_vm14, %v11363_v16, %v1271_v21  ;;  %v1416_v34 = vsel %vm11366_vm9, %v11365_v37, %v1400_v57  ;;  %v1175_v47 = vsel %vm7418_vm8, %v1094_v2, -1e+30  ;;  %v1206_v41 = vmax.f32 %v1045_v18, %v7369_v45 }
 0x1ea   : > { %v1367_v10 = vsel %vm7424_vm4, %v1287_v19, -1e+30  ;;  %v1497_v62 = vsel %vm7430_vm13, %v1416_v34, -1e+30  ;;  %v11367_v16 = vrot.slane %v7402_v26, 1  ;;  %vm11369_vm14 = vcmp.lt.s32.totalorder %v6035_v43, 7 }
 0x1eb   : > { %v1528_v14 = vmax.f32 %v1367_v10, %v7383_v35  ;;  %v11370_v61 = vrot.slane %v7402_v26, 7  ;;  %v11371_v2 = vrot.slane %v7389_v52, 7  ;;  %v10829_v18 = vrot.slane %v7402_v26, 2 }
 0x1ec   : > { %v962_v37 = vsel %vm11369_vm14, %v11368_v58, %v11367_v16  ;;  %v1238_v19 = vmax.f32 %v7282_v3, %v1206_v41  ;;  %v10834_v35 = vrot.slane %v7402_v26, 6  ;;  %v950_v10 = vrot.slane %v7405_v11, 1 }
 0x1ed   : > { %v7563_v45 = vsel %vm11362_vm3, %v11371_v2, %v11370_v61  ;;  %v1079_v34 = vrot.slane %v7405_v11, 7  ;;  %v11372_v58 = vrot.slane %v7389_v52, 2  ;;  %vm11373_vm9 = vcmp.lt.s32.totalorder %v6035_v43, 6 }
 0x1ee   : > { %v1272_v61 = vrot.slane %v7405_v11, 2  ;;  %v1401_v2 = vrot.slane %v7405_v11, 6  ;;  %v794_v30 = vadd.f32 1.0, %v7410_v8  ;;  %v7579_v41 = vmax.f32 %v1238_v19, %v1528_v14 }
 0x1ef   : > { %v1284_v16 = vsel %vm11373_vm9, %v11372_v58, %v10829_v18  ;;  %vm11374_vm14 = vcmp.lt.s32.totalorder %v6035_v43, 2  ;;  %v11375_v53 = vrot.slane %v7389_v52, 1  ;;  %vm11376_vm3 = vcmp.lt.s32.totalorder %v6035_v43, 7 }
 0x1f0   : > { %v7585_v25 = vsel %vm11374_vm14, %v1402_v23, %v10834_v35  ;;  %vm11377_vm9 = vmmov %vm11376_vm3  ;;  %v11378_v8 = vrot.slane %v7389_v52, 7  ;;  %vm11379_vm13 = vcmp.lt.s32.totalorder %v6035_v43, 1  ;;  %vm11382_vm14 = vcmp.lt.s32.totalorder %v6035_v43, 6 }
 0x1f1   : > { %v963_v12 = vsel %vm11376_vm3, %v950_v10, %v11375_v53  ;;  %v964_v58 = vsel %vm11377_vm9, %v949_v56, %v950_v10  ;;  %vm11380_vm8 = vmmov %vm11379_vm13  ;;  %v11381_v53 = vrot.slane %v7389_v52, 2  ;;  %5655 = vrcp.f32 %v794_v30 }
 0x1f2   : > { %v1047_v18 = vsel %vm7485_vm7, %v963_v12, -1e+30  ;;  %v1092_v14 = vsel %vm11379_vm13, %v1079_v34, %v11378_v8  ;;  %v1093_v19 = vsel %vm11380_vm8, %v1078_v32, %v1079_v34  ;;  %v1207_v35 = vmax.f32 %v964_v58, %v1175_v47  ;;  %vm11383_vm3 = vmmov %vm11382_vm14 }
 0x1f3   : > { %v1177_v22 = vsel %vm7495_vm6, %v1092_v14, -1e+30  ;;  %v1208_v9 = vmax.f32 %v1047_v18, %v1093_v19  ;;  %v1285_v56 = vsel %vm11382_vm14, %v1272_v61, %v11381_v53  ;;  %v1286_v12 = vsel %vm11383_vm3, %v1271_v21, %v1272_v61  ;;  %v11391_v19 = vld [vmem:[#allocation56_spill] sm:$0xff] }
 0x1f4   : > { %v1209_v10 = vmax.f32 %v962_v37, %v1177_v22  ;;  %v1239_v39 = vmax.f32 %v7393_v48, %v1207_v35  ;;  %v1369_v8 = vsel %vm7505_vm12, %v1285_v56, -1e+30  ;;  %vm11384_vm13 = vcmp.lt.s32.totalorder %v6035_v43, 2  ;;  %v11393_v56 = vld [vmem:[#allocation54_spill] sm:$0xff] }
 0x1f5   : > { %v1414_v32 = vsel %vm11384_vm13, %v1401_v2, %v1402_v23  ;;  %v1240_v47 = vmax.f32 %v7405_v11, %v1208_v9  ;;  %vm11385_vm8 = vmmov %vm11384_vm13  ;;  %v1529_v58 = vmax.f32 %v1286_v12, %v1497_v62  ;;  %v792_v61 = vadd.f32 1.0, %v7434_v44 }
 0x1f6   : > { %v1415_v18 = vsel %vm11385_vm8, %v1400_v57, %v1401_v2  ;;  %v1499_v34 = vsel %vm7517_vm2, %v1414_v32, -1e+30  ;;  %v1241_v21 = vmax.f32 %v7389_v52, %v1209_v10  ;;  %v795_v23 = vadd.f32 1.0, %v7441_v27  ;;  %v11397_v10 = vld [vmem:[#allocation51_spill] sm:$0xff] }
 0x1f7   : > { %v1530_v22 = vmax.f32 %v1369_v8, %v1415_v18  ;;  %v1531_v37 = vmax.f32 %v1284_v16, %v1499_v34  ;;  %v7620_v35 = vmax.f32 %v1239_v39, %v1529_v58  ;;  %5657 = vpow2.f32 %v7296_v31  ;;  %v11389_v16 = vld [vmem:[#allocation53_spill] sm:$0xff]  ;;  %v11398_v8 = vld [vmem:[#allocation70_spill] sm:$0xff] }
 0x1f8   : > { %5659 = vrcp.f32 %v792_v61  ;;  %v3498_v30 = vpack.c.bf16 %v7057_v50, %v6952_v15  ;;  %v3499_v39 = vpack.c.bf16 %v7386_v28, %v7271_v49  ;;  %v3500_v44 = vpack.c.bf16 %v7282_v3, %v7222_v38  ;;  %v11392_v15 = vld [vmem:[#allocation58_spill] sm:$0xff]  ;;  %v11399_v34 = vld [vmem:[#allocation69_spill] sm:$0xff] }
 0x1f9   : > { %11386 = vst [vmem:[#allocation86_spill] sm:$0xff] %v7620_v35  ;;  %v7625_v9 = vmax.f32 %v1240_v47, %v1530_v22  ;;  %v7627_v57 = vmax.f32 %v1241_v21, %v1531_v37  ;;  %5661 = vrcp.f32 %v795_v23  ;;  %v3501_v31 = vpack.c.bf16 %v7405_v11, %v7393_v48  ;;  %v11394_v28 = vld [vmem:[#allocation62_spill] sm:$0xff]  ;;  %v11413_v50 = vld [vmem:[#allocation5_spill] sm:$0xff] }
 0x1fa   : > { %vm11390_vm9 = vcmask 523264   ;;  %v1698_v53 = vmax.f32 %v11391_v19, -1e+30  ;;  %v1890_v49 = vmax.f32 %v11393_v56, -1e+30  ;;  %v1701_v38 = vmax.f32 %v11394_v28, %v11389_v16  ;;  %v11396_v48 = vld [vmem:[#allocation10_spill] sm:$0xff] }
 0x1fb   : > { %11387 = vst [vmem:[#allocation87_spill] sm:$0xff] %v7625_v9  ;;  %11388 = vst [vmem:[#allocation88_spill] sm:$0xff] %v7627_v57  ;;  %5257 = vmatmul.mubr.msk.bf16.gmra.mrb[4].mxu1 %vm11390_vm9, %v3498_v30  ;;  %v1892_v11 = vmax.f32 %v11396_v48, -1e+30  ;;  %v1702_v12 = vmax.f32 %v11396_v48, %v11391_v19  ;;  %v1894_v32 = vmax.f32 %v11398_v8, %v11397_v10  ;;  %v11400_v22 = vand.u32 15, %v7206_v54 }
 0x1fc   : > { %vm11395_vm14 = vmmov %vm11390_vm9  ;;  %v1730_v47 = vmax.f32 %v11397_v10, %v1698_v53  ;;  %v7657_v18 = vmax.f32 %v11392_v15, %v1701_v38  ;;  %v1703_v58 = vmax.f32 %v11399_v34, %v11392_v15  ;;  %v1704_v21 = vmax.f32 %v11398_v8, %v11393_v56  ;;  %v11412_v53 = vld [vmem:[#allocation63_spill] sm:$0xff] }
 0x1fd   : > { %5260 = vmatprep.mubr.msk.bf16.mxu1 %vm11395_vm14, %v3499_v39  ;;  %vm7665_vm3 = vcmp.lt.s32.totalorder %v11400_v22, 15  ;;  %v11401_v37 = vmov 0  ;;  %v11404_v61 = vand.u32 15, %v7209_v29  ;;  %v11405_v23 = vmov 0 }
 0x1fe   : > { %v11402_v37 = vsel %vm7665_vm3, 4294967295, %v11401_v37  ;;  %v11408_v30 = vmov %v11400_v22  ;;  %v11409_v39 = vmov 0  ;;  %v7682_v38 = vmax.f32 %v11412_v53, %v1892_v11  ;;  %v5656_v53 = vpop.eup %5655 }
 0x1ff   : > { %11403 = vst [vmem:[#allocation53_spill] sm:$0xff] %v11402_v37  ;;  %vm7671_vm13 = vcmp.ge.s32.totalorder %v11404_v61, 1  ;;  %vm7677_vm8 = vcmp.lt.s32.totalorder %v11408_v30, 14  ;;  %v1734_v10 = vmax.f32 %v11393_v56, %v1702_v12  ;;  %v1895_v22 = vmax.f32 %v7215_v7, %v11389_v16 }
 0x200   : > { %v11406_v23 = vsel %vm7671_vm13, 4294967295, %v11405_v23  ;;  %v11410_v39 = vsel %vm7677_vm8, 4294967295, %v11409_v39  ;;  %v1896_v61 = vmax.f32 %v11413_v50, %v11391_v19  ;;  %v11414_v3 = vand.u32 15, %v7209_v29 }
 0x201   : > { %11407 = vst [vmem:[#allocation56_spill] sm:$0xff] %v11406_v23  ;;  %11411 = vst [vmem:[#allocation58_spill] sm:$0xff] %v11410_v39  ;;  %v11415_v14 = vmov 0  ;;  %v7695_v54 = vmax.f32 %v1730_v47, %v1890_v49  ;;  %v1735_v30 = vmax.f32 %v11394_v28, %v1703_v58  ;;  %v1736_v11 = vmax.f32 %v11396_v48, %v1704_v21  ;;  %v11423_v58 = vld [vmem:[#allocation73_spill] sm:$0xff]  ;;  %v5658_v62 = vpop.eup %5657 }
 0x202   : > { %vm7691_vm9 = vcmp.ge.s32.totalorder %v11414_v3, 2  ;;  %v1705_v12 = vmax.f32 %v7215_v7, %v11394_v28  ;;  %v11418_v27 = vand.u32 15, %v7219_v51  ;;  %v11419_v19 = vmov 0  ;;  %v11422_v3 = vld [vmem:[#allocation72_spill] sm:$0xff] }
 0x203   : > { %v11416_v14 = vsel %vm7691_vm9, 4294967295, %v11415_v14  ;;  %v7707_v29 = vmax.f32 %v1734_v10, %v1894_v32  ;;  %v7716_v2 = vmul.f32 %v5656_v53, %v6949_v36  ;;  %v11425_v0 = vmov 0 }
 0x204   : > { %11417 = vst [vmem:[#allocation54_spill] sm:$0xff] %v11416_v14  ;;  %vm7703_vm14 = vcmp.lt.s32.totalorder %v11418_v27, 15  ;;  %v11424_v27 = vand.u32 15, %v6035_v43  ;;  %v7724_v32 = vmax.f32 %v1735_v30, %v1895_v22  ;;  %v7726_v10 = vmax.f32 %v1736_v11, %v1896_v61  ;;  %v5660_v22 = vpop.eup %5659 }
 0x205   : > { %v11420_v19 = vsel %vm7703_vm14, 4294967295, %v11419_v19  ;;  %v7729_v49 = vmax.f32 %v11399_v34, %v1705_v12  ;;  %v11427_v47 = vand.u32 15, %v7219_v51  ;;  %v11428_v21 = vmov 0 }
 0x206   : > { %11421 = vst [vmem:[#allocation62_spill] sm:$0xff] %v11420_v19  ;;  %vm7720_vm2 = vcmp.ge.s32.totalorder %v11424_v27, 1  ;;  %v793_v36 = vadd.f32 1.0, %v5658_v62  ;;  %v11431_v12 = vmov %v11424_v27  ;;  %vm11434_vm7 = vcmask 523264   ;;  %v5662_v62 = vpop.eup %5661 }
 0x207   : > { %v11426_v0 = vsel %vm7720_vm2, 4294967295, %v11425_v0  ;;  %vm7733_vm6 = vcmp.lt.s32.totalorder %v11427_v47, 14  ;;  %vm7746_vm12 = vcmp.ge.s32.totalorder %v11431_v12, 2  ;;  %5261 = vmatmul.mubr.msk.bf16.gmra.mrb[8].mxu1 %vm11434_vm7, %v3500_v44  ;;  %v7752_v20 = vmul.f32 %v5660_v22, %v6956_v33  ;;  %vm11435_vm4 = vmmov %vm11434_vm7 }
 0x208   : > { %v11429_v21 = vsel %vm7733_vm6, 4294967295, %v11428_v21  ;;  %5663 = vrcp.f32 %v793_v36  ;;  %5264 = vmatprep.mubr.msk.bf16.mxu1 %vm11435_vm4, %v3501_v31  ;;  %v7758_v51 = vmul.f32 %v5662_v62, %v6960_v63  ;;  %v11436_v11 = vrot.slane %v7402_v26, 1 }
 0x209   : > { %11430 = vst [vmem:[#allocation10_spill] sm:$0xff] %v11429_v21  ;;  %v953_v30 = vrot.slane %v7752_v20, 1  ;;  %v10861_v33 = vrot.slane %v7752_v20, 7  ;;  %v10863_v36 = vrot.slane %v7752_v20, 2  ;;  %vm11437_vm4 = vcmp.lt.s32.totalorder %v6035_v43, 7 }
 0x20a   : > { %v956_v22 = vrot.slane %v7758_v51, 1  ;;  %v1085_v53 = vrot.slane %v7758_v51, 7  ;;  %v1278_v63 = vrot.slane %v7758_v51, 2  ;;  %v1407_v62 = vrot.slane %v7758_v51, 6 }
 0x20b   : > { %v961_v44 = vsel %vm11437_vm4, %v11436_v11, %v953_v30  ;;  %v11438_v27 = vrot.slane %v7402_v26, 7  ;;  %vm11439_vm7 = vcmp.lt.s32.totalorder %v6035_v43, 1  ;;  %v11440_v61 = vrot.slane %v7402_v26, 2 }
 0x20c   : > { %vm11441_vm0 = vcmp.lt.s32.totalorder %v6035_v43, 6  ;;  %v11442_v4 = vrot.slane %v7752_v20, 6  ;;  %v11443_v57 = vrot.slane %v7402_v26, 6  ;;  %vm11444_vm4 = vcmp.lt.s32.totalorder %v6035_v43, 2 }
 0x20d   : > { %v1090_v12 = vsel %vm11439_vm7, %v11438_v27, %v10861_v33  ;;  %v1283_v31 = vsel %vm11441_vm0, %v11440_v61, %v10863_v36  ;;  %v1049_v9 = vsel %vm7665_vm3, %v961_v44, -1e+30  ;;  %v11445_v35 = vrot.slane %v7716_v2, 1 }
 0x20e   : > { %v7793_v11 = vsel %vm11444_vm4, %v11443_v57, %v11442_v4  ;;  %v1179_v27 = vsel %vm7671_vm13, %v1090_v12, -1e+30  ;;  %v1371_v33 = vsel %vm7677_vm8, %v1283_v31, -1e+30  ;;  %vm11446_vm0 = vcmp.lt.s32.totalorder %v6035_v43, 7  ;;  %v11455_v31 = vld [vmem:[#allocation28_spill] sm:$0xff] }
 0x20f   : > { %v958_v61 = vsel %vm11446_vm0, %v11445_v35, %v956_v22  ;;  %v11447_v36 = vand.u32 15, %v7261_v40  ;;  %v11448_v13 = vmov 0  ;;  %v11451_v4 = vand.u32 15, %v7274_v46 }
 0x210   : > { %v11452_v57 = vmov 0  ;;  %v1210_v12 = vmax.f32 %v1049_v9, %v7563_v45  ;;  %v1501_v44 = vsel %vm7691_vm9, %v7793_v11, -1e+30  ;;  %v1532_v35 = vmax.f32 %v1371_v33, %v7585_v25 }
 0x211   : > { %vm7807_vm7 = vcmp.lt.s32.totalorder %v11447_v36, 15  ;;  %vm7813_vm4 = vcmp.ge.s32.totalorder %v11451_v4, 1  ;;  %v11456_v23 = vrot.slane %v11455_v31, 1  ;;  %v11457_v4 = vrot.slane %v7716_v2, 7 }
 0x212   : > { %v11449_v13 = vsel %vm7807_vm7, 4294967295, %v11448_v13  ;;  %v11453_v57 = vsel %vm7813_vm4, 4294967295, %v11452_v57  ;;  %vm11458_vm13 = vcmp.lt.s32.totalorder %v6035_v43, 1  ;;  %v11459_v45 = vrot.slane %v11455_v31, 7 }
 0x213   : > { %11450 = vst [vmem:[#allocation51_spill] sm:$0xff] %v11449_v13  ;;  %11454 = vst [vmem:[#allocation70_spill] sm:$0xff] %v11453_v57  ;;  %v989_v36 = vsel %vm11446_vm0, %v956_v22, %v11456_v23  ;;  %v1087_v37 = vsel %vm11458_vm13, %v11457_v4, %v1085_v53  ;;  %v11461_v25 = vrot.slane %v7716_v2, 2  ;;  %vm11462_vm9 = vcmp.lt.s32.totalorder %v6035_v43, 6 }
 0x214   : > { %v1053_v39 = vsel %vm7703_vm14, %v989_v36, -1e+30  ;;  %vm11460_vm8 = vmmov %vm11458_vm13  ;;  %v11463_v23 = vand.u32 15, %v7261_v40  ;;  %v11464_v22 = vmov 0  ;;  %v11467_v11 = vpack.c.bf16 %v7402_v26, %v7389_v52  ;;  %v11475_v52 = vld [vmem:[#allocation44_spill] sm:$0xff] }
 0x215   : > { %v1118_v9 = vsel %vm11460_vm8, %v1085_v53, %v11459_v45  ;;  %v1280_v33 = vsel %vm11462_vm9, %v11461_v25, %v1278_v63  ;;  %vm11468_vm13 = vcmask 523264   ;;  %v1242_v36 = vmax.f32 %v7402_v26, %v1210_v12  ;;  %vm11470_vm8 = vmmov %vm11462_vm9 }
 0x216   : > { %vm7842_vm0 = vcmp.lt.s32.totalorder %v11463_v23, 14  ;;  %5265 = vmatmul.mubr.msk.bf16.gmra.mrb[12].mxu1 %vm11468_vm13, %v11467_v11  ;;  %v1151_v53 = vsel %vm7720_vm2, %v1118_v9, -1e+30  ;;  %v1214_v4 = vmax.f32 %v1053_v39, %v1087_v37  ;;  %v11469_v45 = vrot.slane %v11455_v31, 2 }
 0x217   : > { %v11465_v22 = vsel %vm7842_vm0, 4294967295, %v11464_v22  ;;  %v11471_v25 = vand.u32 15, %v7274_v46  ;;  %v11472_v23 = vmov 0  ;;  %v1183_v19 = vmax.f32 %v11475_v52, %v1151_v53  ;;  %v5664_v46 = vpop.eup %5663 }
 0x218   : > { %11466 = vst [vmem:[#allocation69_spill] sm:$0xff] %v11465_v22  ;;  %v1311_v40 = vsel %vm11470_vm8, %v1278_v63, %v11469_v45  ;;  %v11476_v12 = vrot.slane %v7716_v2, 6  ;;  %vm11477_vm13 = vcmp.lt.s32.totalorder %v6035_v43, 2  ;;  %v11478_v39 = vrot.slane %v11455_v31, 6 }
 0x219   : > { %vm7859_vm9 = vcmp.ge.s32.totalorder %v11471_v25, 2  ;;  %v1375_v26 = vsel %vm7733_vm6, %v1311_v40, -1e+30  ;;  %vm11479_vm8 = vmmov %vm11477_vm13  ;;  %v7874_v9 = vmax.f32 %v1242_v36, %v1532_v35  ;;  %v1246_v11 = vmax.f32 %v7758_v51, %v1214_v4  ;;  %v11480_v25 = vld [vmem:[#allocation45_spill] sm:$0xff] }
 0x21a   : > { %v11473_v23 = vsel %vm7859_vm9, 4294967295, %v11472_v23  ;;  %v1409_v37 = vsel %vm11477_vm13, %v11476_v12, %v1407_v62  ;;  %v1440_v63 = vsel %vm11479_vm8, %v1407_v62, %v11478_v39  ;;  %v1215_v40 = vmax.f32 %v11455_v31, %v1183_v19 }
 0x21b   : > { %11474 = vst [vmem:[#allocation63_spill] sm:$0xff] %v11473_v23  ;;  %v1473_v53 = vsel %vm7746_vm12, %v1440_v63, -1e+30  ;;  %v1536_v45 = vmax.f32 %v1375_v26, %v1409_v37  ;;  %v857_v12 = vmul.f32 %v5664_v46, %v7253_v59  ;;  %v3504_v21 = vpack.c.bf16 %v7758_v51, %v7716_v2  ;;  %v11560_v23 = vld [vmem:[#allocation35_spill] sm:$0xff] }
 0x21c   : > { %v1505_v52 = vmax.f32 %v11480_v25, %v1473_v53  ;;  %v11482_v35 = vrot.slane %v7726_v10, 1  ;;  %v11483_v36 = vrot.slane %v7724_v32, 1  ;;  %vm11484_vm13 = vcmp.lt.s32.totalorder %v6035_v43, 7 }
 0x21d   : > { %v7884_v14 = vmax.f32 %v1246_v11, %v1536_v45  ;;  %v11485_v19 = vrot.slane %v7726_v10, 7  ;;  %v11486_v26 = vrot.slane %v7724_v32, 7  ;;  %vm11487_vm8 = vcmp.lt.s32.totalorder %v6035_v43, 1 }
 0x21e   : > { %v2009_v4 = vsel %vm11484_vm13, %v11483_v36, %v11482_v35  ;;  %v1537_v51 = vmax.f32 %v1215_v40, %v1505_v52  ;;  %v954_v37 = vrot.slane %v857_v12, 1  ;;  %v1083_v39 = vrot.slane %v857_v12, 7 }
 0x21f   : > { %11481 = vst [vmem:[#allocation5_spill] sm:$0xff] %v7884_v14  ;;  %v7899_v59 = vsel %vm11487_vm8, %v11486_v26, %v11485_v19  ;;  %v1276_v63 = vrot.slane %v857_v12, 2  ;;  %v1405_v53 = vrot.slane %v857_v12, 6  ;;  %v3503_v45 = vpack.c.bf16 %v857_v12, %v7752_v20  ;;  %vm11489_vm8 = vmmov %vm11484_vm13 }
 0x220   : > { %v1699_v25 = vmax.f32 %v11392_v15, %v1537_v51  ;;  %v11488_v35 = vrot.slane %v7716_v2, 1  ;;  %v960_v40 = vsel %vm11489_vm8, %v953_v30, %v954_v37  ;;  %v11490_v52 = vrot.slane %v7716_v2, 7 }
 0x221   : > { %vm11491_vm6 = vcmp.lt.s32.totalorder %v6035_v43, 1  ;;  %v11492_v11 = vrot.slane %v7752_v20, 7 }
 0x222   : > { %v959_v36 = vsel %vm11484_vm13, %v954_v37, %v11488_v35  ;;  %v1088_v19 = vsel %vm11491_vm6, %v1083_v39, %v11490_v52  ;;  %vm11493_vm14 = vmmov %vm11491_vm6  ;;  %v1211_v35 = vmax.f32 %v960_v40, %v1179_v27  ;;  %vm11494_vm13 = vcmask 523264  }
 0x223   : > { %v1051_v26 = vsel %vm7807_vm7, %v959_v36, -1e+30  ;;  %v1089_v46 = vsel %vm11493_vm14, %v11492_v11, %v1083_v39  ;;  %v1181_v62 = vsel %vm7813_vm4, %v1088_v19, -1e+30  ;;  %5268 = vmatprep.mubr.msk.bf16.mxu1 %vm11494_vm13, %v3503_v45  ;;  %v1731_v30 = vmax.f32 %v11389_v16, %v1699_v25  ;;  %vm11497_vm8 = vmmov %vm11494_vm13 }
 0x224   : > { %v1212_v37 = vmax.f32 %v1051_v26, %v1089_v46  ;;  %v1213_v31 = vmax.f32 %v958_v61, %v1181_v62  ;;  %v11495_v52 = vrot.slane %v7716_v2, 2  ;;  %vm11496_vm6 = vcmp.lt.s32.totalorder %v6035_v43, 6  ;;  %5269 = vmatmul.mubr.msk.bf16.gmra.mrb[16].mxu1 %vm11497_vm8, %v3504_v21 }
 0x225   : > { %v1243_v13 = vmax.f32 %v7752_v20, %v1211_v35  ;;  %v11498_v39 = vrot.slane %v7752_v20, 2  ;;  %vm11499_vm14 = vmmov %vm11496_vm6  ;;  %v11500_v46 = vrot.slane %v7716_v2, 6  ;;  %vm11501_vm13 = vcmp.lt.s32.totalorder %v6035_v43, 2 }
 0x226   : > { %v1281_v36 = vsel %vm11496_vm6, %v1276_v63, %v11495_v52  ;;  %v1244_v62 = vmax.f32 %v857_v12, %v1212_v37  ;;  %v1245_v45 = vmax.f32 %v7716_v2, %v1213_v31  ;;  %v11502_v21 = vrot.slane %v7752_v20, 6  ;;  %vm11503_vm6 = vmmov %vm11501_vm13 }
 0x227   : > { %v1282_v27 = vsel %vm11499_vm14, %v11498_v39, %v1276_v63  ;;  %v1373_v11 = vsel %vm7842_vm0, %v1281_v36, -1e+30  ;;  %v1410_v61 = vsel %vm11501_vm13, %v1405_v53, %v11500_v46  ;;  %v11504_v35 = vmax.f32 %v11389_v16, -1e+30 }
 0x228   : > { %v1411_v25 = vsel %vm11503_vm6, %v11502_v21, %v1405_v53  ;;  %v1503_v40 = vsel %vm7859_vm9, %v1410_v61, -1e+30  ;;  %v1533_v63 = vmax.f32 %v1282_v27, %v1501_v44  ;;  %v11505_v36 = vmax.f32 %v11394_v28, -1e+30 }
 0x229   : > { %v1534_v19 = vmax.f32 %v1373_v11, %v1411_v25  ;;  %v1535_v26 = vmax.f32 %v1280_v33, %v1503_v40  ;;  %v1729_v52 = vmax.f32 %v1537_v51, %v11504_v35  ;;  %v1893_v2 = vmax.f32 %v11399_v34, %v1537_v51 }
 0x22a   : > { %v7954_v39 = vmax.f32 %v1731_v30, %v11505_v36  ;;  %v11506_v20 = vrot.slane %v7724_v32, 7  ;;  %v11507_v31 = vrot.slane %v7707_v29, 7  ;;  %vm11508_vm8 = vcmp.lt.s32.totalorder %v6035_v43, 1 }
 0x22b   : > { %v10893_v44 = vrot.slane %v7724_v32, 2  ;;  %v7964_v53 = vmax.f32 %v1243_v13, %v1533_v63  ;;  %v7966_v33 = vmax.f32 %v1244_v62, %v1534_v19  ;;  %v7968_v16 = vmax.f32 %v1245_v45, %v1535_v26 }
 0x22c   : > { %v2106_v12 = vsel %vm11508_vm8, %v11507_v31, %v11506_v20  ;;  %v11512_v30 = vmax.f32 %v11392_v15, -1e+30  ;;  %v3514_v51 = vpack.c.bf16 %v7682_v38, %v7954_v39  ;;  %v7977_v27 = vmax.f32 %v7657_v18, %v1893_v2 }
 0x22d   : > { %11509 = vst [vmem:[#allocation72_spill] sm:$0xff] %v7964_v53  ;;  %11510 = vst [vmem:[#allocation73_spill] sm:$0xff] %v7966_v33  ;;  %v2119_v46 = vsel %vm6329_vm11, %v2106_v12, -1e+30  ;;  %v2216_v13 = vrot.slane %v7726_v10, 2  ;;  %v2311_v21 = vrot.slane %v7724_v32, 6  ;;  %v3516_v20 = vpack.c.bf16 %v7726_v10, %v7724_v32 }
 0x22e   : > { %11511 = vst [vmem:[#allocation44_spill] sm:$0xff] %v7968_v16  ;;  %v7972_v37 = vmax.f32 %v1729_v52, %v11512_v30  ;;  %v1728_v61 = vmax.f32 %v7966_v33, -1e+30  ;;  %v2151_v45 = vmax.f32 %v2009_v4, %v2119_v46  ;;  %v1957_v25 = vrot.slane %v7977_v27, 1 }
 0x22f   : > { %vm11514_vm14 = vcmask 523264   ;;  %v3515_v26 = vpack.c.bf16 %v7707_v29, %v7977_v27  ;;  %vm11515_vm13 = vcmp.lt.s32.totalorder %v6035_v43, 6  ;;  %v10890_v52 = vrot.slane %v7726_v10, 6 }
 0x230   : > { %v3513_v62 = vpack.c.bf16 %v7695_v54, %v7972_v37  ;;  %v1760_v19 = vmax.f32 %v7884_v14, %v1728_v61  ;;  %v2183_v35 = vmax.f32 %v7724_v32, %v2151_v45  ;;  %v2265_v4 = vsel %vm11515_vm13, %v10893_v44, %v2216_v13  ;;  %vm11516_vm6 = vmmov %vm11514_vm14 }
 0x231   : > { %v11517_v36 = vrot.slane %v7707_v29, 6  ;;  %vm11518_vm8 = vcmp.lt.s32.totalorder %v6035_v43, 2  ;;  %v11519_v31 = vmax.f32 %v11413_v50, %v11396_v48  ;;  %v11520_v30 = vmax.f32 %v7874_v9, -1e+30 }
 0x232   : > { %5200 = vmatprep.mubr.msk.bf16.mxu0 %vm11514_vm14, %v3513_v62  ;;  %vm11521_vm14 = vmmov %vm11516_vm6  ;;  %v11523_v62 = vmax.f32 %v11422_v3, %v11392_v15  ;;  %v11525_v15 = vmax.f32 %v11423_v58, %v11393_v56  ;;  %v1956_v44 = vrot.slane %v7682_v38, 1  ;;  %v11547_v11 = vrot.slane %v7707_v29, 7 }
 0x233   : > { %5201 = vmatmul.mubr.msk.bf16.vlgmr.msra.gmra.mrb[32].mxu0 %vm11516_vm6, %v3514_v51  ;;  %v2362_v2 = vsel %vm11518_vm8, %v11517_v36, %v2311_v21  ;;  %v1738_v12 = vmax.f32 %v11398_v8, %v11519_v31  ;;  %v8013_v46 = vmax.f32 %v1760_v19, %v11520_v30  ;;  %v1707_v36 = vmax.f32 %v11422_v3, %v11399_v34  ;;  %v5794_v31 = vld [vmem:[%s10573_s3] sm:$0xff]   ;;  %vm11524_vm13 = vmmov %vm11518_vm8  ;;  %v5795_v30 = vld [vmem:[%s10573_s3 + $0x8] sm:$0xff]  }
 0x234   : > { %5204 = vmatprep.mubr.msk.bf16.mxu0 %vm11521_vm14, %v3515_v26  ;;  %v2375_v61 = vsel %vm6420_vm15, %v2362_v2, -1e+30  ;;  %v8022_v45 = vmax.f32 %v7729_v49, %v11523_v62  ;;  %5233 = vmatpush3.bf16.msra.mxu0 %v5794_v31  ;;  %v2361_v19 = vsel %vm11524_vm13, %v2311_v21, %v10890_v52  ;;  %v1708_v49 = vmax.f32 %v11423_v58, %v11398_v8  ;;  %vm11532_vm13 = vmmov %vm11521_vm14 }
 0x235   : > { %v2407_v26 = vmax.f32 %v2265_v4, %v2375_v61  ;;  %v8036_v2 = vmax.f32 %v1738_v12, %v11525_v15  ;;  %5234 = vmatprep.subr.bf16.mxu0 %v5795_v30  ;;  %v11526_v52 = vrot.slane %v7726_v10, 1  ;;  %vm11527_vm6 = vcmp.lt.s32.totalorder %v6035_v43, 7 }
 0x236   : > { %v10892_v62 = vrot.slane %v8022_v45, 1  ;;  %v10891_v21 = vrot.slane %v8022_v45, 2  ;;  %vm11528_vm8 = vcmp.lt.s32.totalorder %v6035_v43, 6  ;;  %v1739_v18 = vmax.f32 %v7215_v7, %v1707_v36 }
 0x237   : > { %v8047_v61 = vmax.f32 %v2183_v35, %v2407_v26  ;;  %v3517_v26 = vpack.c.bf16 %v8036_v2, %v8022_v45  ;;  %v10896_v36 = vrot.slane %v7972_v37, 1  ;;  %v2210_v31 = vrot.slane %v7695_v54, 2 }
 0x238   : > { %v2008_v63 = vsel %vm11527_vm6, %v11526_v52, %v10892_v62  ;;  %v2264_v4 = vsel %vm11528_vm8, %v2216_v13, %v10891_v21  ;;  %5235 = vmatpush3.bf16.msra.mxu0 %v5795_v30  ;;  %v1740_v52 = vmax.f32 %v11413_v50, %v1708_v49  ;;  %v5796_v13 = vld [vmem:[%s10573_s3 + $0x10] sm:$0xff]   ;;  %v1954_v49 = vrot.slane %v7695_v54, 1  ;;  %vm11536_vm8 = vmmov %vm11527_vm6 }
 0x239   : > { %v2024_v15 = vsel %vm6513_vm1, %v2008_v63, -1e+30  ;;  %v2280_v56 = vsel %vm6529_vm5, %v2264_v4, -1e+30  ;;  %5236 = vmatprep.subr.bf16.mxu0 %v5796_v13  ;;  %v11531_v30 = vld [vmem:[#allocation75_spill] sm:$0xff]  ;;  %v1900_v4 = vmax.f32 %v7161_v60, %v11396_v48  ;;  %v1955_v62 = vrot.slane %v7954_v39, 1  ;;  %vm11539_vm5 = vmmov %vm11527_vm6 }
 0x23a   : > { %v8075_v35 = vmax.f32 %v2024_v15, %v7899_v59  ;;  %v8077_v21 = vmax.f32 %v2280_v56, %v2361_v19  ;;  %v1899_v63 = vmax.f32 %v11531_v30, %v11394_v28  ;;  %v11533_v28 = vrot.slane %v7724_v32, 1  ;;  %vm11540_vm15 = vmmov %vm11539_vm5 }
 0x23b   : > { %5205 = vmatmul.mubr.msk.bf16.gmra.mrb[36].mxu0 %vm11521_vm14, %v3516_v20  ;;  %v8091_v19 = vmax.f32 %v1740_v52, %v1900_v4  ;;  %v11534_v48 = vrot.slane %v7707_v29, 1  ;;  %vm11537_vm14 = vmmov %vm11527_vm6  ;;  %v2015_v52 = vsel %vm11540_vm15, %v10896_v36, %v1954_v49  ;;  %v11541_v36 = vld [vmem:[#allocation20_spill] sm:$0xff]  ;;  %v2211_v53 = vrot.slane %v7954_v39, 2 }
 0x23c   : > { %5208 = vmatprep.mubr.msk.bf16.mxu0 %vm11532_vm13, %v3517_v26  ;;  %v8089_v59 = vmax.f32 %v1739_v18, %v1899_v63  ;;  %v2012_v40 = vsel %vm11537_vm14, %v1956_v44, %v1957_v25  ;;  %vm11538_vm13 = vmmov %vm11527_vm6  ;;  %v2014_v26 = vsel %vm11539_vm5, %v1954_v49, %v1955_v62  ;;  %5237 = vmatpush3.bf16.msra.mxu0 %v5796_v13  ;;  %v11545_v63 = vld [vmem:[#allocation37_spill] sm:$0xff]  ;;  %v2051_v49 = vrot.slane %v7954_v39, 7 }
 0x23d   : > { %v2010_v20 = vsel %vm11527_vm6, %v11534_v48, %v11533_v28  ;;  %v11535_v56 = vmov %v11534_v48  ;;  %v2013_v18 = vsel %vm11538_vm13, %v1955_v62, %v1956_v44  ;;  %v5797_v44 = vld [vmem:[%s10573_s3 + $0x18] sm:$0xff]   ;;  %vm11542_vm5 = vnez %v11541_v36 }
 0x23e   : > { %v2011_v15 = vsel %vm11536_vm8, %v1957_v25, %v11535_v56  ;;  %5238 = vmatprep.subr.bf16.mxu0 %v5797_v44  ;;  %v3518_v56 = vpack.c.bf16 %v8091_v19, %v8089_v59  ;;  %v2018_v28 = vsel %vm11542_vm5, %v2014_v26, -1e+30  ;;  %v11543_v25 = vld [vmem:[#allocation34_spill] sm:$0xff]  ;;  %vm11546_vm6 = vnez %v11545_v63 }
 0x23f   : > { %vm11544_vm15 = vnez %v11543_v25  ;;  %v2022_v12 = vsel %vm11546_vm6, %v2010_v20, -1e+30  ;;  %v2049_v62 = vrot.slane %v7972_v37, 7  ;;  %v2050_v48 = vrot.slane %v7695_v54, 7 }
 0x240   : > { %v2020_v4 = vsel %vm11544_vm15, %v2012_v40, -1e+30  ;;  %v2052_v13 = vrot.slane %v7682_v38, 7  ;;  %5239 = vmatpush3.bf16.msra.mxu0 %v5797_v44  ;;  %v11548_v26 = vrot.slane %v7977_v27, 7  ;;  %vm11549_vm8 = vcmp.lt.s32.totalorder %v6035_v43, 1 }
 0x241   : > { %vm11550_vm14 = vcmask 523264   ;;  %vm11552_vm13 = vmmov %vm11549_vm8  ;;  %vm11561_vm15 = vnez %v11560_v23 }
 0x242   : > { %v2107_v40 = vsel %vm11549_vm8, %v11548_v26, %v11547_v11  ;;  %v11551_v63 = vmov %v11548_v26  ;;  %vm11553_vm11 = vmmov %vm11549_vm8  ;;  %v11556_v26 = vrot.slane %v8013_v46, 7 }
 0x243   : > { %5209 = vmatmul.mubr.msk.bf16.gmra.mrb[40].mxu0 %vm11550_vm14, %v3518_v56  ;;  %v2108_v44 = vsel %vm11552_vm13, %v2052_v13, %v11551_v63  ;;  %v2109_v51 = vsel %vm11553_vm11, %v2051_v49, %v2052_v13  ;;  %vm11554_vm1 = vmmov %vm11549_vm8  ;;  %v11558_v56 = vld [vmem:[#allocation23_spill] sm:$0xff] }
 0x244   : > { %v2110_v25 = vsel %vm11554_vm1, %v2050_v48, %v2051_v49  ;;  %vm11555_vm6 = vmmov %vm11554_vm1  ;;  %vm11559_vm14 = vnez %v11558_v56  ;;  %v2117_v63 = vsel %vm11561_vm15, %v2108_v44, -1e+30  ;;  %v2148_v49 = vmax.f32 %v2020_v4, %v2109_v51 }
 0x245   : > { %v2111_v11 = vsel %vm11555_vm6, %v2049_v62, %v2050_v48  ;;  %vm11557_vm8 = vmmov %vm11554_vm1  ;;  %v2115_v36 = vsel %vm11559_vm14, %v2110_v25, -1e+30  ;;  %v2149_v14 = vmax.f32 %v2011_v15, %v2117_v63  ;;  %v2150_v48 = vmax.f32 %v2022_v12, %v2107_v40  ;;  %v11575_v63 = vld [vmem:[#allocation40_spill] sm:$0xff] }
 0x246   : > { %v2112_v20 = vsel %vm11557_vm8, %v11556_v26, %v2049_v62  ;;  %v2146_v57 = vmax.f32 %v2018_v28, %v2111_v11  ;;  %v2147_v22 = vmax.f32 %v2013_v18, %v2115_v36  ;;  %v2180_v25 = vmax.f32 %v7682_v38, %v2148_v49  ;;  %v11577_v49 = vld [vmem:[#allocation42_spill] sm:$0xff] }
 0x247   : > { %v2113_v13 = vsel %vm7720_vm2, %v2112_v20, -1e+30  ;;  %v2181_v26 = vmax.f32 %v7977_v27, %v2149_v14  ;;  %v2212_v28 = vrot.slane %v7682_v38, 2  ;;  %v2182_v36 = vmax.f32 %v7707_v29, %v2150_v48  ;;  %v11573_v20 = vld [vmem:[#allocation27_spill] sm:$0xff] }
 0x248   : > { %v2145_v16 = vmax.f32 %v2015_v52, %v2113_v13  ;;  %v2178_v33 = vmax.f32 %v7695_v54, %v2146_v57  ;;  %v2179_v62 = vmax.f32 %v7954_v39, %v2147_v22  ;;  %v11562_v51 = vrot.slane %v7724_v32, 2 }
 0x249   : > { %v11563_v12 = vrot.slane %v7707_v29, 2  ;;  %vm11564_vm1 = vcmp.lt.s32.totalorder %v6035_v43, 6  ;;  %v11566_v22 = vrot.slane %v7977_v27, 2  ;;  %v11572_v4 = vrot.slane %v7972_v37, 2 }
 0x24a   : > { %v2177_v44 = vmax.f32 %v7972_v37, %v2145_v16  ;;  %vm11567_vm11 = vmmov %vm11564_vm1  ;;  %vm11574_vm15 = vnez %v11573_v20  ;;  %vm11578_vm2 = vnez %v11577_v49 }
 0x24b   : > { %v2266_v57 = vsel %vm11564_vm1, %v11563_v12, %v11562_v51  ;;  %v11565_v15 = vmov %v11563_v12  ;;  %v11568_v18 = vmov %v11566_v22  ;;  %vm11569_vm6 = vmmov %vm11564_vm1  ;;  %v2271_v40 = vsel %vm11564_vm1, %v11572_v4, %v2210_v31 }
 0x24c   : > { %v2267_v14 = vsel %vm11567_vm11, %v11566_v22, %v11565_v15  ;;  %v2268_v16 = vsel %vm11569_vm6, %v2212_v28, %v11568_v18  ;;  %vm11570_vm13 = vmmov %vm11564_vm1  ;;  %vm11576_vm11 = vnez %v11575_v63  ;;  %v2278_v48 = vsel %vm11578_vm2, %v2266_v57, -1e+30 }
 0x24d   : > { %v2269_v32 = vsel %vm11570_vm13, %v2211_v53, %v2212_v28  ;;  %vm11571_vm8 = vmmov %vm11564_vm1  ;;  %v2276_v13 = vsel %vm11576_vm11, %v2268_v16, -1e+30  ;;  %v11579_v51 = vrot.slane %v7707_v29, 6  ;;  %v11580_v28 = vrot.slane %v7977_v27, 6 }
 0x24e   : > { %v2270_v52 = vsel %vm11571_vm8, %v2210_v31, %v2211_v53  ;;  %vm11581_vm6 = vcmp.lt.s32.totalorder %v6035_v43, 2  ;;  %v2305_v12 = vrot.slane %v7972_v37, 6  ;;  %v2306_v31 = vrot.slane %v7695_v54, 6 }
 0x24f   : > { %v2274_v11 = vsel %vm11574_vm15, %v2270_v52, -1e+30  ;;  %v2363_v53 = vsel %vm11581_vm6, %v11580_v28, %v11579_v51  ;;  %v2307_v15 = vrot.slane %v7954_v39, 6  ;;  %v2308_v22 = vrot.slane %v7682_v38, 6  ;;  %vm11583_vm13 = vmmov %vm11581_vm6  ;;  %v11588_v51 = vld [vmem:[#allocation29_spill] sm:$0xff] }
 0x250   : > { %v10912_v18 = vrot.slane %v8013_v46, 6  ;;  %v2406_v16 = vmax.f32 %v2278_v48, %v2363_v53  ;;  %v1709_v57 = vmax.f32 %v11531_v30, %v7215_v7  ;;  %v1710_v29 = vmax.f32 %v7161_v60, %v11413_v50  ;;  %vm11584_vm8 = vmmov %vm11581_vm6 }
 0x251   : > { %v11582_v52 = vmov %v11580_v28  ;;  %v2365_v54 = vsel %vm11584_vm8, %v2307_v15, %v2308_v22  ;;  %vm11585_vm1 = vmmov %vm11581_vm6  ;;  %vm11589_vm11 = vnez %v11588_v51  ;;  %v11590_v28 = vld [vmem:[#allocation46_spill] sm:$0xff]  ;;  %vm11598_vm8 = vcmask 523264  }
 0x252   : > { %v2364_v4 = vsel %vm11583_vm13, %v2308_v22, %v11582_v52  ;;  %v2366_v38 = vsel %vm11585_vm1, %v2306_v31, %v2307_v15  ;;  %vm11586_vm6 = vmmov %vm11585_vm1  ;;  %vm11591_vm15 = vnez %v11590_v28  ;;  %v2404_v15 = vmax.f32 %v2276_v13, %v2365_v54 }
 0x253   : > { %v2367_v39 = vsel %vm11586_vm6, %v2305_v12, %v2306_v31  ;;  %vm11587_vm2 = vmmov %vm11585_vm1  ;;  %v2371_v27 = vsel %vm11589_vm11, %v2366_v38, -1e+30  ;;  %v2373_v53 = vsel %vm11591_vm15, %v2364_v4, -1e+30  ;;  %v8241_v23 = vmax.f32 %v2182_v36, %v2406_v16 }
 0x254   : > { %v2368_v48 = vsel %vm11587_vm2, %v10912_v18, %v2305_v12  ;;  %v2402_v52 = vmax.f32 %v2274_v11, %v2367_v39  ;;  %v2403_v49 = vmax.f32 %v2269_v32, %v2371_v27  ;;  %v2405_v63 = vmax.f32 %v2267_v14, %v2373_v53 }
 0x255   : > { %v2369_v22 = vsel %vm7746_vm12, %v2368_v48, -1e+30  ;;  %v1741_v12 = vmax.f32 %v11422_v3, %v1709_v57  ;;  %v8246_v38 = vmax.f32 %v2180_v25, %v2404_v15  ;;  %v1742_v11 = vmax.f32 %v11423_v58, %v1710_v29 }
 0x256   : > { %v2401_v20 = vmax.f32 %v2271_v40, %v2369_v22  ;;  %v8239_v31 = vmax.f32 %v2178_v33, %v2402_v52  ;;  %v8244_v18 = vmax.f32 %v2179_v62, %v2403_v49  ;;  %v8248_v28 = vmax.f32 %v2181_v26, %v2405_v63 }
 0x257   : > { %v2658_v33 = vmax.f32 %v8241_v23, -1e+30  ;;  %v1901_v36 = vmax.f32 %v7195_v55, %v11399_v34  ;;  %v2530_v62 = vmax.f32 %v8246_v38, -1e+30  ;;  %v1902_v26 = vmax.f32 %v7197_v24, %v11398_v8 }
 0x258   : > { %v8251_v4 = vmax.f32 %v2177_v44, %v2401_v20  ;;  %v2532_v14 = vmax.f32 %v8241_v23, %v8239_v31  ;;  %v2529_v32 = vmax.f32 %v8244_v18, -1e+30  ;;  %v2657_v25 = vmax.f32 %v8248_v28, -1e+30 }
 0x259   : > { %v8265_v40 = vmax.f32 %v1741_v12, %v1901_v36  ;;  %v2184_v20 = vmax.f32 %v7726_v10, %v8075_v35  ;;  %v2562_v13 = vmax.f32 %v8239_v31, %v2530_v62  ;;  %v8272_v49 = vmax.f32 %v1742_v11, %v1902_v26  ;;  %v11599_v26 = vld [vmem:[#allocation64_spill] sm:$0xff] }
 0x25a   : > { %v2531_v44 = vmax.f32 %v8248_v28, %v8251_v4  ;;  %v2564_v63 = vmax.f32 %v8246_v38, %v2532_v14  ;;  %v2561_v34 = vmax.f32 %v8251_v4, %v2529_v32  ;;  %v2659_v16 = vmax.f32 %v8047_v61, -1e+30 }
 0x25b   : > { %v10913_v8 = vrot.slane %v8265_v40, 1  ;;  %v10914_v29 = vrot.slane %v8265_v40, 2  ;;  %v8281_v35 = vmax.f32 %v2562_v13, %v2658_v33  ;;  %v3519_v22 = vpack.c.bf16 %v8272_v49, %v8265_v40 }
 0x25c   : > { %v8279_v39 = vmax.f32 %v2561_v34, %v2657_v25  ;;  %v8290_v15 = vmax.f32 %v2184_v20, %v8077_v21  ;;  %v2563_v11 = vmax.f32 %v8244_v18, %v2531_v44  ;;  %v11592_v14 = vrot.slane %v8089_v59, 1 }
 0x25d   : > { %v11593_v33 = vrot.slane %v8036_v2, 1  ;;  %vm11594_vm2 = vcmp.lt.s32.totalorder %v6035_v43, 7  ;;  %v11596_v62 = vrot.slane %v8022_v45, 1  ;;  %5212 = vmatprep.mubr.msk.bf16.mxu0 %vm11598_vm8, %v3519_v22  ;;  %vm11600_vm1 = vnez %v11599_v26 }
 0x25e   : > { %v4004_v12 = vpack.c.bf16 %v8281_v35, %v8279_v39  ;;  %vm11597_vm13 = vmmov %vm11594_vm2  ;;  %v2660_v25 = vmax.f32 %v8290_v15, -1e+30  ;;  %v11601_v20 = vrot.slane %v8036_v2, 7  ;;  %v11602_v34 = vrot.slane %v8022_v45, 7 }
 0x25f   : > { %v2006_v36 = vsel %vm11594_vm2, %v11593_v33, %v11592_v14  ;;  %v11595_v32 = vmov %v11593_v33  ;;  %vm11603_vm6 = vcmp.lt.s32.totalorder %v6035_v43, 1  ;;  %v11605_v33 = vrot.slane %v7726_v10, 7 }
 0x260   : > { %v2007_v21 = vsel %vm11597_vm13, %v11596_v62, %v11595_v32  ;;  %v2026_v44 = vsel %vm11600_vm1, %v2006_v36, -1e+30  ;;  %v2103_v13 = vsel %vm11603_vm6, %v11602_v34, %v11601_v20  ;;  %v11604_v14 = vmov %v11602_v34  ;;  %vm11606_vm2 = vmmov %vm11603_vm6  ;;  %v11608_v62 = vld [vmem:[#allocation61_spill] sm:$0xff] }
 0x261   : > { %v2104_v32 = vsel %vm11606_vm2, %v11605_v33, %v11604_v14  ;;  %vm11607_vm13 = vmmov %vm11598_vm8  ;;  %v8324_v22 = vmax.f32 %v2563_v11, %v2659_v16  ;;  %vm11609_vm8 = vnez %v11608_v62  ;;  %v2154_v54 = vmax.f32 %v2026_v44, %v2103_v13  ;;  %v11616_v11 = vld [vmem:[#allocation43_spill] sm:$0xff] }
 0x262   : > { %5280 = vmatprep.mubr.msk.bf16.mxu1 %vm11607_vm13, %v4004_v12  ;;  %v2121_v36 = vsel %vm11609_vm8, %v2104_v32, -1e+30  ;;  %v11610_v52 = vrot.slane %v8089_v59, 2  ;;  %v11611_v53 = vrot.slane %v8036_v2, 2  ;;  %vm11612_vm6 = vcmp.lt.s32.totalorder %v6035_v43, 6 }
 0x263   : > { %v8334_v34 = vmax.f32 %v2564_v63, %v2660_v25  ;;  %v2153_v57 = vmax.f32 %v2007_v21, %v2121_v36  ;;  %v11614_v12 = vrot.slane %v8022_v45, 2  ;;  %vm11615_vm2 = vmmov %vm11612_vm6  ;;  %vm11617_vm13 = vnez %v11616_v11 }
 0x264   : > { %v2262_v20 = vsel %vm11612_vm6, %v11611_v53, %v11610_v52  ;;  %v11613_v14 = vmov %v11611_v53  ;;  %v2186_v13 = vmax.f32 %v8036_v2, %v2154_v54  ;;  %v11618_v33 = vrot.slane %v8036_v2, 6 }
 0x265   : > { %v2263_v16 = vsel %vm11615_vm2, %v11614_v12, %v11613_v14  ;;  %v2282_v44 = vsel %vm11617_vm13, %v2262_v20, -1e+30  ;;  %v11619_v32 = vrot.slane %v8022_v45, 6  ;;  %vm11620_vm6 = vcmp.lt.s32.totalorder %v6035_v43, 2  ;;  %v11624_v20 = vld [vmem:[#allocation66_spill] sm:$0xff] }
 0x266   : > { %v11622_v52 = vrot.slane %v7726_v10, 6  ;;  %vm11623_vm8 = vmmov %vm11620_vm6  ;;  %v2533_v25 = vmax.f32 %v8047_v61, %v8244_v18  ;;  %v4005_v54 = vpack.c.bf16 %v8334_v34, %v8324_v22  ;;  %v2185_v36 = vmax.f32 %v8022_v45, %v2153_v57 }
 0x267   : > { %v2359_v63 = vsel %vm11620_vm6, %v11619_v32, %v11618_v33  ;;  %v11621_v53 = vmov %v11619_v32  ;;  %vm11625_vm2 = vnez %v11624_v20  ;;  %v5534_v33 = vld [vmem:[%s10576_s6 + $0x8] sm:$0xff]   ;;  %v2534_v32 = vmax.f32 %v8290_v15, %v8246_v38 }
 0x268   : > { %v2360_v21 = vsel %vm11623_vm8, %v11622_v52, %v11621_v53  ;;  %v2410_v12 = vmax.f32 %v2282_v44, %v2359_v63  ;;  %v2565_v53 = vmax.f32 %v8248_v28, %v2533_v25  ;;  %v1711_v52 = vmax.f32 %v7195_v55, %v11422_v3 }
 0x269   : > { %v2377_v14 = vsel %vm11625_vm2, %v2360_v21, -1e+30  ;;  %vm11626_vm8 = vcmask 523264   ;;  %v1712_v57 = vmax.f32 %v7197_v24, %v11423_v58  ;;  %v1903_v44 = vmax.f32 %v7199_v17, %v7215_v7 }
 0x26a   : > { %v2409_v10 = vmax.f32 %v2263_v16, %v2377_v14  ;;  %5281 = vmatmul.mubr.msk.bf16.vlgmr.msra.gmra.mrb[20].mxu1 %vm11626_vm8, %v4005_v54  ;;  %v8373_v45 = vmax.f32 %v2186_v13, %v2410_v12  ;;  %v1904_v16 = vmax.f32 %v7436_v42, %v11413_v50  ;;  %v2566_v21 = vmax.f32 %v8241_v23, %v2534_v32  ;;  %v5535_v50 = vld [vmem:[%s10576_s6 + $0x10] sm:$0xff]  }
 0x26b   : > { %5313 = vmatpush3.bf16.msra.mxu1 %v7466_v6  ;;  %v1743_v25 = vmax.f32 %v11531_v30, %v1711_v52  ;;  %v1713_v13 = vmax.f32 %v7199_v17, %v11531_v30  ;;  %v1744_v14 = vmax.f32 %v7161_v60, %v1712_v57  ;;  %v1714_v7 = vmax.f32 %v7436_v42, %v7161_v60 }
 0x26c   : > { %v8382_v63 = vmax.f32 %v2185_v36, %v2409_v10  ;;  %v2662_v54 = vmax.f32 %v8373_v45, %v8239_v31  ;;  %v1905_v6 = vmax.f32 %v7499_v1, %v11422_v3  ;;  %5314 = vmatprep.subr.bf16.mxu1 %v5534_v33  ;;  %v1906_v10 = vmax.f32 %v7510_v5, %v11423_v58 }
 0x26d   : > { %v8400_v12 = vmax.f32 %v1743_v25, %v1903_v44  ;;  %v1745_v31 = vmax.f32 %v7195_v55, %v1713_v13  ;;  %v8407_v52 = vmax.f32 %v1744_v14, %v1904_v16  ;;  %v1746_v3 = vmax.f32 %v7197_v24, %v1714_v7  ;;  %v11632_v16 = vld [vmem:[#allocation6_spill] sm:$0xff] }
 0x26e   : > { %v2661_v36 = vmax.f32 %v8382_v63, %v8251_v4  ;;  %v8405_v32 = vmax.f32 %v2566_v21, %v2662_v54  ;;  %v11627_v57 = vrot.slane %v8091_v19, 1  ;;  %vm11628_vm6 = vcmp.lt.s32.totalorder %v6035_v43, 7 }
 0x26f   : > { %5315 = vmatpush3.bf16.msra.mxu1 %v5534_v33  ;;  %v5536_v33 = vld [vmem:[%s10576_s6 + $0x18] sm:$0xff]   ;;  %v8435_v13 = vmax.f32 %v1746_v3, %v1906_v10  ;;  %v11629_v54 = vrot.slane %v8091_v19, 1  ;;  %v11630_v14 = vrot.slane %v8089_v59, 1  ;;  %vm11631_vm8 = vmmov %vm11628_vm6  ;;  %v11634_v58 = vrot.slane %v8091_v19, 7 }
 0x270   : > { %v2004_v4 = vsel %vm11628_vm6, %v11627_v57, %v10913_v8  ;;  %v8416_v44 = vmax.f32 %v2565_v53, %v2661_v36  ;;  %5316 = vmatprep.subr.bf16.mxu1 %v5535_v50  ;;  %v3520_v36 = vpack.c.bf16 %v8407_v52, %v8400_v12  ;;  %v8430_v57 = vmax.f32 %v1745_v31, %v1905_v6 }
 0x271   : > { %v2005_v21 = vsel %vm11631_vm8, %v11630_v14, %v11629_v54  ;;  %vm11633_vm6 = vnez %v11632_v16  ;;  %v11635_v6 = vrot.slane %v8089_v59, 7  ;;  %vm11636_vm2 = vcmp.lt.s32.totalorder %v6035_v43, 1 }
 0x272   : > { %v4006_v53 = vpack.c.bf16 %v8405_v32, %v8416_v44  ;;  %v2028_v7 = vsel %vm11633_vm6, %v2004_v4, -1e+30  ;;  %vm11637_vm13 = vcmask 523264   ;;  %v11642_v27 = vrot.slane %v8091_v19, 2 }
 0x273   : > { %v2101_v31 = vsel %vm11636_vm2, %v11635_v6, %v11634_v58  ;;  %vm11638_vm1 = vmmov %vm11637_vm13  ;;  %5317 = vmatpush3.bf16.msra.mxu1 %v5535_v50  ;;  %v11644_v50 = vld [vmem:[#allocation65_spill] sm:$0xff]  ;;  %v11647_v54 = vrot.slane %v8089_v59, 2  ;;  %vm11654_vm6 = vcmask 523264   ;;  %v11656_v25 = vrot.slane %v8036_v2, 6 }
 0x274   : > { %5284 = vmatprep.mubr.msk.bf16.mxu1 %vm11637_vm13, %v4006_v53  ;;  %5213 = vmatmul.mubr.msk.bf16.gmra.mrb[44].mxu0 %vm11638_vm1, %v3520_v36  ;;  %v3521_v53 = vpack.c.bf16 %v8435_v13, %v8430_v57  ;;  %v11639_v36 = vmov %v11635_v6  ;;  %v11640_v6 = vrot.slane %v8036_v2, 7  ;;  %vm11641_vm1 = vmmov %vm11636_vm2  ;;  %v2156_v14 = vmax.f32 %v2028_v7, %v2101_v31 }
 0x275   : > { %vm11643_vm13 = vcmp.lt.s32.totalorder %v6035_v43, 6  ;;  %5318 = vmatprep.subr.bf16.mxu1 %v5536_v33  ;;  %vm11645_vm2 = vnez %v11644_v50  ;;  %v11646_v4 = vmov %v11642_v27  ;;  %v11651_v31 = vrot.slane %v8091_v19, 6 }
 0x276   : > { %v2102_v3 = vsel %vm11641_vm1, %v11640_v6, %v11639_v36  ;;  %v2260_v8 = vsel %vm11643_vm13, %v11642_v27, %v10914_v29  ;;  %vm11648_vm8 = vmmov %vm11643_vm13  ;;  %v11649_v36 = vld [vmem:[#allocation7_spill] sm:$0xff]  ;;  %v11652_v6 = vrot.slane %v8089_v59, 6  ;;  %vm11653_vm13 = vcmp.lt.s32.totalorder %v6035_v43, 2  ;;  %5216 = vmatprep.mubr.msk.bf16.mxu0 %vm11654_vm6, %v3521_v53 }
 0x277   : > { %v2123_v58 = vsel %vm11645_vm2, %v2102_v3, -1e+30  ;;  %v2261_v10 = vsel %vm11648_vm8, %v11647_v54, %v11646_v4  ;;  %vm11650_vm1 = vnez %v11649_v36  ;;  %v2188_v29 = vmax.f32 %v8091_v19, %v2156_v14  ;;  %vm11657_vm8 = vmmov %vm11653_vm13  ;;  %v11658_v4 = vld [vmem:[#allocation15_spill] sm:$0xff]  ;;  %5319 = vmatpush3.bf16.msra.mxu1 %v5536_v33 }
 0x278   : > { %v2284_v7 = vsel %vm11650_vm1, %v2260_v8, -1e+30  ;;  %v2357_v27 = vsel %vm11653_vm13, %v11652_v6, %v11651_v31  ;;  %v2155_v3 = vmax.f32 %v2005_v21, %v2123_v58  ;;  %v11655_v48 = vmov %v11652_v6 }
 0x279   : > { %v2358_v54 = vsel %vm11657_vm8, %v11656_v25, %v11655_v48  ;;  %v2412_v8 = vmax.f32 %v2284_v7, %v2357_v27  ;;  %vm11659_vm1 = vnez %v11658_v4  ;;  %v2535_v50 = vmax.f32 %v8382_v63, %v8248_v28  ;;  %v11666_v4 = vld [vmem:[#allocation48_spill] sm:$0xff] }
 0x27a   : > { %v2379_v36 = vsel %vm11659_vm1, %v2358_v54, -1e+30  ;;  %v2536_v53 = vmax.f32 %v8373_v45, %v8241_v23  ;;  %v11660_v21 = vrot.slane %v8400_v12, 1  ;;  %v11661_v14 = vrot.slane %v8272_v49, 1 }
 0x27b   : > { %vm11662_vm6 = vcmp.lt.s32.totalorder %v6035_v43, 7  ;;  %v2187_v48 = vmax.f32 %v8089_v59, %v2155_v3  ;;  %v2411_v25 = vmax.f32 %v2261_v10, %v2379_v36  ;;  %v8512_v58 = vmax.f32 %v2188_v29, %v2412_v8 }
 0x27c   : > { %v2002_v2 = vsel %vm11662_vm6, %v11661_v14, %v11660_v21  ;;  %v11663_v7 = vmov %v11661_v14  ;;  %v11664_v31 = vrot.slane %v8265_v40, 1  ;;  %vm11665_vm13 = vmmov %vm11662_vm6  ;;  %v2567_v27 = vmax.f32 %v8047_v61, %v2535_v50  ;;  %v11674_v14 = vld [vmem:[#allocation17_spill] sm:$0xff] }
 0x27d   : > { %v2568_v54 = vmax.f32 %v8290_v15, %v2536_v53  ;;  %vm11667_vm8 = vnez %v11666_v4  ;;  %v11668_v33 = vrot.slane %v8272_v49, 7  ;;  %v11669_v59 = vrot.slane %v8265_v40, 7 }
 0x27e   : > { %v2003_v6 = vsel %vm11665_vm13, %v11664_v31, %v11663_v7  ;;  %v2030_v21 = vsel %vm11667_vm8, %v2002_v2, -1e+30  ;;  %vm11670_vm6 = vcmp.lt.s32.totalorder %v6035_v43, 1  ;;  %v8530_v10 = vmax.f32 %v2187_v48, %v2411_v25 }
 0x27f   : > { %v2099_v29 = vsel %vm11670_vm6, %v11669_v59, %v11668_v33  ;;  %v2664_v36 = vmax.f32 %v8512_v58, %v8246_v38  ;;  %v11671_v3 = vmov %v11669_v59  ;;  %v11672_v50 = vrot.slane %v8091_v19, 7  ;;  %vm11673_vm13 = vmmov %vm11670_vm6 }
 0x280   : > { %v2158_v53 = vmax.f32 %v2030_v21, %v2099_v29  ;;  %vm11675_vm8 = vnez %v11674_v14  ;;  %v11676_v7 = vrot.slane %v8400_v12, 2  ;;  %v11677_v31 = vrot.slane %v8272_v49, 2 }
 0x281   : > { %v2100_v8 = vsel %vm11673_vm13, %v11672_v50, %v11671_v3  ;;  %vm11678_vm6 = vcmp.lt.s32.totalorder %v6035_v43, 6  ;;  %v11680_v25 = vrot.slane %v8265_v40, 2  ;;  %v11682_v59 = vrot.slane %v8272_v49, 6 }
 0x282   : > { %v2125_v2 = vsel %vm11675_vm8, %v2100_v8, -1e+30  ;;  %v2258_v48 = vsel %vm11678_vm6, %v11677_v31, %v11676_v7  ;;  %v11679_v38 = vmov %v11677_v31  ;;  %vm11681_vm1 = vmmov %vm11678_vm6  ;;  %v11683_v21 = vrot.slane %v8265_v40, 6  ;;  %v11685_v31 = vld [vmem:[#allocation9_spill] sm:$0xff] }
 0x283   : > { %v2259_v33 = vsel %vm11681_vm1, %v11680_v25, %v11679_v38  ;;  %vm11684_vm13 = vcmp.lt.s32.totalorder %v6035_v43, 2  ;;  %v2663_v3 = vmax.f32 %v8530_v10, %v8244_v18  ;;  %v8562_v50 = vmax.f32 %v2568_v54, %v2664_v36  ;;  %v11690_v36 = vld [vmem:[#allocation14_spill] sm:$0xff] }
 0x284   : > { %v2355_v29 = vsel %vm11684_vm13, %v11683_v21, %v11682_v59  ;;  %v2157_v8 = vmax.f32 %v2003_v6, %v2125_v2  ;;  %v2190_v7 = vmax.f32 %v8272_v49, %v2158_v53  ;;  %vm11686_vm6 = vnez %v11685_v31  ;;  %vm11689_vm1 = vmmov %vm11684_vm13 }
 0x285   : > { %v2286_v14 = vsel %vm11686_vm6, %v2258_v48, -1e+30  ;;  %v11687_v38 = vmov %v11683_v21  ;;  %v11688_v25 = vrot.slane %v8091_v19, 6  ;;  %v2537_v59 = vmax.f32 %v8530_v10, %v8047_v61 }
 0x286   : > { %v2538_v18 = vmax.f32 %v8512_v58, %v8290_v15  ;;  %v8577_v54 = vmax.f32 %v2567_v27, %v2663_v3  ;;  %v2189_v6 = vmax.f32 %v8265_v40, %v2157_v8  ;;  %vm11691_vm13 = vnez %v11690_v36  ;;  %v11692_v27 = vld [vmem:[#allocation85_spill] sm:$0xff] }
 0x287   : > { %v2356_v4 = vsel %vm11689_vm1, %v11688_v25, %v11687_v38  ;;  %v2414_v2 = vmax.f32 %v2286_v14, %v2355_v29  ;;  %v2569_v19 = vmax.f32 %v8382_v63, %v2537_v59  ;;  %v1715_v38 = vmax.f32 %v7499_v1, %v7195_v55  ;;  %v11694_v59 = vld [vmem:[#allocation86_spill] sm:$0xff] }
 0x288   : > { %v2381_v53 = vsel %vm11691_vm13, %v2356_v4, -1e+30  ;;  %v2570_v21 = vmax.f32 %v8373_v45, %v2538_v18  ;;  %v4007_v25 = vpack.c.bf16 %v8562_v50, %v8577_v54  ;;  %v1716_v40 = vmax.f32 %v7510_v5, %v7197_v24 }
 0x289   : > { %v2413_v48 = vmax.f32 %v2259_v33, %v2381_v53  ;;  %v8588_v31 = vmax.f32 %v2190_v7, %v2414_v2  ;;  %v1907_v4 = vmax.f32 %v11692_v27, %v11531_v30  ;;  %v1747_v33 = vmax.f32 %v7199_v17, %v1715_v38  ;;  %v11695_v2 = vld [vmem:[#allocation87_spill] sm:$0xff] }
 0x28a   : > { %v1908_v29 = vmax.f32 %v7579_v41, %v7161_v60  ;;  %v1717_v3 = vmax.f32 %v11692_v27, %v7199_v17  ;;  %vm11693_vm1 = vcmask 523264   ;;  %v1748_v7 = vmax.f32 %v7436_v42, %v1716_v40 }
 0x28b   : > { %v8594_v14 = vmax.f32 %v2189_v6, %v2413_v48  ;;  %5285 = vmatmul.mubr.msk.bf16.gmra.mrb[24].mxu1 %vm11693_vm1, %v4007_v25  ;;  %v2666_v8 = vmax.f32 %v8588_v31, %v8241_v23  ;;  %v1718_v30 = vmax.f32 %v7579_v41, %v7436_v42  ;;  %v1909_v18 = vmax.f32 %v11694_v59, %v7195_v55 }
 0x28c   : > { %v8611_v60 = vmax.f32 %v1747_v33, %v1907_v4  ;;  %v1749_v53 = vmax.f32 %v7499_v1, %v1717_v3  ;;  %v1910_v48 = vmax.f32 %v11695_v2, %v7197_v24  ;;  %v8618_v23 = vmax.f32 %v1748_v7, %v1908_v29 }
 0x28d   : > { %v2665_v6 = vmax.f32 %v8594_v14, %v8248_v28  ;;  %v8616_v38 = vmax.f32 %v2570_v21, %v2666_v8  ;;  %v1750_v25 = vmax.f32 %v7510_v5, %v1718_v30  ;;  %v11696_v40 = vrot.slane %v8430_v57, 1  ;;  %v11701_v30 = vld [vmem:[#allocation21_spill] sm:$0xff] }
 0x28e   : > { %v11697_v55 = vrot.slane %v8407_v52, 1  ;;  %vm11698_vm1 = vcmp.lt.s32.totalorder %v6035_v43, 7  ;;  %v11699_v29 = vrot.slane %v8407_v52, 1  ;;  %v11700_v8 = vrot.slane %v8400_v12, 1 }
 0x28f   : > { %v8627_v4 = vmax.f32 %v2569_v19, %v2665_v6  ;;  %v8644_v3 = vmax.f32 %v1750_v25, %v1910_v48  ;;  %vm11702_vm13 = vnez %v11701_v30  ;;  %vm11703_vm6 = vcmask 523264  }
 0x290   : > { %v2000_v28 = vsel %vm11698_vm1, %v11697_v55, %v11696_v40  ;;  %v3522_v40 = vpack.c.bf16 %v8618_v23, %v8611_v60  ;;  %v8642_v55 = vmax.f32 %v1749_v53, %v1909_v18  ;;  %v2001_v7 = vsel %vm11698_vm1, %v11700_v8, %v11699_v29  ;;  %vm11704_vm8 = vmmov %vm11703_vm6 }
 0x291   : > { %v4008_v19 = vpack.c.bf16 %v8616_v38, %v8627_v4  ;;  %v2032_v21 = vsel %vm11702_vm13, %v2000_v28, -1e+30  ;;  %v11705_v6 = vrot.slane %v8407_v52, 7  ;;  %v11706_v18 = vrot.slane %v8400_v12, 7 }
 0x292   : > { %5217 = vmatmul.mubr.msk.bf16.gmra.mrb[48].mxu0 %vm11704_vm8, %v3522_v40  ;;  %vm11707_vm2 = vcmp.lt.s32.totalorder %v6035_v43, 1  ;;  %v11709_v25 = vrot.slane %v8272_v49, 7  ;;  %v11711_v28 = vrot.slane %v8430_v57, 2  ;;  %v11712_v8 = vrot.slane %v8407_v52, 2 }
 0x293   : > { %5288 = vmatprep.mubr.msk.bf16.mxu1 %vm11703_vm6, %v4008_v19  ;;  %v2097_v53 = vsel %vm11707_vm2, %v11706_v18, %v11705_v6  ;;  %v11708_v48 = vmov %v11706_v18  ;;  %vm11710_vm1 = vmmov %vm11707_vm2  ;;  %vm11713_vm8 = vcmp.lt.s32.totalorder %v6035_v43, 6  ;;  %v11716_v6 = vrot.slane %v8407_v52, 2 }
 0x294   : > { %v2098_v29 = vsel %vm11710_vm1, %v11709_v25, %v11708_v48  ;;  %v2256_v19 = vsel %vm11713_vm8, %v11712_v8, %v11711_v28  ;;  %v3523_v28 = vpack.c.bf16 %v8644_v3, %v8642_v55  ;;  %v11714_v8 = vld [vmem:[#allocation49_spill] sm:$0xff]  ;;  %v2160_v24 = vmax.f32 %v2032_v21, %v2097_v53  ;;  %vm11718_vm6 = vmmov %vm11713_vm8  ;;  %v11719_v48 = vld [vmem:[#allocation12_spill] sm:$0xff] }
 0x295   : > { %vm11715_vm2 = vnez %v11714_v8  ;;  %v11717_v18 = vrot.slane %v8400_v12, 2  ;;  %vm11720_vm1 = vnez %v11719_v48  ;;  %v11721_v36 = vrot.slane %v8407_v52, 6 }
 0x296   : > { %v2127_v40 = vsel %vm11715_vm2, %v2098_v29, -1e+30  ;;  %v2288_v25 = vsel %vm11720_vm1, %v2256_v19, -1e+30  ;;  %v11722_v16 = vrot.slane %v8400_v12, 6  ;;  %vm11723_vm8 = vcmp.lt.s32.totalorder %v6035_v43, 2 }
 0x297   : > { %v2257_v33 = vsel %vm11718_vm6, %v11717_v18, %v11716_v6  ;;  %v2159_v30 = vmax.f32 %v2001_v7, %v2127_v40  ;;  %v11725_v53 = vrot.slane %v8272_v49, 6  ;;  %vm11726_vm2 = vmmov %vm11723_vm8  ;;  %vm11727_vm13 = vcmask 523264   ;;  %v11728_v40 = vld [vmem:[#allocation68_spill] sm:$0xff] }
 0x298   : > { %v2353_v8 = vsel %vm11723_vm8, %v11722_v16, %v11721_v36  ;;  %v11724_v21 = vmov %v11722_v16  ;;  %5220 = vmatprep.mubr.msk.bf16.mxu0 %vm11727_vm13, %v3523_v28  ;;  %v2192_v7 = vmax.f32 %v8407_v52, %v2160_v24  ;;  %vm11729_vm6 = vnez %v11728_v40 }
 0x299   : > { %v2354_v29 = vsel %vm11726_vm2, %v11725_v53, %v11724_v21  ;;  %v2416_v6 = vmax.f32 %v2288_v25, %v2353_v8  ;;  %v2539_v18 = vmax.f32 %v8594_v14, %v8382_v63  ;;  %v2191_v16 = vmax.f32 %v8400_v12, %v2159_v30 }
 0x29a   : > { %v2383_v19 = vsel %vm11729_vm6, %v2354_v29, -1e+30  ;;  %v2540_v49 = vmax.f32 %v8588_v31, %v8373_v45  ;;  %v11730_v48 = vrot.slane %v8611_v60, 1  ;;  %v11731_v21 = vrot.slane %v8435_v13, 1 }
 0x29b   : > { %v2415_v36 = vmax.f32 %v2257_v33, %v2383_v19  ;;  %vm11732_vm13 = vcmp.lt.s32.totalorder %v6035_v43, 7  ;;  %v8722_v28 = vmax.f32 %v2192_v7, %v2416_v6  ;;  %v2571_v25 = vmax.f32 %v8530_v10, %v2539_v18  ;;  %v11736_v33 = vld [vmem:[#allocation13_spill] sm:$0xff] }
 0x29c   : > { %v1998_v24 = vsel %vm11732_vm13, %v11731_v21, %v11730_v48  ;;  %v11733_v8 = vmov %v11731_v21  ;;  %v11734_v53 = vrot.slane %v8430_v57, 1  ;;  %vm11735_vm2 = vmmov %vm11732_vm13  ;;  %vm11737_vm8 = vnez %v11736_v33 }
 0x29d   : > { %v2034_v30 = vsel %vm11737_vm8, %v1998_v24, -1e+30  ;;  %v8733_v29 = vmax.f32 %v2191_v16, %v2415_v36  ;;  %v2572_v19 = vmax.f32 %v8512_v58, %v2540_v49  ;;  %v11738_v48 = vrot.slane %v8435_v13, 7  ;;  %v11744_v36 = vld [vmem:[#allocation11_spill] sm:$0xff] }
 0x29e   : > { %v1999_v12 = vsel %vm11735_vm2, %v11734_v53, %v11733_v8  ;;  %v11739_v7 = vrot.slane %v8430_v57, 7  ;;  %vm11740_vm13 = vcmp.lt.s32.totalorder %v6035_v43, 1  ;;  %v11742_v21 = vrot.slane %v8407_v52, 7 }
 0x29f   : > { %vm11743_vm2 = vmmov %vm11740_vm13  ;;  %v2668_v16 = vmax.f32 %v8722_v28, %v8290_v15  ;;  %vm11745_vm8 = vnez %v11744_v36  ;;  %v11746_v53 = vrot.slane %v8611_v60, 2  ;;  %v11747_v33 = vrot.slane %v8435_v13, 2 }
 0x2a0   : > { %v2095_v6 = vsel %vm11740_vm13, %v11739_v7, %v11738_v48  ;;  %v11741_v18 = vmov %v11739_v7  ;;  %vm11748_vm13 = vcmp.lt.s32.totalorder %v6035_v43, 6  ;;  %v2667_v7 = vmax.f32 %v8733_v29, %v8047_v61 }
 0x2a1   : > { %v2096_v8 = vsel %vm11743_vm2, %v11742_v21, %v11741_v18  ;;  %v2162_v24 = vmax.f32 %v2034_v30, %v2095_v6  ;;  %v2254_v48 = vsel %vm11748_vm13, %v11747_v33, %v11746_v53  ;;  %v11749_v18 = vmov %v11747_v33  ;;  %vm11751_vm2 = vmmov %vm11748_vm13 }
 0x2a2   : > { %v2129_v49 = vsel %vm11745_vm8, %v2096_v8, -1e+30  ;;  %v11750_v21 = vrot.slane %v8430_v57, 2  ;;  %v11752_v8 = vld [vmem:[#allocation74_spill] sm:$0xff]  ;;  %v8768_v6 = vmax.f32 %v2572_v19, %v2668_v16  ;;  %v11755_v33 = vrot.slane %v8435_v13, 6  ;;  %v11761_v16 = vld [vmem:[#allocation71_spill] sm:$0xff] }
 0x2a3   : > { %v2161_v40 = vmax.f32 %v1999_v12, %v2129_v49  ;;  %vm11753_vm8 = vnez %v11752_v8  ;;  %v2194_v36 = vmax.f32 %v8435_v13, %v2162_v24  ;;  %v11756_v53 = vrot.slane %v8430_v57, 6 }
 0x2a4   : > { %v2255_v15 = vsel %vm11751_vm2, %v11750_v21, %v11749_v18  ;;  %v2290_v30 = vsel %vm11753_vm8, %v2254_v48, -1e+30  ;;  %11754 = vst [vmem:[#allocation45_spill] sm:$0xff] %v8768_v6  ;;  %vm11757_vm13 = vcmp.lt.s32.totalorder %v6035_v43, 2  ;;  %v11759_v49 = vrot.slane %v8407_v52, 6 }
 0x2a5   : > { %v2351_v61 = vsel %vm11757_vm13, %v11756_v53, %v11755_v33  ;;  %v11758_v12 = vmov %v11756_v53  ;;  %vm11760_vm2 = vmmov %vm11757_vm13  ;;  %v8783_v21 = vmax.f32 %v2571_v25, %v2667_v7  ;;  %v2193_v19 = vmax.f32 %v8430_v57, %v2161_v40  ;;  %v11763_v40 = vld [vmem:[#allocation88_spill] sm:$0xff] }
 0x2a6   : > { %v2352_v18 = vsel %vm11760_vm2, %v11759_v49, %v11758_v12  ;;  %vm11762_vm8 = vnez %v11761_v16  ;;  %v2418_v48 = vmax.f32 %v2290_v30, %v2351_v61  ;;  %v2541_v20 = vmax.f32 %v8733_v29, %v8530_v10 }
 0x2a7   : > { %v2385_v24 = vsel %vm11762_vm8, %v2352_v18, -1e+30  ;;  %v2542_v33 = vmax.f32 %v8722_v28, %v8512_v58  ;;  %v1719_v52 = vmax.f32 %v11694_v59, %v7499_v1  ;;  %v4009_v25 = vpack.c.bf16 %v8768_v6, %v8783_v21 }
 0x2a8   : > { %v2417_v8 = vmax.f32 %v2255_v15, %v2385_v24  ;;  %v8796_v7 = vmax.f32 %v2194_v36, %v2418_v48  ;;  %v1720_v57 = vmax.f32 %v11695_v2, %v7510_v5  ;;  %v1911_v15 = vmax.f32 %v11763_v40, %v7199_v17  ;;  %v11765_v24 = vld [vmem:[#allocation72_spill] sm:$0xff] }
 0x2a9   : > { %v2573_v53 = vmax.f32 %v8594_v14, %v2541_v20  ;;  %v2574_v61 = vmax.f32 %v8588_v31, %v2542_v33  ;;  %v1751_v12 = vmax.f32 %v11692_v27, %v1719_v52  ;;  %vm11764_vm13 = vcmask 523264   ;;  %v11767_v52 = vld [vmem:[#allocation73_spill] sm:$0xff] }
 0x2aa   : > { %v8802_v30 = vmax.f32 %v2193_v19, %v2417_v8  ;;  %5289 = vmatmul.mubr.msk.bf16.gmra.mrb[28].mxu1 %vm11764_vm13, %v4009_v25  ;;  %v2670_v36 = vmax.f32 %v8796_v7, %v8373_v45  ;;  %v1752_v49 = vmax.f32 %v7579_v41, %v1720_v57  ;;  %v1912_v18 = vmax.f32 %v7874_v9, %v7436_v42 }
 0x2ab   : > { %v1721_v17 = vmax.f32 %v11763_v40, %v11692_v27  ;;  %v8817_v8 = vmax.f32 %v1751_v12, %v1911_v15  ;;  %v1722_v19 = vmax.f32 %v7874_v9, %v7579_v41  ;;  %v1913_v48 = vmax.f32 %v11765_v24, %v7499_v1 }
 0x2ac   : > { %v2669_v20 = vmax.f32 %v8802_v30, %v8382_v63  ;;  %v8823_v45 = vmax.f32 %v2574_v61, %v2670_v36  ;;  %v8825_v33 = vmax.f32 %v1752_v49, %v1912_v18  ;;  %v1914_v25 = vmax.f32 %v11767_v52, %v7510_v5 }
 0x2ad   : > { %v1753_v42 = vmax.f32 %v11694_v59, %v1721_v17  ;;  %v1754_v18 = vmax.f32 %v11695_v2, %v1722_v19  ;;  %v11770_v15 = vrot.slane %v8618_v23, 1  ;;  %vm11771_vm2 = vcmp.lt.s32.totalorder %v6035_v43, 7 }
 0x2ae   : > { %11766 = vst [vmem:[#allocation75_spill] sm:$0xff] %v8823_v45  ;;  %v8830_v57 = vmax.f32 %v2573_v53, %v2669_v20  ;;  %v3524_v53 = vpack.c.bf16 %v8825_v33, %v8817_v8  ;;  %v11769_v20 = vrot.slane %v8642_v55, 1  ;;  %v11773_v1 = vrot.slane %v8611_v60, 1  ;;  %vm11774_vm13 = vmmov %vm11771_vm2 }
 0x2af   : > { %v8845_v17 = vmax.f32 %v1753_v42, %v1913_v48  ;;  %v11772_v36 = vmov %v11770_v15  ;;  %v11775_v16 = vrot.slane %v8618_v23, 7  ;;  %v11776_v19 = vrot.slane %v8611_v60, 7 }
 0x2b0   : > { %11768 = vst [vmem:[#allocation23_spill] sm:$0xff] %v8830_v57  ;;  %v4010_v49 = vpack.c.bf16 %v8823_v45, %v8830_v57  ;;  %v1996_v61 = vsel %vm11771_vm2, %v11770_v15, %v11769_v20  ;;  %v1997_v5 = vsel %vm11774_vm13, %v11773_v1, %v11772_v36  ;;  %vm11777_vm8 = vcmp.lt.s32.totalorder %v6035_v43, 1  ;;  %v11780_v15 = vld [vmem:[#allocation18_spill] sm:$0xff] }
 0x2b1   : > { %v2093_v48 = vsel %vm11777_vm8, %v11776_v19, %v11775_v16  ;;  %vm11778_vm6 = vcmask 523264   ;;  %v8867_v42 = vmax.f32 %v1754_v18, %v1914_v25  ;;  %vm11781_vm2 = vnez %v11780_v15  ;;  %vm11784_vm13 = vmmov %vm11777_vm8  ;;  %v11793_v15 = vld [vmem:[#allocation77_spill] sm:$0xff] }
 0x2b2   : > { %5292 = vmatprep.mubr.msk.bf16.mxu1 %vm11778_vm6, %v4010_v49  ;;  %vm11779_vm1 = vmmov %vm11778_vm6  ;;  %v2036_v20 = vsel %vm11781_vm2, %v1996_v61, -1e+30  ;;  %v11782_v12 = vmov %v11776_v19  ;;  %v11783_v1 = vrot.slane %v8435_v13, 7  ;;  %v11785_v63 = vrot.slane %v8642_v55, 2 }
 0x2b3   : > { %5221 = vmatmul.mubr.msk.bf16.gmra.mrb[52].mxu0 %vm11779_vm1, %v3524_v53  ;;  %v11786_v16 = vrot.slane %v8618_v23, 2  ;;  %vm11787_vm6 = vcmp.lt.s32.totalorder %v6035_v43, 6  ;;  %v3525_v45 = vpack.c.bf16 %v8867_v42, %v8845_v17  ;;  %v2164_v25 = vmax.f32 %v2036_v20, %v2093_v48 }
 0x2b4   : > { %v2094_v36 = vsel %vm11784_vm13, %v11783_v1, %v11782_v12  ;;  %v11790_v53 = vrot.slane %v8618_v23, 2  ;;  %v11791_v61 = vrot.slane %v8611_v60, 2  ;;  %vm11792_vm8 = vmmov %vm11787_vm6  ;;  %vm11794_vm13 = vnez %v11793_v15 }
 0x2b5   : > { %v2252_v49 = vsel %vm11787_vm6, %v11786_v16, %v11785_v63  ;;  %v11788_v63 = vld [vmem:[#allocation16_spill] sm:$0xff]  ;;  %v11795_v1 = vrot.slane %v8618_v23, 6  ;;  %v11796_v57 = vrot.slane %v8611_v60, 6  ;;  %vm11797_vm6 = vcmp.lt.s32.totalorder %v6035_v43, 2 }
 0x2b6   : > { %vm11789_vm1 = vnez %v11788_v63  ;;  %v2253_v18 = vsel %vm11792_vm8, %v11791_v61, %v11790_v53  ;;  %v2292_v12 = vsel %vm11794_vm13, %v2252_v49, -1e+30  ;;  %v11799_v20 = vrot.slane %v8435_v13, 6  ;;  %v11802_v53 = vld [vmem:[#allocation76_spill] sm:$0xff] }
 0x2b7   : > { %v2131_v16 = vsel %vm11789_vm1, %v2094_v36, -1e+30  ;;  %v2349_v63 = vsel %vm11797_vm6, %v11796_v57, %v11795_v1  ;;  %v11798_v48 = vmov %v11796_v57  ;;  %vm11800_vm1 = vmmov %vm11797_vm6  ;;  %vm11801_vm2 = vcmask 523264  }
 0x2b8   : > { %v2163_v19 = vmax.f32 %v1997_v5, %v2131_v16  ;;  %v2350_v36 = vsel %vm11800_vm1, %v11799_v20, %v11798_v48  ;;  %5224 = vmatprep.mubr.msk.bf16.mxu0 %vm11801_vm2, %v3525_v45  ;;  %v2196_v5 = vmax.f32 %v8618_v23, %v2164_v25  ;;  %vm11803_vm8 = vnez %v11802_v53 }
 0x2b9   : > { %v2387_v49 = vsel %vm11803_vm8, %v2350_v36, -1e+30  ;;  %v2420_v61 = vmax.f32 %v2292_v12, %v2349_v63  ;;  %v2543_v16 = vmax.f32 %v8802_v30, %v8594_v14  ;;  %v2544_v13 = vmax.f32 %v8796_v7, %v8588_v31 }
 0x2ba   : > { %v2195_v57 = vmax.f32 %v8611_v60, %v2163_v19  ;;  %v2419_v1 = vmax.f32 %v2253_v18, %v2387_v49  ;;  %v11804_v15 = vrot.slane %v8817_v8, 1  ;;  %v11805_v48 = vrot.slane %v8644_v3, 1 }
 0x2bb   : > { %vm11806_vm2 = vcmp.lt.s32.totalorder %v6035_v43, 7  ;;  %v8930_v25 = vmax.f32 %v2196_v5, %v2420_v61  ;;  %v2575_v12 = vmax.f32 %v8733_v29, %v2543_v16  ;;  %v11808_v20 = vrot.slane %v8642_v55, 1 }
 0x2bc   : > { %v1994_v45 = vsel %vm11806_vm2, %v11805_v48, %v11804_v15  ;;  %v11807_v63 = vmov %v11805_v48  ;;  %vm11809_vm1 = vmmov %vm11806_vm2  ;;  %v8941_v36 = vmax.f32 %v2195_v57, %v2419_v1  ;;  %v2576_v49 = vmax.f32 %v8722_v28, %v2544_v13  ;;  %v11817_v1 = vld [vmem:[#allocation19_spill] sm:$0xff] }
 0x2bd   : > { %v1995_v60 = vsel %vm11809_vm1, %v11808_v20, %v11807_v63  ;;  %v2038_v19 = vsel %vm7286_vm10, %v1994_v45, -1e+30  ;;  %v11811_v15 = vrot.slane %v8644_v3, 7  ;;  %v11812_v5 = vrot.slane %v8642_v55, 7 }
 0x2be   : > { %vm11813_vm6 = vcmp.lt.s32.totalorder %v6035_v43, 1  ;;  %v11815_v48 = vrot.slane %v8618_v23, 7  ;;  %v2672_v57 = vmax.f32 %v8930_v25, %v8512_v58  ;;  %vm11818_vm1 = vnez %v11817_v1 }
 0x2bf   : > { %v2091_v61 = vsel %vm11813_vm6, %v11812_v5, %v11811_v15  ;;  %v11814_v16 = vmov %v11812_v5  ;;  %vm11816_vm2 = vmmov %vm11813_vm6  ;;  %v11819_v20 = vrot.slane %v8817_v8, 2  ;;  %v11820_v18 = vrot.slane %v8644_v3, 2 }
 0x2c0   : > { %v2092_v63 = vsel %vm11816_vm2, %v11815_v48, %v11814_v16  ;;  %v2166_v45 = vmax.f32 %v2038_v19, %v2091_v61  ;;  %vm11821_vm6 = vcmp.lt.s32.totalorder %v6035_v43, 6  ;;  %v2671_v5 = vmax.f32 %v8941_v36, %v8530_v10 }
 0x2c1   : > { %v2133_v13 = vsel %vm11818_vm1, %v2092_v63, -1e+30  ;;  %v2250_v15 = vsel %vm11821_vm6, %v11820_v18, %v11819_v20  ;;  %v11822_v16 = vmov %v11820_v18  ;;  %v11823_v48 = vrot.slane %v8642_v55, 2  ;;  %vm11824_vm2 = vmmov %vm11821_vm6  ;;  %v11825_v63 = vld [vmem:[#allocation24_spill] sm:$0xff] }
 0x2c2   : > { %v2165_v53 = vmax.f32 %v1995_v60, %v2133_v13  ;;  %vm11826_vm1 = vnez %v11825_v63  ;;  %v8976_v61 = vmax.f32 %v2576_v49, %v2672_v57  ;;  %v2198_v1 = vmax.f32 %v8644_v3, %v2166_v45  ;;  %v11833_v57 = vld [vmem:[#allocation31_spill] sm:$0xff] }
 0x2c3   : > { %v2251_v58 = vsel %vm11824_vm2, %v11823_v48, %v11822_v16  ;;  %v2294_v19 = vsel %vm11826_vm1, %v2250_v15, -1e+30  ;;  %v11827_v18 = vrot.slane %v8644_v3, 6  ;;  %v11828_v20 = vrot.slane %v8642_v55, 6 }
 0x2c4   : > { %vm11829_vm6 = vcmp.lt.s32.totalorder %v6035_v43, 2  ;;  %v11831_v13 = vrot.slane %v8618_v23, 6  ;;  %v8991_v48 = vmax.f32 %v2575_v12, %v2671_v5  ;;  %v2197_v49 = vmax.f32 %v8642_v55, %v2165_v53  ;;  %v11835_v53 = vld [vmem:[#allocation44_spill] sm:$0xff] }
 0x2c5   : > { %v2347_v10 = vsel %vm11829_vm6, %v11828_v20, %v11827_v18  ;;  %v11830_v60 = vmov %v11828_v20  ;;  %vm11832_vm2 = vmmov %vm11829_vm6  ;;  %vm11834_vm1 = vnez %v11833_v57  ;;  %v2545_v6 = vmax.f32 %v8941_v36, %v8733_v29 }
 0x2c6   : > { %v2348_v16 = vsel %vm11832_vm2, %v11831_v13, %v11830_v60  ;;  %v2422_v15 = vmax.f32 %v2294_v19, %v2347_v10  ;;  %v2546_v18 = vmax.f32 %v8930_v25, %v8722_v28  ;;  %v1723_v23 = vmax.f32 %v11765_v24, %v11694_v59 }
 0x2c7   : > { %v2389_v45 = vsel %vm11834_vm1, %v2348_v16, -1e+30  ;;  %v4011_v12 = vpack.c.bf16 %v8976_v61, %v8991_v48  ;;  %v1724_v55 = vmax.f32 %v11767_v52, %v11695_v2  ;;  %v2577_v20 = vmax.f32 %v8802_v30, %v2545_v6 }
 0x2c8   : > { %v2421_v63 = vmax.f32 %v2251_v58, %v2389_v45  ;;  %v9004_v5 = vmax.f32 %v2198_v1, %v2422_v15  ;;  %v1915_v58 = vmax.f32 %v11835_v53, %v11692_v27  ;;  %v2578_v10 = vmax.f32 %v8796_v7, %v2546_v18  ;;  %v11837_v45 = vld [vmem:[#allocation5_spill] sm:$0xff] }
 0x2c9   : > { %v1755_v60 = vmax.f32 %v11763_v40, %v1723_v23  ;;  %vm11836_vm6 = vcmask 523264   ;;  %v1756_v13 = vmax.f32 %v7874_v9, %v1724_v55  ;;  %v1725_v16 = vmax.f32 %v11835_v53, %v11763_v40 }
 0x2ca   : > { %v9010_v19 = vmax.f32 %v2197_v49, %v2421_v63  ;;  %5293 = vmatmul.mubr.msk.bf16.gmra.mrb[0].mxu1 %vm11836_vm6, %v4011_v12  ;;  %v2674_v1 = vmax.f32 %v9004_v5, %v8588_v31  ;;  %v11838_v27 = vmax.f32 %v11837_v45, %v7874_v9  ;;  %v1918_v15 = vmax.f32 %v11695_v2, -1e+30 }
 0x2cb   : > { %v9027_v49 = vmax.f32 %v1755_v60, %v1915_v58  ;;  %v11839_v18 = vrot.slane %v8845_v17, 1  ;;  %v11840_v31 = vrot.slane %v8825_v33, 1  ;;  %vm11841_vm2 = vcmp.lt.s32.totalorder %v6035_v43, 7 }
 0x2cc   : > { %v1758_v63 = vmax.f32 %v11767_v52, %v11838_v27  ;;  %v2673_v6 = vmax.f32 %v9010_v19, %v8594_v14  ;;  %v9036_v12 = vmax.f32 %v2578_v10, %v2674_v1  ;;  %v11842_v9 = vmax.f32 %v11837_v45, %v7579_v41  ;;  %vm11845_vm6 = vmmov %vm11841_vm2 }
 0x2cd   : > { %v1992_v23 = vsel %vm11841_vm2, %v11840_v31, %v11839_v18  ;;  %v1757_v14 = vmax.f32 %v11765_v24, %v1725_v16  ;;  %v11843_v55 = vmov %v11840_v31  ;;  %v11844_v2 = vrot.slane %v8817_v8, 1 }
 0x2ce   : > { %v9041_v52 = vmax.f32 %v1756_v13, %v11842_v9  ;;  %v9050_v60 = vmax.f32 %v2577_v20, %v2673_v6  ;;  %v11846_v31 = vmax.f32 %v11694_v59, -1e+30  ;;  %v11849_v16 = vrot.slane %v8825_v33, 7 }
 0x2cf   : > { %v1993_v58 = vsel %vm11845_vm6, %v11844_v2, %v11843_v55  ;;  %v9068_v55 = vmax.f32 %v1758_v63, %v1918_v15  ;;  %v11847_v2 = vld [vmem:[#allocation79_spill] sm:$0xff]  ;;  %v11850_v45 = vrot.slane %v8817_v8, 7  ;;  %vm11851_vm6 = vcmp.lt.s32.totalorder %v6035_v43, 1 }
 0x2d0   : > { %v4012_v18 = vpack.c.bf16 %v9036_v12, %v9050_v60  ;;  %v3526_v6 = vpack.c.bf16 %v9041_v52, %v9027_v49  ;;  %v9066_v9 = vmax.f32 %v1757_v14, %v11846_v31  ;;  %vm11848_vm2 = vnez %v11847_v2  ;;  %vm11854_vm1 = vmmov %vm11851_vm6  ;;  %v11857_v14 = vld [vmem:[#allocation22_spill] sm:$0xff] }
 0x2d1   : > { %v2040_v10 = vsel %vm11848_vm2, %v1992_v23, -1e+30  ;;  %v2089_v13 = vsel %vm11851_vm6, %v11850_v45, %v11849_v16  ;;  %v11852_v20 = vmov %v11850_v45  ;;  %v11853_v41 = vrot.slane %v8644_v3, 7 }
 0x2d2   : > { %vm11855_vm10 = vcmask 523264   ;;  %vm11858_vm2 = vnez %v11857_v14  ;;  %v11860_v63 = vrot.slane %v8825_v33, 2  ;;  %v11865_v31 = vrot.slane %v8825_v33, 6 }
 0x2d3   : > { %v2090_v59 = vsel %vm11854_vm1, %v11853_v41, %v11852_v20  ;;  %5296 = vmatprep.mubr.msk.bf16.mxu1 %vm11855_vm10, %v4012_v18  ;;  %vm11856_vm8 = vmmov %vm11855_vm10  ;;  %v3527_v41 = vpack.c.bf16 %v9068_v55, %v9066_v9  ;;  %v2168_v18 = vmax.f32 %v2040_v10, %v2089_v13  ;;  %vm11861_vm10 = vcmp.lt.s32.totalorder %v6035_v43, 6  ;;  %v11869_v13 = vld [vmem:[#allocation47_spill] sm:$0xff] }
 0x2d4   : > { %5225 = vmatmul.mubr.msk.bf16.gmra.mrb[56].mxu0 %vm11856_vm8, %v3526_v6  ;;  %v2135_v16 = vsel %vm11858_vm2, %v2090_v59, -1e+30  ;;  %v11859_v6 = vrot.slane %v8845_v17, 2  ;;  %v11862_v23 = vmov %v11860_v63  ;;  %v11863_v59 = vrot.slane %v8817_v8, 2  ;;  %vm11864_vm8 = vmmov %vm11861_vm10 }
 0x2d5   : > { %v2167_v20 = vmax.f32 %v1993_v58, %v2135_v16  ;;  %v11866_v1 = vrot.slane %v8817_v8, 6  ;;  %vm11867_vm1 = vcmp.lt.s32.totalorder %v6035_v43, 2  ;;  %vm11868_vm6 = vcmask 523264  }
 0x2d6   : > { %v2248_v15 = vsel %vm11861_vm10, %v11860_v63, %v11859_v6  ;;  %v2249_v45 = vsel %vm11864_vm8, %v11863_v59, %v11862_v23  ;;  %5228 = vmatprep.mubr.msk.bf16.mxu0 %vm11868_vm6, %v3527_v41  ;;  %vm11870_vm10 = vnez %v11869_v13  ;;  %v11872_v6 = vrot.slane %v8644_v3, 6  ;;  %vm11873_vm8 = vmmov %vm11867_vm1 }
 0x2d7   : > { %v2345_v58 = vsel %vm11867_vm1, %v11866_v1, %v11865_v31  ;;  %v2199_v10 = vmax.f32 %v8817_v8, %v2167_v20  ;;  %v2296_v63 = vsel %vm11870_vm10, %v2248_v15, -1e+30  ;;  %v11871_v16 = vmov %v11866_v1  ;;  %v11874_v1 = vld [vmem:[#allocation78_spill] sm:$0xff] }
 0x2d8   : > { %v2346_v23 = vsel %vm11873_vm8, %v11872_v6, %v11871_v16  ;;  %v2547_v59 = vmax.f32 %v9010_v19, %v8802_v30  ;;  %v2200_v27 = vmax.f32 %v8825_v33, %v2168_v18  ;;  %vm11875_vm1 = vnez %v11874_v1 }
 0x2d9   : > { %v2391_v31 = vsel %vm11875_vm1, %v2346_v23, -1e+30  ;;  %v2424_v41 = vmax.f32 %v2296_v63, %v2345_v58  ;;  %v2548_v20 = vmax.f32 %v9004_v5, %v8796_v7  ;;  %v11876_v3 = vrot.slane %v9027_v49, 1  ;;  %v11882_v23 = vld [vmem:[#allocation81_spill] sm:$0xff] }
 0x2da   : > { %v2423_v15 = vmax.f32 %v2249_v45, %v2391_v31  ;;  %v2579_v8 = vmax.f32 %v8941_v36, %v2547_v59  ;;  %v11877_v13 = vrot.slane %v8867_v42, 1  ;;  %vm11878_vm6 = vcmp.lt.s32.totalorder %v6035_v43, 7 }
 0x2db   : > { %v11880_v18 = vrot.slane %v8845_v17, 1  ;;  %vm11881_vm8 = vmmov %vm11878_vm6  ;;  %v9143_v63 = vmax.f32 %v2200_v27, %v2424_v41  ;;  %v2580_v45 = vmax.f32 %v8930_v25, %v2548_v20  ;;  %vm11883_vm1 = vnez %v11882_v23 }
 0x2dc   : > { %v1990_v16 = vsel %vm11878_vm6, %v11877_v13, %v11876_v3  ;;  %v11879_v6 = vmov %v11877_v13  ;;  %v11884_v31 = vrot.slane %v8867_v42, 7  ;;  %v11885_v1 = vrot.slane %v8845_v17, 7 }
 0x2dd   : > { %v1991_v58 = vsel %vm11881_vm8, %v11880_v18, %v11879_v6  ;;  %v2042_v59 = vsel %vm11883_vm1, %v1990_v16, -1e+30  ;;  %vm11886_vm6 = vcmp.lt.s32.totalorder %v6035_v43, 1  ;;  %v9154_v3 = vmax.f32 %v2199_v10, %v2423_v15  ;;  %v11893_v10 = vld [vmem:[#allocation8_spill] sm:$0xff] }
 0x2de   : > { %v2087_v13 = vsel %vm11886_vm6, %v11885_v1, %v11884_v31  ;;  %v11887_v14 = vmov %v11885_v1  ;;  %v11888_v6 = vrot.slane %v8825_v33, 7  ;;  %vm11889_vm8 = vmmov %vm11886_vm6  ;;  %v11890_v20 = vrot.slane %v9027_v49, 2 }
 0x2df   : > { %v2170_v41 = vmax.f32 %v2042_v59, %v2087_v13  ;;  %v11891_v16 = vrot.slane %v8867_v42, 2  ;;  %vm11892_vm1 = vcmp.lt.s32.totalorder %v6035_v43, 6  ;;  %v2676_v1 = vmax.f32 %v9143_v63, %v8722_v28  ;;  %v11898_v59 = vld [vmem:[#allocation83_spill] sm:$0xff] }
 0x2e0   : > { %v2088_v27 = vsel %vm11889_vm8, %v11888_v6, %v11887_v14  ;;  %vm11894_vm6 = vnez %v11893_v10  ;;  %v11896_v23 = vrot.slane %v8845_v17, 2  ;;  %vm11897_vm8 = vmmov %vm11892_vm1  ;;  %vm11899_vm10 = vnez %v11898_v59  ;;  %v11906_v59 = vld [vmem:[#allocation80_spill] sm:$0xff] }
 0x2e1   : > { %v2246_v18 = vsel %vm11892_vm1, %v11891_v16, %v11890_v20  ;;  %v2137_v15 = vsel %vm11894_vm6, %v2088_v27, -1e+30  ;;  %v11895_v31 = vmov %v11891_v16  ;;  %v2675_v6 = vmax.f32 %v9154_v3, %v8733_v29 }
 0x2e2   : > { %v2247_v14 = vsel %vm11897_vm8, %v11896_v23, %v11895_v31  ;;  %v2298_v13 = vsel %vm11899_vm10, %v2246_v18, -1e+30  ;;  %v2169_v20 = vmax.f32 %v1991_v58, %v2137_v15  ;;  %v2202_v16 = vmax.f32 %v8867_v42, %v2170_v41 }
 0x2e3   : > { %v11900_v28 = vrot.slane %v8867_v42, 6  ;;  %v11901_v27 = vrot.slane %v8845_v17, 6  ;;  %vm11902_vm1 = vcmp.lt.s32.totalorder %v6035_v43, 2  ;;  %v9189_v2 = vmax.f32 %v2580_v45, %v2676_v1 }
 0x2e4   : > { %v11904_v31 = vrot.slane %v8825_v33, 6  ;;  %vm11905_vm8 = vmmov %vm11902_vm1  ;;  %v2549_v58 = vmax.f32 %v9154_v3, %v8941_v36  ;;  %v9199_v41 = vmax.f32 %v2579_v8, %v2675_v6  ;;  %v2201_v15 = vmax.f32 %v8845_v17, %v2169_v20  ;;  %v11908_v6 = vld [vmem:[#allocation28_spill] sm:$0xff]  ;;  %v11909_v20 = vld [vmem:[#allocation26_spill] sm:$0xff] }
 0x2e5   : > { %v2343_v10 = vsel %vm11902_vm1, %v11901_v27, %v11900_v28  ;;  %v11903_v23 = vmov %v11901_v27  ;;  %vm11907_vm10 = vnez %v11906_v59  ;;  %v2550_v45 = vmax.f32 %v9143_v63, %v8930_v25 }
 0x2e6   : > { %v2344_v18 = vsel %vm11905_vm8, %v11904_v31, %v11903_v23  ;;  %v2426_v29 = vmax.f32 %v2298_v13, %v2343_v10  ;;  %v2581_v33 = vmax.f32 %v9010_v19, %v2549_v58  ;;  %v1727_v10 = vmax.f32 %v11765_v24, -1e+30 }
 0x2e7   : > { %v2393_v28 = vsel %vm11907_vm10, %v2344_v18, -1e+30  ;;  %v4013_v13 = vpack.c.bf16 %v9189_v2, %v9199_v41  ;;  %v2582_v8 = vmax.f32 %v9004_v5, %v2550_v45  ;;  %v1919_v17 = vmax.f32 %v11763_v40, -1e+30 }
 0x2e8   : > { %v2425_v1 = vmax.f32 %v2247_v14, %v2393_v28  ;;  %v9206_v27 = vmax.f32 %v2202_v16, %v2426_v29  ;;  %v3489_v23 = vpack.c.bf16 %v11909_v20, %v11908_v6  ;;  %v1759_v16 = vmax.f32 %v11835_v53, %v1727_v10 }
 0x2e9   : > { %v11910_v18 = vrot.slane %v9066_v9, 1  ;;  %v11911_v24 = vrot.slane %v9041_v52, 1  ;;  %vm11912_vm1 = vcmp.lt.s32.totalorder %v6035_v43, 7  ;;  %vm11913_vm8 = vcmask 523264  }
 0x2ea   : > { %v9216_v31 = vmax.f32 %v2201_v15, %v2425_v1  ;;  %v2678_v14 = vmax.f32 %v9206_v27, %v8796_v7  ;;  %5297 = vmatmul.mubr.msk.bf16.gmra.mrb[4].mxu1 %vm11913_vm8, %v4013_v13  ;;  %v11915_v58 = vrot.slane %v9027_v49, 1  ;;  %vm11916_vm10 = vmmov %vm11912_vm1  ;;  %v11918_v53 = vrot.slane %v9041_v52, 7 }
 0x2eb   : > { %v1988_v29 = vsel %vm11912_vm1, %v11911_v24, %v11910_v18  ;;  %v11914_v40 = vmov %v11911_v24  ;;  %v11919_v45 = vrot.slane %v9027_v49, 7  ;;  %vm11920_vm6 = vcmp.lt.s32.totalorder %v6035_v43, 1 }
 0x2ec   : > { %v1989_v15 = vsel %vm11916_vm10, %v11915_v58, %v11914_v40  ;;  %v2044_v7 = vsel %vm7665_vm3, %v1988_v29, -1e+30  ;;  %v11922_v13 = vrot.slane %v8867_v42, 7  ;;  %vm11923_vm1 = vmmov %vm11920_vm6  ;;  %v2677_v20 = vmax.f32 %v9216_v31, %v8802_v30  ;;  %v11924_v29 = vld [vmem:[#allocation82_spill] sm:$0xff] }
 0x2ed   : > { %v2085_v1 = vsel %vm11920_vm6, %v11919_v45, %v11918_v53  ;;  %v11921_v10 = vmov %v11919_v45  ;;  %v9250_v18 = vmax.f32 %v2582_v8, %v2678_v14  ;;  %v9252_v24 = vmax.f32 %v1759_v16, %v1919_v17 }
 0x2ee   : > { %v2086_v6 = vsel %vm11923_vm1, %v11922_v13, %v11921_v10  ;;  %vm11925_vm10 = vnez %v11924_v29  ;;  %v2172_v28 = vmax.f32 %v2044_v7, %v2085_v1  ;;  %v11926_v53 = vrot.slane %v9066_v9, 2  ;;  %v11932_v13 = vld [vmem:[#allocation58_spill] sm:$0xff] }
 0x2ef   : > { %v2139_v40 = vsel %vm11925_vm10, %v2086_v6, -1e+30  ;;  %v11927_v45 = vrot.slane %v9041_v52, 2  ;;  %vm11928_vm6 = vcmp.lt.s32.totalorder %v6035_v43, 6  ;;  %v11930_v30 = vrot.slane %v9027_v49, 2 }
 0x2f0   : > { %v2171_v58 = vmax.f32 %v1989_v15, %v2139_v40  ;;  %vm11931_vm8 = vmmov %vm11928_vm6  ;;  %v9268_v17 = vmax.f32 %v2581_v33, %v2677_v20  ;;  %v10922_v14 = vrot.slane %v9252_v24, 1  ;;  %v3528_v15 = vpack.c.bf16 %v8013_v46, %v9252_v24 }
 0x2f1   : > { %v2244_v59 = vsel %vm11928_vm6, %v11927_v45, %v11926_v53  ;;  %v11929_v10 = vmov %v11927_v45  ;;  %v2204_v1 = vmax.f32 %v9041_v52, %v2172_v28  ;;  %vm11933_vm1 = vnez %v11932_v13 }
 0x2f2   : > { %v2245_v8 = vsel %vm11931_vm8, %v11930_v30, %v11929_v10  ;;  %v2203_v7 = vmax.f32 %v9027_v49, %v2171_v58  ;;  %v2300_v6 = vsel %vm11933_vm1, %v2244_v59, -1e+30  ;;  %v11934_v40 = vrot.slane %v9041_v52, 6  ;;  %v11942_v30 = vld [vmem:[#allocation84_spill] sm:$0xff] }
 0x2f3   : > { %v11935_v53 = vrot.slane %v9027_v49, 6  ;;  %vm11936_vm6 = vcmp.lt.s32.totalorder %v6035_v43, 2  ;;  %v4014_v20 = vpack.c.bf16 %v9250_v18, %v9268_v17  ;;  %vm11937_vm8 = vcmask 523264  }
 0x2f4   : > { %5229 = vmatmul.mubr.msk.bf16.gmra.mrb[60].mxu0 %vm11937_vm8, %v3528_v15  ;;  %v11939_v58 = vrot.slane %v8867_v42, 6  ;;  %vm11940_vm10 = vmmov %vm11936_vm6  ;;  %v2551_v10 = vmax.f32 %v9216_v31, %v9010_v19  ;;  %v11944_v49 = vrot.slane %v9068_v55, 1 }
 0x2f5   : > { %v2341_v33 = vsel %vm11936_vm6, %v11935_v53, %v11934_v40  ;;  %v11938_v45 = vmov %v11935_v53  ;;  %vm11941_vm1 = vmmov %vm11937_vm8  ;;  %vm11943_vm6 = vnez %v11942_v30  ;;  %v2552_v53 = vmax.f32 %v9206_v27, %v9004_v5 }
 0x2f6   : > { %v2342_v28 = vsel %vm11940_vm10, %v11939_v58, %v11938_v45  ;;  %v2428_v59 = vmax.f32 %v2300_v6, %v2341_v33  ;;  %5240 = vmatprep.mubr.msk.bf16.mxu0 %vm11941_vm1, %v3489_v23  ;;  %vm11945_vm8 = vcmp.lt.s32.totalorder %v6035_v43, 7  ;;  %v11946_v15 = vmov %v11944_v49  ;;  %5300 = vmatprep.mubr.msk.bf16.mxu1 %vm11941_vm1, %v4014_v20 }
 0x2f7   : > { %v2395_v40 = vsel %vm11943_vm6, %v2342_v28, -1e+30  ;;  %v1986_v42 = vsel %vm11945_vm8, %v11944_v49, %v10922_v14  ;;  %v11947_v6 = vrot.slane %v9066_v9, 1  ;;  %vm11948_vm10 = vmmov %vm11945_vm8  ;;  %v2583_v58 = vmax.f32 %v9154_v3, %v2551_v10 }
 0x2f8   : > { %v2427_v33 = vmax.f32 %v2245_v8, %v2395_v40  ;;  %v9313_v45 = vmax.f32 %v2204_v1, %v2428_v59  ;;  %v2046_v16 = vsel %vm7807_vm7, %v1986_v42, -1e+30  ;;  %v2584_v30 = vmax.f32 %v9143_v63, %v2552_v53  ;;  %v11956_v40 = vld [vmem:[#allocation56_spill] sm:$0xff] }
 0x2f9   : > { %v1987_v23 = vsel %vm11948_vm10, %v11947_v6, %v11946_v15  ;;  %v11950_v49 = vrot.slane %v9068_v55, 7  ;;  %v11951_v14 = vrot.slane %v9066_v9, 7  ;;  %vm11952_vm8 = vcmp.lt.s32.totalorder %v6035_v43, 1 }
 0x2fa   : > { %v11954_v8 = vrot.slane %v9041_v52, 7  ;;  %vm11955_vm10 = vmmov %vm11952_vm8  ;;  %v2238_v20 = vrot.slane %v9068_v55, 2  ;;  %v9332_v59 = vmax.f32 %v2203_v7, %v2427_v33  ;;  %v2680_v10 = vmax.f32 %v9313_v45, %v8930_v25 }
 0x2fb   : > { %v2083_v13 = vsel %vm11952_vm8, %v11951_v14, %v11950_v49  ;;  %v11953_v15 = vmov %v11951_v14  ;;  %vm11957_vm1 = vnez %v11956_v40  ;;  %v11958_v14 = vrot.slane %v9252_v24, 2  ;;  %v11971_v40 = vld [vmem:[#allocation41_spill] sm:$0xff] }
 0x2fc   : > { %v2084_v1 = vsel %vm11955_vm10, %v11954_v8, %v11953_v15  ;;  %v2174_v42 = vmax.f32 %v2046_v16, %v2083_v13  ;;  %vm11959_vm8 = vcmp.lt.s32.totalorder %v6035_v43, 6  ;;  %v11960_v28 = vrot.slane %v9066_v9, 2  ;;  %v11970_v13 = vld [vmem:[#allocation33_spill] sm:$0xff] }
 0x2fd   : > { %v2141_v53 = vsel %vm11957_vm1, %v2084_v1, -1e+30  ;;  %v2242_v49 = vsel %vm11959_vm8, %v2238_v20, %v11958_v14  ;;  %vm11961_vm10 = vmmov %vm11959_vm8  ;;  %v2333_v7 = vrot.slane %v9066_v9, 6  ;;  %v2679_v25 = vmax.f32 %v9332_v59, %v8941_v36  ;;  %v11967_v14 = vld [vmem:[#allocation25_spill] sm:$0xff] }
 0x2fe   : > { %v2173_v6 = vmax.f32 %v1987_v23, %v2141_v53  ;;  %v2243_v15 = vsel %vm11961_vm10, %v11960_v28, %v2238_v20  ;;  %v9349_v33 = vmax.f32 %v2584_v30, %v2680_v10  ;;  %v2206_v16 = vmax.f32 %v9068_v55, %v2174_v42  ;;  %v11965_v30 = vld [vmem:[#allocation54_spill] sm:$0xff] }
 0x2ff   : > { %v2302_v23 = vsel %vm7842_vm0, %v2242_v49, -1e+30  ;;  %v2334_v1 = vrot.slane %v9068_v55, 6  ;;  %v11963_v53 = vrot.slane %v9041_v52, 6  ;;  %vm11964_vm8 = vcmp.lt.s32.totalorder %v6035_v43, 2 }
 0x300   : > { %v2205_v8 = vmax.f32 %v9066_v9, %v2173_v6  ;;  %v2553_v20 = vmax.f32 %v9332_v59, %v9154_v3  ;;  %v9362_v36 = vmax.f32 %v2583_v58, %v2679_v25  ;;  %vm11966_vm10 = vnez %v11965_v30  ;;  %v11968_v9 = vld [vmem:[#allocation30_spill] sm:$0xff]  ;;  %vm11969_vm0 = vmmov %vm11964_vm8 }
 0x301   : > { %v2340_v28 = vsel %vm11964_vm8, %v11963_v53, %v2333_v7  ;;  %v2554_v42 = vmax.f32 %v9313_v45, %v9143_v63  ;;  %v3490_v6 = vpack.c.bf16 %v11968_v9, %v11967_v14  ;;  %v2339_v52 = vsel %vm11969_vm0, %v2333_v7, %v2334_v1  ;;  %v11979_v9 = vld [vmem:[#allocation62_spill] sm:$0xff] }
 0x302   : > { %v2397_v10 = vsel %vm11966_vm10, %v2340_v28, -1e+30  ;;  %v2585_v53 = vmax.f32 %v9216_v31, %v2553_v20  ;;  %v3491_v29 = vpack.c.bf16 %v11971_v40, %v11970_v13  ;;  %v4015_v58 = vpack.c.bf16 %v9349_v33, %v9362_v36 }
 0x303   : > { %v2429_v49 = vmax.f32 %v2243_v15, %v2397_v10  ;;  %v2430_v25 = vmax.f32 %v2302_v23, %v2339_v52  ;;  %v2586_v28 = vmax.f32 %v9206_v27, %v2554_v42  ;;  %vm11972_vm8 = vcmask 523264  }
 0x304   : > { %5241 = vmatmul.mubr.msk.bf16.vlgmr.msra.gmra.mrb[32].mxu0 %vm11972_vm8, %v3490_v6  ;;  %v1984_v30 = vrot.slane %v8013_v46, 1  ;;  %vm11973_vm10 = vmmov %vm11972_vm8  ;;  %v2079_v15 = vrot.slane %v9252_v24, 7  ;;  %v2240_v7 = vrot.slane %v8013_v46, 2  ;;  %v2335_v20 = vrot.slane %v9252_v24, 6 }
 0x305   : > { %v2461_v14 = vmax.f32 %v2205_v8, %v2429_v49  ;;  %5244 = vmatprep.mubr.msk.bf16.mxu0 %vm11973_vm10, %v3491_v29  ;;  %vm11974_vm0 = vmmov %vm11972_vm8  ;;  %v2462_v40 = vmax.f32 %v2206_v16, %v2430_v25  ;;  %v11975_v13 = vrot.slane %v9252_v24, 1  ;;  %vm11976_vm1 = vcmp.lt.s32.totalorder %v6035_v43, 7 }
 0x306   : > { %5301 = vmatmul.mubr.msk.bf16.gmra.mrb[8].mxu1 %vm11974_vm0, %v4015_v58  ;;  %v11977_v10 = vrot.slane %v7972_v37, 1  ;;  %vm11978_vm8 = vmmov %vm11976_vm1  ;;  %v2685_v29 = vmax.f32 %v9216_v31, -1e+30  ;;  %vm11980_vm10 = vnez %v11979_v9  ;;  %v11981_v52 = vrot.slane %v8013_v46, 7 }
 0x307   : > { %v1985_v23 = vsel %vm11976_vm1, %v11975_v13, %v1984_v30  ;;  %v2681_v42 = vmax.f32 %v2461_v14, %v9010_v19  ;;  %vm11982_vm0 = vcmp.lt.s32.totalorder %v6035_v43, 1  ;;  %v11983_v49 = vrot.slane %v9068_v55, 7 }
 0x308   : > { %v2016_v8 = vsel %vm11978_vm8, %v1984_v30, %v11977_v10  ;;  %v2081_v16 = vsel %vm11982_vm0, %v2079_v15, %v11981_v52  ;;  %vm11984_vm1 = vmmov %vm11982_vm0  ;;  %v2682_v25 = vmax.f32 %v2462_v40, %v9004_v5  ;;  %v11985_v30 = vld [vmem:[#allocation70_spill] sm:$0xff]  ;;  %v11986_v19 = vrot.slane %v9252_v24, 2 }
 0x309   : > { %v2048_v6 = vsel %vm11980_vm10, %v2016_v8, -1e+30  ;;  %v2082_v58 = vsel %vm11984_vm1, %v11983_v49, %v2079_v15  ;;  %vm11987_vm8 = vcmp.lt.s32.totalorder %v6035_v43, 6  ;;  %v9412_v9 = vmax.f32 %v2585_v53, %v2681_v42 }
 0x30a   : > { %v2143_v13 = vsel %vm7813_vm4, %v2082_v58, -1e+30  ;;  %v2176_v10 = vmax.f32 %v2048_v6, %v2081_v16  ;;  %v2241_v8 = vsel %vm11987_vm8, %v11986_v19, %v2240_v7  ;;  %v11988_v52 = vrot.slane %v7972_v37, 2  ;;  %vm11989_vm0 = vmmov %vm11987_vm8  ;;  %v11992_v16 = vld [vmem:[#allocation10_spill] sm:$0xff] }
 0x30b   : > { %v2175_v57 = vmax.f32 %v1985_v23, %v2143_v13  ;;  %v11990_v15 = vrot.slane %v8013_v46, 6  ;;  %vm11991_vm1 = vcmp.lt.s32.totalorder %v6035_v43, 2  ;;  %v9422_v49 = vmax.f32 %v2586_v28, %v2682_v25 }
 0x30c   : > { %v2272_v55 = vsel %vm11989_vm0, %v2240_v7, %v11988_v52  ;;  %v2208_v6 = vmax.f32 %v8013_v46, %v2176_v10  ;;  %vm11993_vm4 = vnez %v11992_v16  ;;  %vm11994_vm8 = vmmov %vm11991_vm1  ;;  %v2555_v13 = vmax.f32 %v2461_v14, %v9216_v31 }
 0x30d   : > { %v2337_v5 = vsel %vm11991_vm1, %v2335_v20, %v11990_v15  ;;  %v2304_v58 = vsel %vm11993_vm4, %v2272_v55, -1e+30  ;;  %v2338_v53 = vsel %vm11994_vm8, %v2334_v1, %v2335_v20  ;;  %v2207_v37 = vmax.f32 %v9252_v24, %v2175_v57  ;;  %v11996_v1 = vld [vmem:[#allocation38_spill] sm:$0xff]  ;;  %v11998_v24 = vld [vmem:[#allocation60_spill] sm:$0xff]  ;;  %v11999_v55 = vld [vmem:[#allocation67_spill] sm:$0xff] }
 0x30e   : > { %v2399_v7 = vsel %vm7859_vm9, %v2338_v53, -1e+30  ;;  %v2432_v42 = vmax.f32 %v2304_v58, %v2337_v5  ;;  %v4016_v28 = vpack.c.bf16 %v9422_v49, %v9412_v9  ;;  %v2556_v46 = vmax.f32 %v2462_v40, %v9206_v27  ;;  %v11997_v20 = vld [vmem:[#allocation50_spill] sm:$0xff] }
 0x30f   : > { %v2431_v25 = vmax.f32 %v2241_v8, %v2399_v7  ;;  %v2686_v10 = vmax.f32 %v9206_v27, -1e+30  ;;  %v2587_v52 = vmax.f32 %v9332_v59, %v2555_v13  ;;  %v3492_v57 = vpack.c.bf16 %v11997_v20, %v11996_v1 }
 0x310   : > { %v2464_v19 = vmax.f32 %v2208_v6, %v2432_v42  ;;  %v3493_v15 = vpack.c.bf16 %v11999_v55, %v11998_v24  ;;  %vm12000_vm0 = vcmask 523264   ;;  %v2588_v5 = vmax.f32 %v9313_v45, %v2556_v46 }
 0x311   : > { %5304 = vmatprep.mubr.msk.bf16.mxu1 %vm12000_vm0, %v4016_v28  ;;  %v2463_v31 = vmax.f32 %v2207_v37, %v2431_v25  ;;  %v2559_v58 = vmax.f32 %v2461_v14, -1e+30  ;;  %v2560_v8 = vmax.f32 %v2462_v40, -1e+30  ;;  %vm12001_vm1 = vmmov %vm12000_vm0  ;;  %v2687_v6 = vmax.f32 %v9332_v59, -1e+30 }
 0x312   : > { %v2684_v53 = vmax.f32 %v2464_v19, %v9143_v63  ;;  %v2558_v27 = vmax.f32 %v2464_v19, %v9313_v45  ;;  %5245 = vmatmul.mubr.msk.bf16.gmra.mrb[36].mxu0 %vm12001_vm1, %v3492_v57  ;;  %v2688_v7 = vmax.f32 %v9313_v45, -1e+30  ;;  %vm12002_vm8 = vmmov %vm12000_vm0  ;;  %v10926_v63 = vrot.slane %v8279_v39, 1 }
 0x313   : > { %v2683_v42 = vmax.f32 %v2463_v31, %v9154_v3  ;;  %v2557_v13 = vmax.f32 %v2463_v31, %v9332_v59  ;;  %5248 = vmatprep.mubr.msk.bf16.mxu0 %vm12002_vm8, %v3493_v15  ;;  %v2591_v37 = vmax.f32 %v2463_v31, %v2559_v58  ;;  %v2592_v28 = vmax.f32 %v2464_v19, %v2560_v8 }
 0x314   : > { %v9452_v25 = vmax.f32 %v2588_v5, %v2684_v53  ;;  %v2590_v46 = vmax.f32 %v2462_v40, %v2558_v27  ;;  %v2722_v1 = vrot.slane %v8281_v35, 1  ;;  %v2723_v59 = vrot.slane %v8324_v22, 1 }
 0x315   : > { %v9456_v20 = vmax.f32 %v2587_v52, %v2683_v42  ;;  %v2589_v57 = vmax.f32 %v2461_v14, %v2557_v13  ;;  %v9458_v24 = vmax.f32 %v2591_v37, %v2687_v6  ;;  %v9460_v45 = vmax.f32 %v2592_v28, %v2688_v7  ;;  %v12010_v42 = vld [vmem:[#allocation34_spill] sm:$0xff] }
 0x316   : > { %v9462_v3 = vmax.f32 %v2590_v46, %v2686_v10  ;;  %v2724_v19 = vrot.slane %v8334_v34, 1  ;;  %v2725_v55 = vrot.slane %v8416_v44, 1  ;;  %v2726_v52 = vrot.slane %v8405_v32, 1  ;;  %v12013_v46 = vld [vmem:[#allocation37_spill] sm:$0xff] }
 0x317   : > { %v4017_v40 = vpack.c.bf16 %v9452_v25, %v9456_v20  ;;  %v9469_v15 = vmax.f32 %v2589_v57, %v2685_v29  ;;  %v4019_v14 = vpack.c.bf16 %v9460_v45, %v9458_v24  ;;  %v10928_v31 = vrot.slane %v8577_v54, 1 }
 0x318   : > { %vm12003_vm0 = vcmp.lt.s32.totalorder %v6035_v43, 7  ;;  %vm12006_vm9 = vcmask 523264   ;;  %v2817_v37 = vrot.slane %v8279_v39, 7  ;;  %v2818_v28 = vrot.slane %v8281_v35, 7 }
 0x319   : > { %v2780_v10 = vsel %vm12003_vm0, %v2724_v19, %v2725_v55  ;;  %vm12004_vm1 = vmmov %vm12003_vm0  ;;  %5305 = vmatmul.mubr.msk.bf16.gmra.mrb[12].mxu1 %vm12006_vm9, %v4017_v40  ;;  %v4018_v29 = vpack.c.bf16 %v9462_v3, %v9469_v15  ;;  %v2778_v7 = vsel %vm12003_vm0, %v2726_v52, %v10928_v31  ;;  %vm12011_vm9 = vnez %v12010_v42 }
 0x31a   : > { %v2781_v5 = vsel %vm12004_vm1, %v2723_v59, %v2724_v19  ;;  %vm12005_vm8 = vmmov %vm12003_vm0  ;;  %v2788_v13 = vsel %vm12011_vm9, %v2780_v10, -1e+30  ;;  %vm12014_vm1 = vnez %v12013_v46  ;;  %v2819_v57 = vrot.slane %v8324_v22, 7 }
 0x31b   : > { %v2782_v58 = vsel %vm12005_vm8, %v2722_v1, %v2723_v59  ;;  %vm12007_vm4 = vmmov %vm12003_vm0  ;;  %v2820_v59 = vrot.slane %v8334_v34, 7  ;;  %v2821_v19 = vrot.slane %v8416_v44, 7  ;;  %v10927_v40 = vrot.slane %v8577_v54, 7 }
 0x31c   : > { %v2779_v8 = vsel %vm12007_vm4, %v2725_v55, %v2726_v52  ;;  %vm12008_vm10 = vmmov %vm12003_vm0  ;;  %v2786_v6 = vsel %vm11542_vm5, %v2782_v58, -1e+30  ;;  %vm12012_vm4 = vcmask 523264   ;;  %v2822_v55 = vrot.slane %v8405_v32, 7 }
 0x31d   : > { %v2783_v53 = vsel %vm12008_vm10, %v10926_v63, %v2722_v1  ;;  %5308 = vmatprep.mubr.msk.bf16.mxu1 %vm12012_vm4, %v4018_v29  ;;  %v2790_v1 = vsel %vm12014_vm1, %v2778_v7, -1e+30  ;;  %v10930_v52 = vrot.slane %v9460_v45, 7  ;;  %vm12015_vm5 = vcmp.lt.s32.totalorder %v6035_v43, 1 }
 0x31e   : > { %v2879_v10 = vsel %vm12015_vm5, %v2817_v37, %v2818_v28  ;;  %vm12016_vm10 = vmmov %vm12015_vm5 }
 0x31f   : > { %v2876_v58 = vsel %vm12016_vm10, %v2820_v59, %v2821_v19  ;;  %vm12017_vm8 = vmmov %vm12015_vm5  ;;  %v2914_v7 = vmax.f32 %v2786_v6, %v2879_v10 }
 0x320   : > { %v2877_v29 = vsel %vm12017_vm8, %v2819_v57, %v2820_v59  ;;  %vm12018_vm0 = vmmov %vm12015_vm5  ;;  %vm12022_vm5 = vnez %v11426_v0  ;;  %vm12025_vm8 = vcmask 523264   ;;  %v2978_v0 = vrot.slane %v8281_v35, 2 }
 0x321   : > { %v2878_v27 = vsel %vm12018_vm0, %v2818_v28, %v2819_v57  ;;  %vm12019_vm9 = vmmov %vm12018_vm0  ;;  %v12023_v28 = vld [vmem:[#allocation35_spill] sm:$0xff]  ;;  %5309 = vmatmul.mubr.msk.bf16.gmra.mrb[16].mxu1 %vm12025_vm8, %v4019_v14  ;;  %v2981_v14 = vrot.slane %v8416_v44, 2 }
 0x322   : > { %v9521_v42 = vsel %vm12019_vm9, %v2822_v55, %v10927_v40  ;;  %vm12020_vm4 = vmmov %vm12018_vm0  ;;  %v2883_v59 = vsel %vm11559_vm14, %v2878_v27, -1e+30  ;;  %vm12024_vm10 = vnez %v12023_v28  ;;  %v2916_v40 = vmax.f32 %v2788_v13, %v2877_v29  ;;  %v12034_v28 = vld [vmem:[#allocation40_spill] sm:$0xff] }
 0x323   : > { %v2875_v46 = vsel %vm12020_vm4, %v2821_v19, %v2822_v55  ;;  %vm12021_vm1 = vmmov %vm12018_vm0  ;;  %v2885_v57 = vsel %vm12024_vm10, %v2876_v58, -1e+30  ;;  %v2915_v10 = vmax.f32 %v2781_v5, %v2883_v59  ;;  %v2946_v19 = vmax.f32 %v8281_v35, %v2914_v7  ;;  %v12032_v59 = vld [vmem:[#allocation27_spill] sm:$0xff] }
 0x324   : > { %v2880_v63 = vsel %vm12021_vm1, %v10930_v52, %v2817_v37  ;;  %v2917_v23 = vmax.f32 %v2779_v8, %v2885_v57  ;;  %v2918_v16 = vmax.f32 %v2790_v1, %v2875_v46  ;;  %v2948_v56 = vmax.f32 %v8334_v34, %v2916_v40  ;;  %v12036_v57 = vld [vmem:[#allocation42_spill] sm:$0xff] }
 0x325   : > { %v2881_v6 = vsel %vm12022_vm5, %v2880_v63, -1e+30  ;;  %v2947_v37 = vmax.f32 %v8324_v22, %v2915_v10  ;;  %v10929_v55 = vrot.slane %v8279_v39, 2  ;;  %v2979_v8 = vrot.slane %v8324_v22, 2 }
 0x326   : > { %v2913_v31 = vmax.f32 %v2783_v53, %v2881_v6  ;;  %v2949_v5 = vmax.f32 %v8416_v44, %v2917_v23  ;;  %v2950_v53 = vmax.f32 %v8405_v32, %v2918_v16  ;;  %v2980_v13 = vrot.slane %v8334_v34, 2 }
 0x327   : > { %v2982_v1 = vrot.slane %v8405_v32, 2  ;;  %v10931_v40 = vrot.slane %v8577_v54, 2  ;;  %vm12026_vm14 = vcmp.lt.s32.totalorder %v6035_v43, 6  ;;  %v3073_v16 = vrot.slane %v8279_v39, 6 }
 0x328   : > { %v2945_v63 = vmax.f32 %v8279_v39, %v2913_v31  ;;  %v3038_v58 = vsel %vm12026_vm14, %v2978_v0, %v2979_v8  ;;  %vm12027_vm0 = vmmov %vm12026_vm14  ;;  %v3074_v31 = vrot.slane %v8281_v35, 6  ;;  %vm12033_vm10 = vnez %v12032_v59 }
 0x329   : > { %v3039_v23 = vsel %vm12027_vm0, %v10929_v55, %v2978_v0  ;;  %vm12028_vm9 = vmmov %vm12027_vm0  ;;  %v3042_v6 = vsel %vm12033_vm10, %v3038_v58, -1e+30  ;;  %vm12035_vm8 = vnez %v12034_v28  ;;  %vm12037_vm14 = vnez %v12036_v57  ;;  %v12040_v28 = vld [vmem:[#allocation36_spill] sm:$0xff] }
 0x32a   : > { %v3034_v29 = vsel %vm12028_vm9, %v2982_v1, %v10931_v40  ;;  %vm12029_vm4 = vmmov %vm12027_vm0  ;;  %v3076_v55 = vrot.slane %v8334_v34, 6  ;;  %v10932_v58 = vrot.slane %v9460_v45, 6 }
 0x32b   : > { %v3035_v27 = vsel %vm12029_vm4, %v2981_v14, %v2982_v1  ;;  %vm12030_vm1 = vmmov %vm12027_vm0  ;;  %v3046_v10 = vsel %vm12037_vm14, %v3034_v29, -1e+30  ;;  %v3075_v1 = vrot.slane %v8324_v22, 6  ;;  %vm12048_vm14 = vcmask 523264  }
 0x32c   : > { %v3036_v7 = vsel %vm12030_vm1, %v2980_v13, %v2981_v14  ;;  %vm12031_vm5 = vmmov %vm12027_vm0  ;;  %vm12038_vm0 = vcmp.lt.s32.totalorder %v6035_v43, 2  ;;  %v3077_v14 = vrot.slane %v8416_v44, 6 }
 0x32d   : > { %v3037_v46 = vsel %vm12031_vm5, %v2979_v8, %v2980_v13  ;;  %v3044_v35 = vsel %vm12035_vm8, %v3036_v7, -1e+30  ;;  %v3135_v0 = vsel %vm12038_vm0, %v3073_v16, %v3074_v31  ;;  %v3078_v8 = vrot.slane %v8405_v32, 6  ;;  %v12039_v7 = vld [vmem:[#allocation55_spill] sm:$0xff]  ;;  %vm12041_vm9 = vmmov %vm12038_vm0 }
 0x32e   : > { %v3079_v13 = vrot.slane %v8577_v54, 6  ;;  %v3170_v59 = vmax.f32 %v3042_v6, %v3135_v0  ;;  %v3494_v57 = vpack.c.bf16 %v12040_v28, %v12039_v7  ;;  %vm12042_vm4 = vmmov %vm12038_vm0 }
 0x32f   : > { %v3131_v29 = vsel %vm12041_vm9, %v3077_v14, %v3078_v8  ;;  %v3132_v22 = vsel %vm12042_vm4, %v3076_v55, %v3077_v14  ;;  %vm12043_vm1 = vmmov %vm12038_vm0 }
 0x330   : > { %v3133_v34 = vsel %vm12043_vm1, %v3075_v1, %v3076_v55  ;;  %vm12044_vm5 = vmmov %vm12038_vm0  ;;  %v3141_v14 = vsel %vm11591_vm15, %v3132_v22, -1e+30  ;;  %5249 = vmatmul.mubr.msk.bf16.gmra.mrb[40].mxu0 %vm12048_vm14, %v3494_v57  ;;  %v3174_v52 = vmax.f32 %v3046_v10, %v3131_v29  ;;  %v9604_v40 = vmax.f32 %v2946_v19, %v3170_v59  ;;  %v12055_v59 = vld [vmem:[#allocation57_spill] sm:$0xff] }
 0x331   : > { %v3134_v32 = vsel %vm12044_vm5, %v3074_v31, %v3075_v1  ;;  %vm12045_vm10 = vmmov %vm12038_vm0  ;;  %v3172_v1 = vmax.f32 %v3044_v35, %v3133_v34  ;;  %v3173_v28 = vmax.f32 %v3035_v27, %v3141_v14  ;;  %v2824_v57 = vrot.slane %v8562_v50, 7 }
 0x332   : > { %v3130_v44 = vsel %vm12045_vm10, %v3078_v8, %v3079_v13  ;;  %vm12046_vm8 = vmmov %vm12038_vm0  ;;  %v3139_v0 = vsel %vm11589_vm11, %v3134_v32, -1e+30  ;;  %v9616_v47 = vmax.f32 %v2950_v53, %v3174_v52  ;;  %v12049_v27 = vrot.slane %v8627_v4, 1 }
 0x333   : > { %v3136_v6 = vsel %vm12046_vm8, %v10932_v58, %v3073_v16  ;;  %v3171_v31 = vmax.f32 %v3037_v46, %v3139_v0  ;;  %v2728_v16 = vrot.slane %v8562_v50, 1  ;;  %v9609_v51 = vmax.f32 %v2948_v56, %v3172_v1  ;;  %v12057_v0 = vld [vmem:[#allocation39_spill] sm:$0xff]  ;;  %vm12064_vm10 = vmmov %vm12046_vm8 }
 0x334   : > { %v3137_v55 = vsel %vm7746_vm12, %v3136_v6, -1e+30  ;;  %v9611_v32 = vmax.f32 %v2949_v5, %v3173_v28  ;;  %vm12050_vm12 = vcmp.lt.s32.totalorder %v6035_v43, 7  ;;  %vm12054_vm11 = vcmp.lt.s32.totalorder %v6035_v43, 1 }
 0x335   : > { %v3169_v8 = vmax.f32 %v3039_v23, %v3137_v55  ;;  %v9607_v58 = vmax.f32 %v2947_v37, %v3171_v31  ;;  %v2776_v19 = vsel %vm12050_vm12, %v2728_v16, %v12049_v27  ;;  %v12051_v23 = vrot.slane %v8577_v54, 1  ;;  %vm12052_vm15 = vmmov %vm12050_vm12 }
 0x336   : > { %v3298_v5 = vmax.f32 %v9609_v51, -1e+30  ;;  %v3425_v46 = vmax.f32 %v9611_v32, -1e+30  ;;  %v3300_v35 = vmax.f32 %v9616_v47, %v9604_v40  ;;  %v3426_v10 = vmax.f32 %v9616_v47, -1e+30 }
 0x337   : > { %v9614_v22 = vmax.f32 %v2945_v63, %v3169_v8  ;;  %v2777_v37 = vsel %vm12052_vm15, %v12051_v23, %v2728_v16  ;;  %v3297_v56 = vmax.f32 %v9607_v58, -1e+30  ;;  %v12053_v63 = vrot.slane %v8577_v54, 7  ;;  %vm12068_vm15 = vmmov %vm12050_vm12 }
 0x338   : > { %vm12056_vm0 = vnez %v12055_v59  ;;  %v3330_v6 = vmax.f32 %v9604_v40, %v3298_v5  ;;  %vm12058_vm9 = vnez %v12057_v0  ;;  %v2984_v31 = vrot.slane %v8562_v50, 2 }
 0x339   : > { %v2873_v52 = vsel %vm12054_vm11, %v12053_v63, %v2824_v57  ;;  %v3299_v53 = vmax.f32 %v9611_v32, %v9614_v22  ;;  %v2792_v29 = vsel %vm12056_vm0, %v2776_v19, -1e+30  ;;  %v3329_v34 = vmax.f32 %v9614_v22, %v3297_v56  ;;  %v12059_v19 = vld [vmem:[#allocation52_spill] sm:$0xff] }
 0x33a   : > { %v2887_v7 = vsel %vm12058_vm9, %v9521_v42, -1e+30  ;;  %v2920_v14 = vmax.f32 %v2792_v29, %v2873_v52  ;;  %v2985_v1 = vrot.slane %v8627_v4, 2  ;;  %v3080_v28 = vrot.slane %v8562_v50, 6  ;;  %v12065_v52 = vld [vmem:[#allocation59_spill] sm:$0xff] }
 0x33b   : > { %v2919_v55 = vmax.f32 %v2777_v37, %v2887_v7  ;;  %v3457_v8 = vmax.f32 %v3329_v34, %v3425_v46  ;;  %v3458_v16 = vmax.f32 %v3330_v6, %v3426_v10  ;;  %vm12060_vm4 = vnez %v12059_v19 }
 0x33c   : > { %v2952_v27 = vmax.f32 %v8562_v50, %v2920_v14  ;;  %v3143_v23 = vsel %vm12060_vm4, %v3130_v44, -1e+30  ;;  %vm12061_vm1 = vcmp.lt.s32.totalorder %v6035_v43, 6  ;;  %v12062_v37 = vrot.slane %v8577_v54, 2 }
 0x33d   : > { %v2951_v56 = vmax.f32 %v8577_v54, %v2919_v55  ;;  %v3032_v42 = vsel %vm12061_vm1, %v2984_v31, %v2985_v1  ;;  %vm12063_vm5 = vmmov %vm12061_vm1  ;;  %v3129_v63 = vsel %vm12064_vm10, %v3079_v13, %v3080_v28  ;;  %v4293_v46 = vpack.c.bf16 %v3458_v16, %v3457_v8 }
 0x33e   : > { %v3033_v5 = vsel %vm12063_vm5, %v12062_v37, %v2984_v31  ;;  %vm12066_vm8 = vnez %v12065_v52  ;;  %v3331_v44 = vmax.f32 %v9607_v58, %v3299_v53  ;;  %v3332_v29 = vmax.f32 %v9609_v51, %v3300_v35  ;;  %vm12073_vm5 = vmmov %vm12061_vm1 }
 0x33f   : > { %v3048_v50 = vsel %vm12066_vm8, %v3032_v42, -1e+30  ;;  %v3175_v10 = vmax.f32 %v3033_v5, %v3143_v23  ;;  %v2730_v34 = vrot.slane %v8616_v38, 1  ;;  %v2731_v54 = vrot.slane %v8783_v21, 1  ;;  %5320 = vmatprep.mubr.msk.bf16.mxu1 %vm12048_vm14, %v4293_v46 }
 0x340   : > { %v3176_v59 = vmax.f32 %v3048_v50, %v3129_v63  ;;  %v2825_v13 = vrot.slane %v8627_v4, 7  ;;  %v2826_v0 = vrot.slane %v8616_v38, 7  ;;  %v2986_v7 = vrot.slane %v8616_v38, 2 }
 0x341   : > { %v9667_v6 = vmax.f32 %v2951_v56, %v3175_v10  ;;  %v2774_v53 = vsel %vm12050_vm12, %v2730_v34, %v2731_v54  ;;  %v12067_v35 = vrot.slane %v8627_v4, 1  ;;  %v2987_v31 = vrot.slane %v8783_v21, 2 }
 0x342   : > { %v9672_v14 = vmax.f32 %v2952_v27, %v3176_v59  ;;  %vm12069_vm11 = vnez %v11599_v26  ;;  %vm12070_vm0 = vcmp.lt.s32.totalorder %v6035_v43, 1  ;;  %vm12072_vm4 = vnez %v11608_v62 }
 0x343   : > { %v2775_v55 = vsel %vm12068_vm15, %v12067_v35, %v2730_v34  ;;  %v3427_v8 = vmax.f32 %v9667_v6, -1e+30  ;;  %v2794_v16 = vsel %vm12069_vm11, %v2774_v53, -1e+30  ;;  %v2871_v19 = vsel %vm12070_vm0, %v2825_v13, %v2826_v0  ;;  %vm12071_vm9 = vmmov %vm12070_vm0  ;;  %v12075_v34 = vld [vmem:[#allocation45_spill] sm:$0xff] }
 0x344   : > { %v2872_v27 = vsel %vm12071_vm9, %v2824_v57, %v2825_v13  ;;  %v3428_v23 = vmax.f32 %v9672_v14, -1e+30  ;;  %v2922_v42 = vmax.f32 %v2794_v16, %v2871_v19  ;;  %v3030_v37 = vsel %vm12061_vm1, %v2986_v7, %v2987_v31 }
 0x345   : > { %v2889_v56 = vsel %vm12072_vm4, %v2872_v27, -1e+30  ;;  %v3459_v5 = vmax.f32 %v3331_v44, %v3427_v8  ;;  %v3031_v26 = vsel %vm12073_vm5, %v2985_v1, %v2986_v7  ;;  %vm12074_vm10 = vnez %v11616_v11  ;;  %v12078_v7 = vld [vmem:[#allocation23_spill] sm:$0xff] }
 0x346   : > { %v2921_v63 = vmax.f32 %v2775_v55, %v2889_v56  ;;  %v3050_v46 = vsel %vm12074_vm10, %v3030_v37, -1e+30  ;;  %v3460_v52 = vmax.f32 %v3332_v29, %v3428_v23  ;;  %v2954_v57 = vmax.f32 %v8616_v38, %v2922_v42  ;;  %v12084_v56 = vld [vmem:[#allocation6_spill] sm:$0xff] }
 0x347   : > { %v3081_v50 = vrot.slane %v8627_v4, 6  ;;  %v3082_v62 = vrot.slane %v8616_v38, 6  ;;  %v3301_v59 = vmax.f32 %v9667_v6, %v9607_v58  ;;  %v3302_v44 = vmax.f32 %v9672_v14, %v9609_v51  ;;  %v12079_v38 = vld [vmem:[#allocation66_spill] sm:$0xff] }
 0x348   : > { %v2953_v10 = vmax.f32 %v8627_v4, %v2921_v63  ;;  %v2732_v1 = vrot.slane %v12075_v34, 1  ;;  %v4294_v13 = vpack.c.bf16 %v3460_v52, %v3459_v5  ;;  %vm12076_vm8 = vcmp.lt.s32.totalorder %v6035_v43, 2 }
 0x349   : > { %v3127_v11 = vsel %vm12076_vm8, %v3081_v50, %v3082_v62  ;;  %vm12077_vm14 = vmmov %vm12076_vm8  ;;  %v2733_v53 = vrot.slane %v12078_v7, 1  ;;  %vm12080_vm12 = vnez %v12079_v38  ;;  %v3333_v55 = vmax.f32 %v9611_v32, %v3301_v59 }
 0x34a   : > { %v3128_v29 = vsel %vm12077_vm14, %v3080_v28, %v3081_v50  ;;  %v3178_v35 = vmax.f32 %v3050_v46, %v3127_v11  ;;  %v3334_v8 = vmax.f32 %v9616_v47, %v3302_v44  ;;  %vm12081_vm15 = vcmask 523264   ;;  %v12088_v50 = vld [vmem:[#allocation65_spill] sm:$0xff] }
 0x34b   : > { %v3145_v4 = vsel %vm12080_vm12, %v3128_v29, -1e+30  ;;  %5321 = vmatmul.mubr.msk.bf16.vlgmr.msra.gmra.mrb[20].mxu1 %vm12081_vm15, %v4294_v13  ;;  %vm12082_vm11 = vcmp.lt.s32.totalorder %v6035_v43, 7  ;;  %v2827_v28 = vrot.slane %v8783_v21, 7  ;;  %vm12085_vm9 = vnez %v12084_v56  ;;  %v12092_v29 = vld [vmem:[#allocation7_spill] sm:$0xff] }
 0x34c   : > { %v3177_v16 = vmax.f32 %v3031_v26, %v3145_v4  ;;  %v2772_v19 = vsel %vm12082_vm11, %v2732_v1, %v2733_v53  ;;  %vm12083_vm0 = vmmov %vm12082_vm11  ;;  %v9721_v23 = vmax.f32 %v2954_v57, %v3178_v35  ;;  %v2828_v37 = vrot.slane %v12075_v34, 7 }
 0x34d   : > { %v2773_v27 = vsel %vm12083_vm0, %v2731_v54, %v2732_v1  ;;  %v2796_v42 = vsel %vm12085_vm9, %v2772_v19, -1e+30  ;;  %v2988_v5 = vrot.slane %v12075_v34, 2  ;;  %vm12086_vm4 = vcmp.lt.s32.totalorder %v6035_v43, 1 }
 0x34e   : > { %v9727_v63 = vmax.f32 %v2953_v10, %v3177_v16  ;;  %v2870_v26 = vsel %vm12086_vm4, %v2826_v0, %v2827_v28  ;;  %v2989_v46 = vrot.slane %v12078_v7, 2  ;;  %v3083_v54 = vrot.slane %v8783_v21, 6  ;;  %vm12087_vm1 = vmmov %vm12086_vm4 }
 0x34f   : > { %v3430_v52 = vmax.f32 %v9721_v23, %v9604_v40  ;;  %v2869_v57 = vsel %vm12087_vm1, %v2827_v28, %v2828_v37  ;;  %vm12089_vm5 = vnez %v12088_v50  ;;  %vm12090_vm10 = vcmp.lt.s32.totalorder %v6035_v43, 6 }
 0x350   : > { %v2891_v59 = vsel %vm12089_vm5, %v2870_v26, -1e+30  ;;  %v3029_v10 = vsel %vm12090_vm10, %v2987_v31, %v2988_v5  ;;  %v3429_v44 = vmax.f32 %v9727_v63, %v9614_v22  ;;  %v2924_v1 = vmax.f32 %v2796_v42, %v2869_v57  ;;  %vm12091_vm8 = vmmov %vm12090_vm10  ;;  %v12095_v22 = vld [vmem:[#allocation15_spill] sm:$0xff] }
 0x351   : > { %v2923_v0 = vmax.f32 %v2773_v27, %v2891_v59  ;;  %v3028_v13 = vsel %vm12091_vm8, %v2988_v5, %v2989_v46  ;;  %v3462_v11 = vmax.f32 %v3334_v8, %v3430_v52  ;;  %vm12093_vm14 = vnez %v12092_v29 }
 0x352   : > { %v3052_v40 = vsel %vm12093_vm14, %v3028_v13, -1e+30  ;;  %v3084_v38 = vrot.slane %v12075_v34, 6  ;;  %vm12094_vm12 = vcmp.lt.s32.totalorder %v6035_v43, 2  ;;  %v3461_v35 = vmax.f32 %v3333_v55, %v3429_v44  ;;  %v12098_v55 = vld [vmem:[#allocation75_spill] sm:$0xff] }
 0x353   : > { %v3126_v4 = vsel %vm12094_vm12, %v3082_v62, %v3083_v54  ;;  %v2955_v31 = vmax.f32 %v8783_v21, %v2923_v0  ;;  %v2956_v16 = vmax.f32 %v12075_v34, %v2924_v1  ;;  %vm12096_vm15 = vnez %v12095_v22  ;;  %vm12097_vm11 = vmmov %vm12094_vm12  ;;  %v12102_v0 = vld [vmem:[#allocation48_spill] sm:$0xff] }
 0x354   : > { %v3147_v19 = vsel %vm12096_vm15, %v3126_v4, -1e+30  ;;  %v3125_v27 = vsel %vm12097_vm11, %v3083_v54, %v3084_v38  ;;  %v3303_v28 = vmax.f32 %v9727_v63, %v9611_v32  ;;  %v3304_v56 = vmax.f32 %v9721_v23, %v9616_v47 }
 0x355   : > { %v3179_v8 = vmax.f32 %v3029_v10, %v3147_v19  ;;  %v4295_v42 = vpack.c.bf16 %v3462_v11, %v3461_v35  ;;  %v3180_v62 = vmax.f32 %v3052_v40, %v3125_v27  ;;  %v2734_v5 = vrot.slane %v12098_v55, 1 }
 0x356   : > { %v2735_v21 = vrot.slane %v8991_v48, 1  ;;  %v3335_v26 = vmax.f32 %v9667_v6, %v3303_v28  ;;  %v3336_v52 = vmax.f32 %v9672_v14, %v3304_v56  ;;  %v2829_v54 = vrot.slane %v12078_v7, 7  ;;  %v12110_v56 = vld [vmem:[#allocation9_spill] sm:$0xff] }
 0x357   : > { %v9762_v34 = vmax.f32 %v2955_v31, %v3179_v8  ;;  %vm12099_vm0 = vcmask 523264   ;;  %v9768_v57 = vmax.f32 %v2956_v16, %v3180_v62  ;;  %vm12100_vm9 = vcmp.lt.s32.totalorder %v6035_v43, 7 }
 0x358   : > { %5324 = vmatprep.mubr.msk.bf16.mxu1 %vm12099_vm0, %v4295_v42  ;;  %v2770_v50 = vsel %vm12100_vm9, %v2734_v5, %v2735_v21  ;;  %vm12101_vm4 = vmmov %vm12100_vm9  ;;  %v2830_v10 = vrot.slane %v12098_v55, 7  ;;  %vm12103_vm1 = vnez %v12102_v0  ;;  %vm12104_vm5 = vcmp.lt.s32.totalorder %v6035_v43, 1 }
 0x359   : > { %v2771_v59 = vsel %vm12101_vm4, %v2733_v53, %v2734_v5  ;;  %v3431_v44 = vmax.f32 %v9762_v34, %v9607_v58  ;;  %v2798_v1 = vsel %vm12103_vm1, %v2770_v50, -1e+30  ;;  %v2868_v13 = vsel %vm12104_vm5, %v2828_v37, %v2829_v54  ;;  %vm12105_vm10 = vmmov %vm12104_vm5  ;;  %v12106_v53 = vld [vmem:[#allocation17_spill] sm:$0xff] }
 0x35a   : > { %v2990_v11 = vrot.slane %v12098_v55, 2  ;;  %v3432_v29 = vmax.f32 %v9768_v57, %v9609_v51  ;;  %v2867_v40 = vsel %vm12105_vm10, %v2829_v54, %v2830_v10  ;;  %vm12107_vm8 = vnez %v12106_v53  ;;  %vm12112_vm0 = vmmov %vm12097_vm11  ;;  %v12113_v54 = vld [vmem:[#allocation14_spill] sm:$0xff] }
 0x35b   : > { %v2893_v4 = vsel %vm12107_vm8, %v2868_v13, -1e+30  ;;  %v2991_v35 = vrot.slane %v8991_v48, 2  ;;  %v3463_v58 = vmax.f32 %v3335_v26, %v3431_v44  ;;  %v2926_v16 = vmax.f32 %v2798_v1, %v2867_v40 }
 0x35c   : > { %v2925_v31 = vmax.f32 %v2771_v59, %v2893_v4  ;;  %vm12108_vm14 = vcmp.lt.s32.totalorder %v6035_v43, 6  ;;  %v3464_v37 = vmax.f32 %v3336_v52, %v3432_v29  ;;  %v3085_v51 = vrot.slane %v12078_v7, 6 }
 0x35d   : > { %v3027_v22 = vsel %vm12108_vm14, %v2989_v46, %v2990_v11  ;;  %vm12109_vm12 = vmmov %vm12108_vm14  ;;  %v3086_v27 = vrot.slane %v12098_v55, 6  ;;  %v2958_v28 = vmax.f32 %v12098_v55, %v2926_v16  ;;  %vm12111_vm15 = vnez %v12110_v56 }
 0x35e   : > { %v3026_v19 = vsel %vm12109_vm12, %v2990_v11, %v2991_v35  ;;  %v2957_v8 = vmax.f32 %v12078_v7, %v2925_v31  ;;  %v3305_v62 = vmax.f32 %v9762_v34, %v9667_v6  ;;  %v4296_v5 = vpack.c.bf16 %v3464_v37, %v3463_v58  ;;  %vm12120_vm14 = vmmov %vm12105_vm10 }
 0x35f   : > { %v3054_v42 = vsel %vm12111_vm15, %v3026_v19, -1e+30  ;;  %v3123_v46 = vsel %vm12097_vm11, %v3085_v51, %v3086_v27  ;;  %v3124_v26 = vsel %vm12112_vm0, %v3084_v38, %v3085_v51  ;;  %v3306_v52 = vmax.f32 %v9768_v57, %v9672_v14  ;;  %v12121_v19 = vld [vmem:[#allocation49_spill] sm:$0xff] }
 0x360   : > { %vm12114_vm9 = vnez %v12113_v54  ;;  %v3182_v55 = vmax.f32 %v3054_v42, %v3123_v46  ;;  %v3337_v50 = vmax.f32 %v9727_v63, %v3305_v62  ;;  %v2736_v59 = vrot.slane %v8976_v61, 1  ;;  %v12125_v62 = vld [vmem:[#allocation12_spill] sm:$0xff] }
 0x361   : > { %v3149_v7 = vsel %vm12114_vm9, %v3124_v26, -1e+30  ;;  %vm12115_vm4 = vcmask 523264   ;;  %v3338_v0 = vmax.f32 %v9721_v23, %v3306_v52  ;;  %v2737_v1 = vrot.slane %v9050_v60, 1 }
 0x362   : > { %5325 = vmatmul.mubr.msk.bf16.gmra.mrb[24].mxu1 %vm12115_vm4, %v4296_v5  ;;  %v3181_v44 = vmax.f32 %v3027_v22, %v3149_v7  ;;  %v2831_v38 = vrot.slane %v8991_v48, 7  ;;  %v9815_v13 = vmax.f32 %v2958_v28, %v3182_v55  ;;  %vm12116_vm1 = vcmp.lt.s32.totalorder %v6035_v43, 7  ;;  %v12118_v22 = vld [vmem:[#allocation21_spill] sm:$0xff] }
 0x363   : > { %v2769_v11 = vsel %vm12116_vm1, %v2735_v21, %v2736_v59  ;;  %v2832_v29 = vrot.slane %v8976_v61, 7  ;;  %v2992_v40 = vrot.slane %v8976_v61, 2  ;;  %vm12117_vm5 = vmmov %vm12116_vm1  ;;  %v2993_v31 = vrot.slane %v9050_v60, 2 }
 0x364   : > { %v9821_v53 = vmax.f32 %v2957_v8, %v3181_v44  ;;  %v2768_v4 = vsel %vm12117_vm5, %v2736_v59, %v2737_v1  ;;  %v2866_v58 = vsel %vm12105_vm10, %v2830_v10, %v2831_v38  ;;  %v3434_v16 = vmax.f32 %v9815_v13, %v9616_v47 }
 0x365   : > { %vm12119_vm8 = vnez %v12118_v22  ;;  %v2865_v37 = vsel %vm12120_vm14, %v2831_v38, %v2832_v29  ;;  %vm12122_vm12 = vnez %v12121_v19  ;;  %vm12123_vm15 = vcmp.lt.s32.totalorder %v6035_v43, 6  ;;  %v12134_v19 = vld [vmem:[#allocation13_spill] sm:$0xff] }
 0x366   : > { %v2800_v21 = vsel %vm12119_vm8, %v2768_v4, -1e+30  ;;  %v2895_v51 = vsel %vm12122_vm12, %v2866_v58, -1e+30  ;;  %v3433_v8 = vmax.f32 %v9821_v53, %v9611_v32  ;;  %v3024_v10 = vsel %vm12123_vm15, %v2992_v40, %v2993_v31  ;;  %vm12124_vm11 = vmmov %vm12123_vm15 }
 0x367   : > { %v2927_v28 = vmax.f32 %v2769_v11, %v2895_v51  ;;  %v2928_v56 = vmax.f32 %v2800_v21, %v2865_v37  ;;  %v3466_v42 = vmax.f32 %v3338_v0, %v3434_v16  ;;  %v3025_v47 = vsel %vm12124_vm11, %v2991_v35, %v2992_v40 }
 0x368   : > { %vm12126_vm0 = vnez %v12125_v62  ;;  %v3087_v46 = vrot.slane %v8991_v48, 6  ;;  %v3465_v26 = vmax.f32 %v3337_v50, %v3433_v8  ;;  %v3088_v32 = vrot.slane %v8976_v61, 6  ;;  %v12138_v62 = vld [vmem:[#allocation11_spill] sm:$0xff] }
 0x369   : > { %v3056_v5 = vsel %vm12126_vm0, %v3024_v10, -1e+30  ;;  %v2959_v52 = vmax.f32 %v8991_v48, %v2927_v28  ;;  %v2960_v54 = vmax.f32 %v8976_v61, %v2928_v56  ;;  %vm12127_vm9 = vcmp.lt.s32.totalorder %v6035_v43, 2  ;;  %v12129_v48 = vld [vmem:[#allocation68_spill] sm:$0xff] }
 0x36a   : > { %v3122_v7 = vsel %vm12127_vm9, %v3086_v27, %v3087_v46  ;;  %v3307_v55 = vmax.f32 %v9821_v53, %v9727_v63  ;;  %v3308_v35 = vmax.f32 %v9815_v13, %v9721_v23  ;;  %v2738_v59 = vrot.slane %v9036_v12, 1  ;;  %vm12128_vm4 = vmmov %vm12127_vm9 }
 0x36b   : > { %v4297_v44 = vpack.c.bf16 %v3466_v42, %v3465_v26  ;;  %v3121_v50 = vsel %vm12128_vm4, %v3087_v46, %v3088_v32  ;;  %vm12130_vm1 = vnez %v12129_v48  ;;  %v2739_v61 = vrot.slane %v9199_v41, 1 }
 0x36c   : > { %v3151_v0 = vsel %vm12130_vm1, %v3122_v7, -1e+30  ;;  %v3184_v11 = vmax.f32 %v3056_v5, %v3121_v50  ;;  %v3339_v27 = vmax.f32 %v9762_v34, %v3307_v55  ;;  %v3340_v40 = vmax.f32 %v9768_v57, %v3308_v35  ;;  %v12142_v35 = vld [vmem:[#allocation74_spill] sm:$0xff] }
 0x36d   : > { %v3183_v38 = vmax.f32 %v3025_v47, %v3151_v0  ;;  %vm12131_vm5 = vcmask 523264   ;;  %vm12132_vm10 = vcmp.lt.s32.totalorder %v6035_v43, 7  ;;  %v2833_v16 = vrot.slane %v9050_v60, 7  ;;  %v12146_v0 = vld [vmem:[#allocation71_spill] sm:$0xff] }
 0x36e   : > { %5328 = vmatprep.mubr.msk.bf16.mxu1 %vm12131_vm5, %v4297_v44  ;;  %v2766_v4 = vsel %vm12132_vm10, %v2738_v59, %v2739_v61  ;;  %vm12133_vm8 = vmmov %vm12132_vm10  ;;  %v2834_v22 = vrot.slane %v9036_v12, 7  ;;  %v9871_v37 = vmax.f32 %v2960_v54, %v3184_v11  ;;  %vm12135_vm14 = vnez %v12134_v19 }
 0x36f   : > { %v2767_v58 = vsel %vm12133_vm8, %v2737_v1, %v2738_v59  ;;  %v9869_v21 = vmax.f32 %v2959_v52, %v3183_v38  ;;  %v2802_v51 = vsel %vm12135_vm14, %v2766_v4, -1e+30  ;;  %v2994_v8 = vrot.slane %v9036_v12, 2 }
 0x370   : > { %vm12136_vm12 = vcmp.lt.s32.totalorder %v6035_v43, 1  ;;  %v2995_v1 = vrot.slane %v9199_v41, 2  ;;  %v3089_v10 = vrot.slane %v9050_v60, 6  ;;  %v3436_v47 = vmax.f32 %v9871_v37, %v9672_v14 }
 0x371   : > { %v2863_v28 = vsel %vm12136_vm12, %v2833_v16, %v2834_v22  ;;  %vm12137_vm15 = vmmov %vm12136_vm12  ;;  %v3435_v42 = vmax.f32 %v9869_v21, %v9667_v6  ;;  %vm12139_vm11 = vnez %v12138_v62  ;;  %vm12140_vm0 = vcmp.lt.s32.totalorder %v6035_v43, 6 }
 0x372   : > { %v2864_v56 = vsel %vm12137_vm15, %v2832_v29, %v2833_v16  ;;  %v2930_v46 = vmax.f32 %v2802_v51, %v2863_v28  ;;  %v3022_v52 = vsel %vm12140_vm0, %v2994_v8, %v2995_v1  ;;  %vm12141_vm9 = vmmov %vm12140_vm0  ;;  %v3090_v54 = vrot.slane %v9036_v12, 6 }
 0x373   : > { %v2897_v5 = vsel %vm12139_vm11, %v2864_v56, -1e+30  ;;  %v3023_v29 = vsel %vm12141_vm9, %v2993_v31, %v2994_v8  ;;  %v3467_v7 = vmax.f32 %v3339_v27, %v3435_v42  ;;  %v3468_v55 = vmax.f32 %v3340_v40, %v3436_v47  ;;  %v12151_v42 = vld [vmem:[#allocation18_spill] sm:$0xff] }
 0x374   : > { %v2929_v26 = vmax.f32 %v2767_v58, %v2897_v5  ;;  %v2962_v6 = vmax.f32 %v9036_v12, %v2930_v46  ;;  %vm12143_vm4 = vnez %v12142_v35  ;;  %vm12144_vm1 = vcmp.lt.s32.totalorder %v6035_v43, 2 }
 0x375   : > { %v3058_v14 = vsel %vm12143_vm4, %v3022_v52, -1e+30  ;;  %v3119_v44 = vsel %vm12144_vm1, %v3089_v10, %v3090_v54  ;;  %vm12145_vm5 = vmmov %vm12144_vm1  ;;  %v3309_v31 = vmax.f32 %v9869_v21, %v9762_v34  ;;  %v4298_v48 = vpack.c.bf16 %v3468_v55, %v3467_v7 }
 0x376   : > { %v2961_v59 = vmax.f32 %v9050_v60, %v2929_v26  ;;  %v3120_v50 = vsel %vm12145_vm5, %v3088_v32, %v3089_v10  ;;  %vm12147_vm10 = vnez %v12146_v0  ;;  %v3186_v11 = vmax.f32 %v3058_v14, %v3119_v44  ;;  %v12155_v26 = vld [vmem:[#allocation16_spill] sm:$0xff] }
 0x377   : > { %v3153_v38 = vsel %vm12147_vm10, %v3120_v50, -1e+30  ;;  %v3310_v12 = vmax.f32 %v9871_v37, %v9768_v57  ;;  %v3341_v60 = vmax.f32 %v9821_v53, %v3309_v31  ;;  %v2740_v40 = vrot.slane %v9189_v2, 1  ;;  %vm12160_vm10 = vmmov %vm12145_vm5 }
 0x378   : > { %v3185_v27 = vmax.f32 %v3023_v29, %v3153_v38  ;;  %v2741_v4 = vrot.slane %v9268_v17, 1  ;;  %vm12148_vm8 = vcmask 523264   ;;  %v9911_v32 = vmax.f32 %v2962_v6, %v3186_v11  ;;  %v12161_v38 = vld [vmem:[#allocation76_spill] sm:$0xff] }
 0x379   : > { %5329 = vmatmul.mubr.msk.bf16.gmra.mrb[28].mxu1 %vm12148_vm8, %v4298_v48  ;;  %v3342_v58 = vmax.f32 %v9815_v13, %v3310_v12  ;;  %v2835_v16 = vrot.slane %v9199_v41, 7  ;;  %v2836_v19 = vrot.slane %v9189_v2, 7  ;;  %vm12149_vm14 = vcmp.lt.s32.totalorder %v6035_v43, 7 }
 0x37a   : > { %v9916_v51 = vmax.f32 %v2961_v59, %v3185_v27  ;;  %v2764_v8 = vsel %vm12149_vm14, %v2740_v40, %v2741_v4  ;;  %vm12150_vm12 = vmmov %vm12149_vm14  ;;  %v2996_v56 = vrot.slane %v9189_v2, 2  ;;  %v3438_v10 = vmax.f32 %v9911_v32, %v9721_v23 }
 0x37b   : > { %v2765_v28 = vsel %vm12150_vm12, %v2739_v61, %v2740_v40  ;;  %vm12152_vm15 = vnez %v12151_v42  ;;  %vm12153_vm11 = vcmp.lt.s32.totalorder %v6035_v43, 1  ;;  %vm12156_vm9 = vnez %v12155_v26  ;;  %vm12164_vm14 = vmmov %vm12150_vm12 }
 0x37c   : > { %v2804_v47 = vsel %vm12152_vm15, %v2764_v8, -1e+30  ;;  %v2861_v62 = vsel %vm12153_vm11, %v2835_v16, %v2836_v19  ;;  %vm12154_vm0 = vmmov %vm12153_vm11  ;;  %v3437_v46 = vmax.f32 %v9916_v51, %v9727_v63  ;;  %v2997_v29 = vrot.slane %v9268_v17, 2 }
 0x37d   : > { %v2862_v5 = vsel %vm12154_vm0, %v2834_v22, %v2835_v16  ;;  %v2932_v52 = vmax.f32 %v2804_v47, %v2861_v62  ;;  %v3470_v7 = vmax.f32 %v3342_v58, %v3438_v10  ;;  %vm12157_vm4 = vcmp.lt.s32.totalorder %v6035_v43, 6  ;;  %vm12165_vm15 = vmmov %vm12154_vm0 }
 0x37e   : > { %v2899_v61 = vsel %vm12156_vm9, %v2862_v5, -1e+30  ;;  %v3021_v55 = vsel %vm12157_vm4, %v2995_v1, %v2996_v56  ;;  %v3091_v6 = vrot.slane %v9199_v41, 6  ;;  %v3469_v35 = vmax.f32 %v3341_v60, %v3437_v46  ;;  %vm12158_vm1 = vmmov %vm12157_vm4 }
 0x37f   : > { %v2931_v23 = vmax.f32 %v2765_v28, %v2899_v61  ;;  %v2964_v14 = vmax.f32 %v9189_v2, %v2932_v52  ;;  %v3020_v22 = vsel %vm12158_vm1, %v2996_v56, %v2997_v29  ;;  %v3092_v63 = vrot.slane %v9189_v2, 6  ;;  %vm12166_vm11 = vmmov %vm12154_vm0  ;;  %v12169_v52 = vld [vmem:[#allocation19_spill] sm:$0xff] }
 0x380   : > { %v3060_v50 = vsel %vm11794_vm13, %v3020_v22, -1e+30  ;;  %v3118_v31 = vsel %vm12145_vm5, %v3090_v54, %v3091_v6  ;;  %v3311_v1 = vmax.f32 %v9916_v51, %v9821_v53  ;;  %v4299_v48 = vpack.c.bf16 %v3470_v7, %v3469_v35  ;;  %vm12171_vm4 = vmmov %vm12158_vm1 }
 0x381   : > { %v2963_v59 = vmax.f32 %v9199_v41, %v2931_v23  ;;  %v3117_v0 = vsel %vm12160_vm10, %v3091_v6, %v3092_v63  ;;  %vm12162_vm8 = vnez %v12161_v38  ;;  %v3312_v2 = vmax.f32 %v9911_v32, %v9815_v13 }
 0x382   : > { %v3155_v11 = vsel %vm12162_vm8, %v3118_v31, -1e+30  ;;  %v3188_v12 = vmax.f32 %v3060_v50, %v3117_v0  ;;  %v3343_v27 = vmax.f32 %v9869_v21, %v3311_v1  ;;  %v2742_v60 = vrot.slane %v9250_v18, 1  ;;  %vm12174_vm8 = vmmov %vm12160_vm10 }
 0x383   : > { %v3187_v41 = vmax.f32 %v3021_v55, %v3155_v11  ;;  %vm12163_vm13 = vcmask 523264   ;;  %v3344_v54 = vmax.f32 %v9871_v37, %v3312_v2  ;;  %v2743_v40 = vrot.slane %v9362_v36, 1 }
 0x384   : > { %5332 = vmatprep.mubr.msk.bf16.mxu1 %vm12163_vm13, %v4299_v48  ;;  %v2837_v58 = vrot.slane %v9268_v17, 7  ;;  %v2838_v16 = vrot.slane %v9250_v18, 7  ;;  %v9965_v28 = vmax.f32 %v2964_v14, %v3188_v12  ;;  %v2763_v56 = vsel %vm12164_vm14, %v2741_v4, %v2742_v60  ;;  %v12167_v4 = vld [vmem:[#allocation32_spill] sm:$0xff] }
 0x385   : > { %v9963_v8 = vmax.f32 %v2963_v59, %v3187_v41  ;;  %v2998_v10 = vrot.slane %v9250_v18, 2  ;;  %v2762_v42 = vsel %vm12150_vm12, %v2742_v60, %v2743_v40  ;;  %v2999_v5 = vrot.slane %v9362_v36, 2  ;;  %v10012_v60 = vpop.f32.mrb[44].mxu0 }
 0x386   : > { %v2859_v47 = vsel %vm12165_vm15, %v2837_v58, %v2838_v16  ;;  %v2860_v62 = vsel %vm12166_vm11, %v2836_v19, %v2837_v58  ;;  %v3440_v26 = vmax.f32 %v9965_v28, %v9768_v57  ;;  %vm12168_vm0 = vnez %v12167_v4  ;;  %vm12178_vm15 = vmmov %vm12150_vm12 }
 0x387   : > { %v3439_v46 = vmax.f32 %v9963_v8, %v9762_v34  ;;  %v2806_v61 = vsel %vm12168_vm0, %v2762_v42, -1e+30  ;;  %vm12170_vm9 = vnez %v12169_v52  ;;  %v3018_v6 = vsel %vm12171_vm4, %v2998_v10, %v2999_v5  ;;  %v12172_v34 = vld [vmem:[#allocation24_spill] sm:$0xff]  ;;  %v10019_v42 = vpop.f32.mrb[45].mxu0  ;;  %vm12183_vm4 = vmmov %vm12158_vm1 }
 0x388   : > { %v2901_v7 = vsel %vm12170_vm9, %v2860_v62, -1e+30  ;;  %v2934_v55 = vmax.f32 %v2806_v61, %v2859_v47  ;;  %v3019_v19 = vsel %vm12158_vm1, %v2997_v29, %v2998_v10  ;;  %v3472_v14 = vmax.f32 %v3344_v54, %v3440_v26  ;;  %v10028_v4 = vpop.f32.mrb[46].mxu0 }
 0x389   : > { %v2933_v23 = vmax.f32 %v2763_v56, %v2901_v7  ;;  %v3471_v35 = vmax.f32 %v3343_v27, %v3439_v46  ;;  %vm12173_vm5 = vnez %v12172_v34  ;;  %v3093_v57 = vrot.slane %v9268_v17, 6  ;;  %v12179_v46 = vld [vmem:[#allocation79_spill] sm:$0xff] }
 0x38a   : > { %v3062_v22 = vsel %vm12173_vm5, %v3018_v6, -1e+30  ;;  %v2966_v44 = vmax.f32 %v9250_v18, %v2934_v55  ;;  %v3094_v50 = vrot.slane %v9250_v18, 6  ;;  %v3313_v31 = vmax.f32 %v9963_v8, %v9869_v21  ;;  %v10037_v55 = vpop.f32.mrb[47].mxu0  ;;  %vm12185_vm5 = vmmov %vm12174_vm8 }
 0x38b   : > { %v2965_v59 = vmax.f32 %v9268_v17, %v2933_v23  ;;  %v4300_v1 = vpack.c.bf16 %v3472_v14, %v3471_v35  ;;  %v3116_v29 = vsel %vm12160_vm10, %v3092_v63, %v3093_v57  ;;  %v3314_v48 = vmax.f32 %v9965_v28, %v9871_v37  ;;  %v12175_v17 = vld [vmem:[#allocation31_spill] sm:$0xff]  ;;  %v12196_v35 = vld [vmem:[#allocation8_spill] sm:$0xff] }
 0x38c   : > { %v2744_v0 = vrot.slane %v9349_v33, 1  ;;  %v3115_v38 = vsel %vm12174_vm8, %v3093_v57, %v3094_v50  ;;  %vm12176_vm13 = vnez %v12175_v17  ;;  %v3345_v18 = vmax.f32 %v9916_v51, %v3313_v31  ;;  %v12186_v31 = vld [vmem:[#allocation47_spill] sm:$0xff] }
 0x38d   : > { %v3157_v11 = vsel %vm12176_vm13, %v3116_v29, -1e+30  ;;  %v2745_v2 = vrot.slane %v9412_v9, 1  ;;  %vm12177_vm14 = vcmask 523264   ;;  %v3190_v12 = vmax.f32 %v3062_v22, %v3115_v38 }
 0x38e   : > { %5333 = vmatmul.mubr.msk.bf16.gmra.mrb[0].mxu1 %vm12177_vm14, %v4300_v1  ;;  %v3189_v41 = vmax.f32 %v3019_v19, %v3157_v11  ;;  %v3346_v63 = vmax.f32 %v9911_v32, %v3314_v48  ;;  %v2761_v27 = vsel %vm12150_vm12, %v2743_v40, %v2744_v0  ;;  %v2839_v58 = vrot.slane %v9362_v36, 7  ;;  %v12189_v48 = vld [vmem:[#allocation78_spill] sm:$0xff]  ;;  %vm12191_vm13 = vmmov %vm12177_vm14 }
 0x38f   : > { %v2760_v54 = vsel %vm12178_vm15, %v2744_v0, %v2745_v2  ;;  %v2840_v56 = vrot.slane %v9349_v33, 7  ;;  %v3000_v10 = vrot.slane %v9349_v33, 2  ;;  %v10023_v62 = vmax.f32 %v2966_v44, %v3190_v12  ;;  %vm12192_vm14 = vmmov %vm12150_vm12 }
 0x390   : > { %v10021_v47 = vmax.f32 %v2965_v59, %v3189_v41  ;;  %vm12180_vm11 = vnez %v12179_v46  ;;  %v3001_v26 = vrot.slane %v9412_v9, 2  ;;  %vm12181_vm0 = vcmp.lt.s32.totalorder %v6035_v43, 1 }
 0x391   : > { %v2808_v40 = vsel %vm12180_vm11, %v2760_v54, -1e+30  ;;  %v2857_v61 = vsel %vm12181_vm0, %v2839_v58, %v2840_v56  ;;  %vm12182_vm9 = vmmov %vm12181_vm0  ;;  %v3017_v7 = vsel %vm12183_vm4, %v2999_v5, %v3000_v10  ;;  %v3095_v23 = vrot.slane %v9362_v36, 6 }
 0x392   : > { %v2858_v52 = vsel %vm12182_vm9, %v2838_v16, %v2839_v58  ;;  %v3441_v6 = vmax.f32 %v10021_v47, %v9821_v53  ;;  %v3442_v19 = vmax.f32 %v10023_v62, %v9815_v13  ;;  %v2936_v34 = vmax.f32 %v2808_v40, %v2857_v61  ;;  %vm12193_vm15 = vmmov %vm12181_vm0 }
 0x393   : > { %v2903_v14 = vsel %vm11858_vm2, %v2858_v52, -1e+30  ;;  %v3016_v16 = vsel %vm12158_vm1, %v3000_v10, %v3001_v26  ;;  %v3096_v5 = vrot.slane %v9349_v33, 6  ;;  %v3114_v57 = vsel %vm12185_vm5, %v3094_v50, %v3095_v23  ;;  %vm12188_vm2 = vmmov %vm12185_vm5 }
 0x394   : > { %v2935_v22 = vmax.f32 %v2761_v27, %v2903_v14  ;;  %v3473_v59 = vmax.f32 %v3345_v18, %v3441_v6  ;;  %v3474_v44 = vmax.f32 %v3346_v63, %v3442_v19  ;;  %v2968_v53 = vmax.f32 %v9349_v33, %v2936_v34  ;;  %vm12198_vm4 = vmmov %vm12158_vm1 }
 0x395   : > { %vm12187_vm10 = vnez %v12186_v31  ;;  %v3113_v29 = vsel %vm12188_vm2, %v3095_v23, %v3096_v5  ;;  %vm12190_vm8 = vnez %v12189_v48  ;;  %v3315_v38 = vmax.f32 %v10021_v47, %v9916_v51  ;;  %v12194_v23 = vld [vmem:[#allocation81_spill] sm:$0xff] }
 0x396   : > { %v3064_v13 = vsel %vm12187_vm10, %v3016_v16, -1e+30  ;;  %v2967_v1 = vmax.f32 %v9362_v36, %v2935_v22  ;;  %v3159_v0 = vsel %vm12190_vm8, %v3114_v57, -1e+30  ;;  %v4301_v17 = vpack.c.bf16 %v3474_v44, %v3473_v59  ;;  %vm12201_vm10 = vmmov %vm12188_vm2 }
 0x397   : > { %v3191_v50 = vmax.f32 %v3017_v7, %v3159_v0  ;;  %v3192_v11 = vmax.f32 %v3064_v13, %v3113_v29  ;;  %v3316_v33 = vmax.f32 %v10023_v62, %v9911_v32  ;;  %v3347_v18 = vmax.f32 %v9963_v8, %v3315_v38  ;;  %v12202_v0 = vld [vmem:[#allocation80_spill] sm:$0xff] }
 0x398   : > { %v2746_v41 = vrot.slane %v9422_v49, 1  ;;  %v2747_v36 = vrot.slane %v9456_v20, 1  ;;  %v2841_v12 = vrot.slane %v9412_v9, 7  ;;  %5336 = vmatprep.mubr.msk.bf16.mxu1 %vm12191_vm13, %v4301_v17  ;;  %v2842_v58 = vrot.slane %v9422_v49, 7 }
 0x399   : > { %v10067_v63 = vmax.f32 %v2967_v1, %v3191_v50  ;;  %v10069_v27 = vmax.f32 %v2968_v53, %v3192_v11  ;;  %v3348_v54 = vmax.f32 %v9965_v28, %v3316_v33  ;;  %v3002_v61 = vrot.slane %v9422_v49, 2  ;;  %v12199_v1 = vld [vmem:[#allocation83_spill] sm:$0xff] }
 0x39a   : > { %v2758_v10 = vsel %vm12192_vm14, %v2746_v41, %v2747_v36  ;;  %v2759_v46 = vsel %vm12150_vm12, %v2745_v2, %v2746_v41  ;;  %v2856_v40 = vsel %vm12193_vm15, %v2840_v56, %v2841_v12  ;;  %vm12195_vm11 = vnez %v12194_v23  ;;  %vm12204_vm14 = vmmov %vm12150_vm12 }
 0x39b   : > { %v3443_v52 = vmax.f32 %v10067_v63, %v9869_v21  ;;  %v3444_v7 = vmax.f32 %v10069_v27, %v9871_v37  ;;  %v2810_v6 = vsel %vm12195_vm11, %v2758_v10, -1e+30  ;;  %v2855_v19 = vsel %vm12181_vm0, %v2841_v12, %v2842_v58  ;;  %vm12206_vm15 = vmmov %vm12181_vm0 }
 0x39c   : > { %vm12197_vm9 = vnez %v12196_v35  ;;  %v2938_v14 = vmax.f32 %v2810_v6, %v2855_v19  ;;  %v3003_v56 = vrot.slane %v9456_v20, 2  ;;  %v3015_v34 = vsel %vm12198_vm4, %v3001_v26, %v3002_v61  ;;  %vm12207_vm11 = vmmov %vm12181_vm0 }
 0x39d   : > { %v2905_v2 = vsel %vm12197_vm9, %v2856_v40, -1e+30  ;;  %v3475_v22 = vmax.f32 %v3347_v18, %v3443_v52  ;;  %v3476_v21 = vmax.f32 %v3348_v54, %v3444_v7  ;;  %v3097_v37 = vrot.slane %v9412_v9, 6  ;;  %vm12211_vm9 = vmmov %vm12158_vm1 }
 0x39e   : > { %v2937_v16 = vmax.f32 %v2759_v46, %v2905_v2  ;;  %v2970_v57 = vmax.f32 %v9422_v49, %v2938_v14  ;;  %v3014_v59 = vsel %vm12158_vm1, %v3002_v61, %v3003_v56  ;;  %v3098_v44 = vrot.slane %v9422_v49, 6  ;;  %v12208_v2 = vld [vmem:[#allocation82_spill] sm:$0xff] }
 0x39f   : > { %v3317_v53 = vmax.f32 %v10067_v63, %v9963_v8  ;;  %v4302_v31 = vpack.c.bf16 %v3476_v21, %v3475_v22  ;;  %vm12200_vm5 = vnez %v12199_v1  ;;  %v3112_v29 = vsel %vm12201_vm10, %v3096_v5, %v3097_v37  ;;  %vm12217_vm10 = vmmov %vm12191_vm13 }
 0x3a0   : > { %v2969_v13 = vmax.f32 %v9412_v9, %v2937_v16  ;;  %v3066_v26 = vsel %vm12200_vm5, %v3014_v59, -1e+30  ;;  %v3111_v48 = vsel %vm12188_vm2, %v3097_v37, %v3098_v44  ;;  %vm12203_vm8 = vnez %v12202_v0  ;;  %v10145_v16 = vpop.f32.mrb[48].mxu0 }
 0x3a1   : > { %v3161_v38 = vsel %vm12203_vm8, %v3112_v29, -1e+30  ;;  %v3318_v49 = vmax.f32 %v10069_v27, %v9965_v28  ;;  %v3349_v17 = vmax.f32 %v10021_v47, %v3317_v53  ;;  %5337 = vmatmul.mubr.msk.bf16.gmra.mrb[4].mxu1 %vm12191_vm13, %v4302_v31  ;;  %v3194_v50 = vmax.f32 %v3066_v26, %v3111_v48  ;;  %v10150_v53 = vpop.f32.mrb[49].mxu0  ;;  %vm12221_vm8 = vmmov %vm12207_vm11 }
 0x3a2   : > { %v3193_v9 = vmax.f32 %v3015_v34, %v3161_v38  ;;  %v2748_v11 = vrot.slane %v9452_v25, 1  ;;  %v2749_v33 = vrot.slane %v9469_v15, 1  ;;  %v2843_v18 = vrot.slane %v9456_v20, 7  ;;  %v10158_v26 = vpop.f32.mrb[50].mxu0  ;;  %vm12222_vm13 = vmmov %vm12221_vm8 }
 0x3a3   : > { %v3350_v5 = vmax.f32 %v10023_v62, %v3318_v49  ;;  %v2844_v41 = vrot.slane %v9452_v25, 7  ;;  %v3004_v12 = vrot.slane %v9452_v25, 2  ;;  %v10121_v10 = vmax.f32 %v2970_v57, %v3194_v50 }
 0x3a4   : > { %v10119_v54 = vmax.f32 %v2969_v13, %v3193_v9  ;;  %v2756_v46 = vsel %vm12204_vm14, %v2748_v11, %v2749_v33  ;;  %v2757_v40 = vsel %vm12150_vm12, %v2747_v36, %v2748_v11  ;;  %v2854_v23 = vsel %vm12207_vm11, %v2842_v58, %v2843_v18 }
 0x3a5   : > { %v2812_v52 = vsel %vm7665_vm3, %v2756_v46, -1e+30  ;;  %v2853_v7 = vsel %vm12206_vm15, %v2843_v18, %v2844_v41  ;;  %v3005_v6 = vrot.slane %v9469_v15, 2  ;;  %v3446_v35 = vmax.f32 %v10121_v10, %v9911_v32  ;;  %vm12210_vm3 = vmmov %vm12158_vm1  ;;  %v12212_v32 = vld [vmem:[#allocation58_spill] sm:$0xff] }
 0x3a6   : > { %v3445_v19 = vmax.f32 %v10119_v54, %v9916_v51  ;;  %vm12209_vm0 = vnez %v12208_v2  ;;  %v2940_v14 = vmax.f32 %v2812_v52, %v2853_v7  ;;  %v3013_v21 = vsel %vm12211_vm9, %v3003_v56, %v3004_v12  ;;  %vm12214_vm1 = vmmov %vm12188_vm2 }
 0x3a7   : > { %v2907_v36 = vsel %vm12209_vm0, %v2854_v23, -1e+30  ;;  %v3012_v22 = vsel %vm12210_vm3, %v3004_v12, %v3005_v6  ;;  %v3099_v58 = vrot.slane %v9456_v20, 6  ;;  %v3478_v51 = vmax.f32 %v3350_v5, %v3446_v35  ;;  %vm12216_vm5 = vmmov %vm12214_vm1 }
 0x3a8   : > { %v2939_v34 = vmax.f32 %v2757_v40, %v2907_v36  ;;  %v3477_v37 = vmax.f32 %v3349_v17, %v3445_v19  ;;  %v2972_v57 = vmax.f32 %v9452_v25, %v2940_v14  ;;  %vm12213_vm4 = vnez %v12212_v32  ;;  %v12223_v36 = vld [vmem:[#allocation56_spill] sm:$0xff]  ;;  %vm12229_vm11 = vmmov %vm12214_vm1 }
 0x3a9   : > { %v3068_v59 = vsel %vm12213_vm4, %v3012_v22, -1e+30  ;;  %v3100_v13 = vrot.slane %v9452_v25, 6  ;;  %v3110_v56 = vsel %vm12214_vm1, %v3098_v44, %v3099_v58  ;;  %v3319_v1 = vmax.f32 %v10119_v54, %v10021_v47  ;;  %vm12230_vm0 = vmmov %vm12214_vm1 }
 0x3aa   : > { %v2971_v31 = vmax.f32 %v9456_v20, %v2939_v34  ;;  %v4303_v29 = vpack.c.bf16 %v3478_v51, %v3477_v37  ;;  %v3163_v0 = vsel %vm11943_vm6, %v3110_v56, -1e+30  ;;  %v3320_v38 = vmax.f32 %v10121_v10, %v10023_v62  ;;  %v10165_v20 = vpop.f32.mrb[51].mxu0  ;;  %vm12218_vm6 = vmmov %vm12150_vm12  ;;  %v12227_v51 = vld [vmem:[#allocation69_spill] sm:$0xff] }
 0x3ab   : > { %v2750_v49 = vrot.slane %v9462_v3, 1  ;;  %v3109_v25 = vsel %vm12216_vm5, %v3099_v58, %v3100_v13  ;;  %v3195_v44 = vmax.f32 %v3013_v21, %v3163_v0  ;;  %v3351_v17 = vmax.f32 %v10067_v63, %v3319_v1  ;;  %vm12219_vm2 = vmmov %vm12218_vm6 }
 0x3ac   : > { %v2751_v9 = vrot.slane %v9458_v24, 1  ;;  %5340 = vmatprep.mubr.msk.bf16.mxu1 %vm12217_vm10, %v4303_v29  ;;  %v3196_v50 = vmax.f32 %v3068_v59, %v3109_v25  ;;  %v3352_v11 = vmax.f32 %v10069_v27, %v3320_v38  ;;  %v2845_v18 = vrot.slane %v9469_v15, 7  ;;  %vm12225_vm12 = vmmov %vm12210_vm3  ;;  %v12231_v38 = vld [vmem:[#allocation54_spill] sm:$0xff] }
 0x3ad   : > { %v2755_v5 = vsel %vm12218_vm6, %v2749_v33, %v2750_v49  ;;  %v10176_v12 = vmax.f32 %v2971_v31, %v3195_v44  ;;  %v2846_v40 = vrot.slane %v9462_v3, 7  ;;  %v3006_v61 = vrot.slane %v9462_v3, 2  ;;  %vm12234_vm9 = vmmov %vm12219_vm2 }
 0x3ae   : > { %v2754_v46 = vsel %vm12219_vm2, %v2750_v49, %v2751_v9  ;;  %v10182_v52 = vmax.f32 %v2972_v57, %v3196_v50  ;;  %v2852_v19 = vsel %vm12221_vm8, %v2844_v41, %v2845_v18  ;;  %v3007_v33 = vrot.slane %v9458_v24, 2  ;;  %vm12235_vm4 = vmmov %vm12217_vm10  ;;  %v12236_v50 = vld [vmem:[#allocation62_spill] sm:$0xff] }
 0x3af   : > { %v2814_v23 = vsel %vm7807_vm7, %v2754_v46, -1e+30  ;;  %v3447_v35 = vmax.f32 %v10176_v12, %v9963_v8  ;;  %v2851_v2 = vsel %vm12222_vm13, %v2845_v18, %v2846_v40  ;;  %vm12224_vm14 = vnez %v12223_v36  ;;  %vm12226_vm7 = vmmov %vm12210_vm3 }
 0x3b0   : > { %v2909_v14 = vsel %vm12224_vm14, %v2852_v19, -1e+30  ;;  %v3011_v34 = vsel %vm12225_vm12, %v3005_v6, %v3006_v61  ;;  %v3448_v22 = vmax.f32 %v10182_v52, %v9965_v28  ;;  %v2942_v58 = vmax.f32 %v2814_v23, %v2851_v2  ;;  %vm12238_vm5 = vmmov %vm12219_vm2 }
 0x3b1   : > { %v2941_v21 = vmax.f32 %v2755_v5, %v2909_v14  ;;  %v3010_v41 = vsel %vm12226_vm7, %v3006_v61, %v3007_v33  ;;  %v3479_v37 = vmax.f32 %v3351_v17, %v3447_v35  ;;  %vm12228_vm15 = vnez %v12227_v51  ;;  %vm12240_vm10 = vmmov %vm12221_vm8 }
 0x3b2   : > { %v3070_v8 = vsel %vm12228_vm15, %v3010_v41, -1e+30  ;;  %v3101_v57 = vrot.slane %v9469_v15, 6  ;;  %v3102_v32 = vrot.slane %v9462_v3, 6  ;;  %v3480_v59 = vmax.f32 %v3352_v11, %v3448_v22  ;;  %vm12241_vm6 = vmmov %vm12221_vm8 }
 0x3b3   : > { %v2973_v31 = vmax.f32 %v9469_v15, %v2941_v21  ;;  %v2974_v6 = vmax.f32 %v9462_v3, %v2942_v58  ;;  %v3321_v28 = vmax.f32 %v10176_v12, %v10067_v63  ;;  %v3322_v29 = vmax.f32 %v10182_v52, %v10069_v27  ;;  %vm12242_vm2 = vmmov %vm12226_vm7 }
 0x3b4   : > { %v3107_v56 = vsel %vm12229_vm11, %v3101_v57, %v3102_v32  ;;  %v3108_v1 = vsel %vm12230_vm0, %v3100_v13, %v3101_v57  ;;  %v2752_v48 = vrot.slane %v9460_v45, 1  ;;  %v4304_v0 = vpack.c.bf16 %v3480_v59, %v3479_v37  ;;  %vm12245_vm13 = vmmov %vm12242_vm2  ;;  %v12246_v37 = vld [vmem:[#allocation10_spill] sm:$0xff]  ;;  %v12251_v59 = vld [vmem:[#allocation63_spill] sm:$0xff] }
 0x3b5   : > { %vm12232_vm3 = vnez %v12231_v38  ;;  %v3198_v49 = vmax.f32 %v3070_v8, %v3107_v56  ;;  %v3354_v25 = vmax.f32 %v10121_v10, %v3322_v29  ;;  %v12233_v44 = vrot.slane %v8279_v39, 1  ;;  %vm12249_vm12 = vmmov %vm12230_vm0 }
 0x3b6   : > { %v3165_v15 = vsel %vm12232_vm3, %v3108_v1, -1e+30  ;;  %5341 = vmatmul.mubr.msk.bf16.gmra.mrb[8].mxu1 %vm12235_vm4, %v4304_v0  ;;  %vm12237_vm1 = vnez %v12236_v50  ;;  %v2847_v5 = vrot.slane %v9458_v24, 7  ;;  %v3008_v18 = vrot.slane %v9460_v45, 2  ;;  %vm12250_vm7 = vmmov %vm12230_vm0  ;;  %v10264_v0 = vpop.f32.mrb[52].mxu0 }
 0x3b7   : > { %v3197_v3 = vmax.f32 %v3011_v34, %v3165_v15  ;;  %v2784_v17 = vsel %vm12234_vm9, %v2752_v48, %v12233_v44  ;;  %v3230_v13 = vmax.f32 %v2974_v6, %v3198_v49  ;;  %v3353_v61 = vmax.f32 %v10119_v54, %v3321_v28  ;;  %vm12253_vm11 = vmmov %vm12235_vm4  ;;  %v10270_v15 = vpop.f32.mrb[53].mxu0 }
 0x3b8   : > { %v2816_v11 = vsel %vm12237_vm1, %v2784_v17, -1e+30  ;;  %v2753_v7 = vsel %vm12238_vm5, %v2751_v9, %v2752_v48  ;;  %v3103_v23 = vrot.slane %v9458_v24, 6  ;;  %v12239_v35 = vrot.slane %v9460_v45, 7  ;;  %vm12254_vm0 = vmmov %vm12235_vm4 }
 0x3b9   : > { %v3229_v46 = vmax.f32 %v2973_v31, %v3197_v3  ;;  %v3450_v19 = vmax.f32 %v3230_v13, %v10023_v62  ;;  %v2850_v36 = vsel %vm12241_vm6, %v2846_v40, %v2847_v5  ;;  %v3009_v14 = vsel %vm12242_vm2, %v3007_v33, %v3008_v18  ;;  %vm12255_vm3 = vmmov %vm12254_vm0 }
 0x3ba   : > { %v2849_v2 = vsel %vm12240_vm10, %v2847_v5, %v12239_v35  ;;  %vm12243_vm8 = vnez %v11985_v30  ;;  %v12244_v21 = vrot.slane %v8279_v39, 2  ;;  %vm12247_vm14 = vnez %v12246_v37  ;;  %vm12256_vm9 = vmmov %vm12254_vm0 }
 0x3bb   : > { %v3449_v34 = vmax.f32 %v3229_v46, %v10021_v47  ;;  %v2911_v9 = vsel %vm12243_vm8, %v2850_v36, -1e+30  ;;  %v2944_v22 = vmax.f32 %v2816_v11, %v2849_v2  ;;  %v3482_v58 = vmax.f32 %v3354_v25, %v3450_v19  ;;  %v10272_v25 = vpop.f32.mrb[54].mxu0 }
 0x3bc   : > { %v3040_v62 = vsel %vm12245_vm13, %v3008_v18, %v12244_v21  ;;  %v2943_v41 = vmax.f32 %v2753_v7, %v2911_v9  ;;  %v12248_v40 = vrot.slane %v9460_v45, 6  ;;  %v3106_v8 = vsel %vm12250_vm7, %v3102_v32, %v3103_v23  ;;  %v10276_v11 = vpop.f32.mrb[55].mxu0 }
 0x3bd   : > { %v3072_v51 = vsel %vm12247_vm14, %v3040_v62, -1e+30  ;;  %v3481_v47 = vmax.f32 %v3353_v61, %v3449_v34  ;;  %v2976_v30 = vmax.f32 %v9460_v45, %v2944_v22  ;;  %vm12252_vm15 = vnez %v12251_v59 }
 0x3be   : > { %v3105_v33 = vsel %vm12249_vm12, %v3103_v23, %v12248_v40  ;;  %v2975_v57 = vmax.f32 %v9458_v24, %v2943_v41  ;;  %v3167_v31 = vsel %vm12252_vm15, %v3106_v8, -1e+30  ;;  %v3323_v6 = vmax.f32 %v3229_v46, %v10119_v54 }
 0x3bf   : > { %v3200_v39 = vmax.f32 %v3072_v51, %v3105_v33  ;;  %v3324_v28 = vmax.f32 %v3230_v13, %v10121_v10  ;;  %v4305_v56 = vpack.c.bf16 %v3482_v58, %v3481_v47  ;;  %v3199_v1 = vmax.f32 %v3009_v14, %v3167_v31 }
 0x3c0   : > { %v3454_v45 = vmax.f32 %v10121_v10, -1e+30  ;;  %v3355_v24 = vmax.f32 %v10176_v12, %v3323_v6  ;;  %v3327_v49 = vmax.f32 %v3229_v46, -1e+30  ;;  %v3328_v3 = vmax.f32 %v3230_v13, -1e+30 }
 0x3c1   : > { %v3232_v29 = vmax.f32 %v2976_v30, %v3200_v39  ;;  %v3356_v48 = vmax.f32 %v10182_v52, %v3324_v28  ;;  %5344 = vmatprep.mubr.msk.bf16.mxu1 %vm12253_vm11, %v4305_v56  ;;  %v3231_v43 = vmax.f32 %v2975_v57, %v3199_v1  ;;  %v3455_v7 = vmax.f32 %v10176_v12, -1e+30  ;;  %v10311_v6 = vld [vmem:[%s10577_s7] ss:$0 sm:$0xff] }
 0x3c2   : > { %v3456_v36 = vmax.f32 %v10182_v52, -1e+30 }
 0x3c3   : > { %v3452_v32 = vmax.f32 %v3232_v29, %v10069_v27  ;;  %v3326_v38 = vmax.f32 %v3232_v29, %v10182_v52  ;;  %v3451_v44 = vmax.f32 %v3231_v43, %v10067_v63  ;;  %v3325_v17 = vmax.f32 %v3231_v43, %v10176_v12 }
 0x3c4   : > { %v3453_v27 = vmax.f32 %v10119_v54, -1e+30  ;;  %v3359_v35 = vmax.f32 %v3231_v43, %v3327_v49  ;;  %v3360_v2 = vmax.f32 %v3232_v29, %v3328_v3  ;;  %v10284_v54 = vpop.f32.mrb[56].mxu0 }
 0x3c5   : > { %v3484_v10 = vmax.f32 %v3356_v48, %v3452_v32  ;;  %v3358_v50 = vmax.f32 %v3230_v13, %v3326_v38  ;;  %v3483_v5 = vmax.f32 %v3355_v24, %v3451_v44  ;;  %v3357_v18 = vmax.f32 %v3229_v46, %v3325_v17  ;;  %v10286_v46 = vpop.f32.mrb[57].mxu0 }
 0x3c6   : > { %v3487_v13 = vmax.f32 %v3359_v35, %v3455_v7  ;;  %v3488_v14 = vmax.f32 %v3360_v2, %v3456_v36  ;;  %v10288_v12 = vpop.f32.mrb[58].mxu0 }
 0x3c7   : > { %v3486_v61 = vmax.f32 %v3358_v50, %v3454_v45  ;;  %v4306_v23 = vpack.c.bf16 %v3484_v10, %v3483_v5  ;;  %v3485_v19 = vmax.f32 %v3357_v18, %v3453_v27  ;;  %v10290_v9 = vpop.f32.mrb[59].mxu0 }
 0x3c8   : > { %v4308_v34 = vpack.c.bf16 %v3488_v14, %v3487_v13  ;;  %v10292_v22 = vpop.f32.mrb[60].mxu0 }
 0x3c9   : > { %5345 = vmatmul.mubr.msk.bf16.gmra.mrb[12].mxu1 %vm12254_vm0, %v4306_v23  ;;  %v4307_v63 = vpack.c.bf16 %v3486_v61, %v3485_v19  ;;  %v10294_v21 = vpop.f32.mrb[61].mxu0 }
 0x3ca   : > { %v10296_v52 = vpop.f32.mrb[62].mxu0 }
 0x3cb   : > { %5348 = vmatprep.mubr.msk.bf16.mxu1 %vm12255_vm3, %v4307_v63  ;;  %v10298_v62 = vpop.f32.mrb[63].mxu0 }
 0x3d1   : > { %5349 = vmatmul.mubr.msk.bf16.gmra.mrb[16].mxu1 %vm12256_vm9, %v4308_v34 }
 0x3d7   : > { %v5242_v58 = vpop.f32.mrb[32].mxu0 }
 0x3d8   : > { %v3877_v41 = vpop.f32.mrb[33].mxu0 }
 0x3d9   : > { %v5243_v37 = vpop.f32.mrb[34].mxu0 }
 0x3da   : > { %v3880_v51 = vpop.f32.mrb[35].mxu0 }
 0x3e5   : > { %v5246_v40 = vpop.f32.mrb[36].mxu0 }
 0x3e6   : > { %v3893_v33 = vpop.f32.mrb[37].mxu0 }
 0x3e7   : > { %v5247_v47 = vpop.f32.mrb[38].mxu0 }
 0x3e8   : > { %v3896_v30 = vpop.f32.mrb[39].mxu0 }
 0x403   : > { %v10300_v8 = vpop.f32.mrb[40].mxu0 }
 0x404   : > { %v10302_v39 = vpop.f32.mrb[41].mxu0 }
 0x405   : > { %v10304_v57 = vpop.f32.mrb[42].mxu0 }
 0x406   : > { %v10306_v59 = vpop.f32.mrb[43].mxu0 }
 0x41e   : > { %v5322_v31 = vpop.f32.mrb[20].mxu1 }
 0x41f   : > { %v5360_v28 = vadd.f32 %v5322_v31, %v5242_v58  ;;  %v4423_v56 = vpop.f32.mrb[21].mxu1 }
 0x420   : > { %v5361_v1 = vadd.f32 %v4423_v56, %v3877_v41  ;;  %v5323_v29 = vpop.f32.mrb[22].mxu1 }
 0x421   : > { %v4591_v48 = vadd.f32 %v5360_v28, %v10311_v6  ;;  %v5362_v45 = vadd.f32 %v5323_v29, %v5243_v37  ;;  %v4426_v43 = vpop.f32.mrb[23].mxu1 }
 0x422   : > { %v4589_v24 = vadd.f32 %v5361_v1, %v10311_v6  ;;  %v5363_v32 = vadd.f32 %v4426_v43, %v3880_v51 }
 0x423   : > { %v4623_v38 = vsub.f32 0.0, %v4591_v48  ;;  %v4592_v49 = vadd.f32 %v5362_v45, %v10311_v6 }
 0x424   : > { %v4621_v3 = vsub.f32 0.0, %v4589_v24  ;;  %v4590_v44 = vadd.f32 %v5363_v32, %v10311_v6 }
 0x425   : > { %v4657_v10 = vmul.f32 1.442695, %v4623_v38  ;;  %v4624_v17 = vsub.f32 0.0, %v4592_v49 }
 0x426   : > { %v4653_v50 = vmul.f32 1.442695, %v4621_v3  ;;  %v4622_v5 = vsub.f32 0.0, %v4590_v44 }
 0x427   : > { %5665 = vpow2.f32 %v4657_v10  ;;  %v4659_v18 = vmul.f32 1.442695, %v4624_v17 }
 0x428   : > { %5667 = vpow2.f32 %v4653_v50  ;;  %v4655_v27 = vmul.f32 1.442695, %v4622_v5 }
 0x429   : > { %5669 = vpow2.f32 %v4659_v18 }
 0x42a   : > { %5671 = vpow2.f32 %v4655_v27 }
 0x431   : > { %v5666_v7 = vpop.eup %5665 }
 0x432   : > { %v5668_v35 = vpop.eup %5667  ;;  %v4719_v2 = vadd.f32 1.0, %v5666_v7 }
 0x433   : > { %v5670_v13 = vpop.eup %5669  ;;  %v4717_v14 = vadd.f32 1.0, %v5668_v35 }
 0x434   : > { %v5672_v37 = vpop.eup %5671  ;;  %5673 = vrcp.f32 %v4719_v2  ;;  %v4720_v51 = vadd.f32 1.0, %v5670_v13 }
 0x435   : > { %v5326_v61 = vpop.f32.mrb[24].mxu1  ;;  %5675 = vrcp.f32 %v4717_v14  ;;  %v4718_v28 = vadd.f32 1.0, %v5672_v37 }
 0x436   : > { %v5364_v23 = vadd.f32 %v5326_v61, %v5246_v40  ;;  %v4439_v19 = vpop.f32.mrb[25].mxu1  ;;  %5677 = vrcp.f32 %v4720_v51 }
 0x437   : > { %v5365_v63 = vadd.f32 %v4439_v19, %v3893_v33  ;;  %v5327_v36 = vpop.f32.mrb[26].mxu1  ;;  %5679 = vrcp.f32 %v4718_v28 }
 0x438   : > { %v10318_v34 = vadd.f32 %v5364_v23, %v10311_v6  ;;  %v5366_v58 = vadd.f32 %v5327_v36, %v5247_v47  ;;  %v4442_v41 = vpop.f32.mrb[27].mxu1 }
 0x439   : > { %v10321_v31 = vadd.f32 %v5365_v63, %v10311_v6  ;;  %v5367_v40 = vadd.f32 %v4442_v41, %v3896_v30 }
 0x43a   : > { %v4627_v33 = vsub.f32 0.0, %v10318_v34  ;;  %v10325_v56 = vadd.f32 %v5366_v58, %v10311_v6 }
 0x43b   : > { %v4625_v47 = vsub.f32 0.0, %v10321_v31  ;;  %v10329_v1 = vadd.f32 %v5367_v40, %v10311_v6 }
 0x43c   : > { %v4665_v29 = vmul.f32 1.442695, %v4627_v33  ;;  %v4628_v45 = vsub.f32 0.0, %v10325_v56 }
 0x43d   : > { %v4661_v30 = vmul.f32 1.442695, %v4625_v47  ;;  %v4626_v43 = vsub.f32 0.0, %v10329_v1 }
 0x43e   : > { %5681 = vpow2.f32 %v4665_v29  ;;  %v4667_v32 = vmul.f32 1.442695, %v4628_v45  ;;  %v5674_v3 = vpop.eup %5673 }
 0x43f   : > { %5683 = vpow2.f32 %v4661_v30  ;;  %v4663_v38 = vmul.f32 1.442695, %v4626_v43  ;;  %v5676_v10 = vpop.eup %5675  ;;  %v4783_v17 = vmul.f32 %v5674_v3, %v4591_v48 }
 0x440   : > { %5685 = vpow2.f32 %v4667_v32  ;;  %v5678_v50 = vpop.eup %5677  ;;  %v4781_v5 = vmul.f32 %v5676_v10, %v4589_v24 }
 0x441   : > { %5687 = vpow2.f32 %v4663_v38  ;;  %v5680_v18 = vpop.eup %5679  ;;  %4815 = vst [vmem:[%s10336_s21 + $0x10] sm:$0xff] %v4783_v17  ;;  %v4784_v27 = vmul.f32 %v5678_v50, %v4592_v49 }
 0x442   : > { %4813 = vst [vmem:[%s10336_s21] sm:$0xff] %v4781_v5  ;;  %v4782_v61 = vmul.f32 %v5680_v18, %v4590_v44 }
 0x443   : > { %4816 = vst [vmem:[%s10336_s21 + $0x18] sm:$0xff] %v4784_v27 }
 0x444   : > { %4814 = vst [vmem:[%s10336_s21 + $0x8] sm:$0xff] %v4782_v61 }
 0x448   : > { %v5682_v7 = vpop.eup %5681 }
 0x449   : > { %v5684_v19 = vpop.eup %5683  ;;  %v4723_v35 = vadd.f32 1.0, %v5682_v7 }
 0x44a   : > { %v5686_v2 = vpop.eup %5685  ;;  %v4721_v63 = vadd.f32 1.0, %v5684_v19 }
 0x44b   : > { %v5688_v14 = vpop.eup %5687  ;;  %5689 = vrcp.f32 %v4723_v35  ;;  %v4724_v58 = vadd.f32 1.0, %v5686_v2 }
 0x44c   : > { %v5330_v23 = vpop.f32.mrb[28].mxu1  ;;  %5691 = vrcp.f32 %v4721_v63  ;;  %v4722_v37 = vadd.f32 1.0, %v5688_v14 }
 0x44d   : > { %v5368_v48 = vadd.f32 %v5330_v23, %v10300_v8  ;;  %v4455_v24 = vpop.f32.mrb[29].mxu1  ;;  %5693 = vrcp.f32 %v4724_v58 }
 0x44e   : > { %v5369_v36 = vadd.f32 %v4455_v24, %v10302_v39  ;;  %v5331_v13 = vpop.f32.mrb[30].mxu1  ;;  %5695 = vrcp.f32 %v4722_v37 }
 0x44f   : > { %v10345_v49 = vadd.f32 %v5368_v48, %v10311_v6  ;;  %v5370_v44 = vadd.f32 %v5331_v13, %v10304_v57  ;;  %v4458_v41 = vpop.f32.mrb[31].mxu1 }
 0x450   : > { %v10349_v51 = vadd.f32 %v5369_v36, %v10311_v6  ;;  %v5371_v8 = vadd.f32 %v4458_v41, %v10306_v59 }
 0x451   : > { %v4631_v39 = vsub.f32 0.0, %v10345_v49  ;;  %v10354_v40 = vadd.f32 %v5370_v44, %v10311_v6 }
 0x452   : > { %v4629_v28 = vsub.f32 0.0, %v10349_v51  ;;  %v10358_v33 = vadd.f32 %v5371_v8, %v10311_v6 }
 0x453   : > { %v4673_v57 = vmul.f32 1.442695, %v4631_v39  ;;  %v4632_v47 = vsub.f32 0.0, %v10354_v40 }
 0x454   : > { %v4669_v29 = vmul.f32 1.442695, %v4629_v28  ;;  %v4630_v59 = vsub.f32 0.0, %v10358_v33 }
 0x455   : > { %5697 = vpow2.f32 %v4673_v57  ;;  %v4675_v45 = vmul.f32 1.442695, %v4632_v47  ;;  %v5690_v43 = vpop.eup %5689 }
 0x456   : > { %5699 = vpow2.f32 %v4669_v29  ;;  %v4671_v30 = vmul.f32 1.442695, %v4630_v59  ;;  %v5692_v32 = vpop.eup %5691  ;;  %v4787_v38 = vmul.f32 %v5690_v43, %v10318_v34 }
 0x457   : > { %5701 = vpow2.f32 %v4675_v45  ;;  %v5694_v3 = vpop.eup %5693  ;;  %v4785_v10 = vmul.f32 %v5692_v32, %v10321_v31 }
 0x458   : > { %5703 = vpow2.f32 %v4671_v30  ;;  %v5696_v17 = vpop.eup %5695  ;;  %4819 = vst [vmem:[%s10336_s21 + $0x30] sm:$0xff] %v4787_v38  ;;  %v4788_v50 = vmul.f32 %v5694_v3, %v10325_v56 }
 0x459   : > { %4817 = vst [vmem:[%s10336_s21 + $0x20] sm:$0xff] %v4785_v10  ;;  %v4786_v5 = vmul.f32 %v5696_v17, %v10329_v1 }
 0x45a   : > { %4820 = vst [vmem:[%s10336_s21 + $0x38] sm:$0xff] %v4788_v50 }
 0x45b   : > { %4818 = vst [vmem:[%s10336_s21 + $0x28] sm:$0xff] %v4786_v5 }
 0x45f   : > { %v5698_v27 = vpop.eup %5697 }
 0x460   : > { %v5700_v23 = vpop.eup %5699  ;;  %v4727_v19 = vadd.f32 1.0, %v5698_v27 }
 0x461   : > { %v5334_v18 = vpop.f32.mrb[0].mxu1  ;;  %v5702_v31 = vpop.eup %5701  ;;  %v4725_v48 = vadd.f32 1.0, %v5700_v23 }
 0x462   : > { %v5372_v61 = vadd.f32 %v5334_v18, %v10012_v60  ;;  %v4471_v7 = vpop.f32.mrb[1].mxu1  ;;  %v5704_v2 = vpop.eup %5703  ;;  %5705 = vrcp.f32 %v4727_v19  ;;  %v4728_v63 = vadd.f32 1.0, %v5702_v31 }
 0x463   : > { %v5373_v34 = vadd.f32 %v4471_v7, %v10019_v42  ;;  %v5335_v35 = vpop.f32.mrb[2].mxu1  ;;  %5707 = vrcp.f32 %v4725_v48  ;;  %v4726_v13 = vadd.f32 1.0, %v5704_v2 }
 0x464   : > { %v10373_v24 = vadd.f32 %v5372_v61, %v10311_v6  ;;  %v5374_v56 = vadd.f32 %v5335_v35, %v10028_v4  ;;  %v4474_v1 = vpop.f32.mrb[3].mxu1  ;;  %5709 = vrcp.f32 %v4728_v63 }
 0x465   : > { %v10377_v36 = vadd.f32 %v5373_v34, %v10311_v6  ;;  %v5375_v60 = vadd.f32 %v4474_v1, %v10037_v55  ;;  %5711 = vrcp.f32 %v4726_v13 }
 0x466   : > { %v4635_v42 = vsub.f32 0.0, %v10373_v24  ;;  %v10382_v14 = vadd.f32 %v5374_v56, %v10311_v6 }
 0x467   : > { %v4633_v58 = vsub.f32 0.0, %v10377_v36  ;;  %v10386_v4 = vadd.f32 %v5375_v60, %v10311_v6 }
 0x468   : > { %v4681_v44 = vmul.f32 1.442695, %v4635_v42  ;;  %v4636_v41 = vsub.f32 0.0, %v10382_v14 }
 0x469   : > { %v4677_v37 = vmul.f32 1.442695, %v4633_v58  ;;  %v4634_v55 = vsub.f32 0.0, %v10386_v4 }
 0x46a   : > { %5713 = vpow2.f32 %v4681_v44  ;;  %v4683_v8 = vmul.f32 1.442695, %v4636_v41 }
 0x46b   : > { %5715 = vpow2.f32 %v4677_v37  ;;  %v4679_v39 = vmul.f32 1.442695, %v4634_v55 }
 0x46c   : > { %5717 = vpow2.f32 %v4683_v8  ;;  %v5706_v28 = vpop.eup %5705 }
 0x46d   : > { %5719 = vpow2.f32 %v4679_v39  ;;  %v5708_v57 = vpop.eup %5707  ;;  %v4791_v47 = vmul.f32 %v5706_v28, %v10345_v49 }
 0x46e   : > { %v5710_v29 = vpop.eup %5709  ;;  %v4789_v59 = vmul.f32 %v5708_v57, %v10349_v51 }
 0x46f   : > { %v5712_v45 = vpop.eup %5711  ;;  %4823 = vst [vmem:[%s10336_s21 + $0x50] sm:$0xff] %v4791_v47  ;;  %v4792_v30 = vmul.f32 %v5710_v29, %v10354_v40 }
 0x470   : > { %4821 = vst [vmem:[%s10336_s21 + $0x40] sm:$0xff] %v4789_v59  ;;  %v4790_v43 = vmul.f32 %v5712_v45, %v10358_v33 }
 0x471   : > { %4824 = vst [vmem:[%s10336_s21 + $0x58] sm:$0xff] %v4792_v30 }
 0x472   : > { %4822 = vst [vmem:[%s10336_s21 + $0x48] sm:$0xff] %v4790_v43 }
 0x474   : > { %v5338_v32 = vpop.f32.mrb[4].mxu1  ;;  %v5714_v38 = vpop.eup %5713 }
 0x475   : > { %v5376_v3 = vadd.f32 %v5338_v32, %v10145_v16  ;;  %v4487_v10 = vpop.f32.mrb[5].mxu1  ;;  %v5716_v17 = vpop.eup %5715  ;;  %v4731_v50 = vadd.f32 1.0, %v5714_v38 }
 0x476   : > { %v5377_v49 = vadd.f32 %v4487_v10, %v10150_v53  ;;  %v5339_v5 = vpop.f32.mrb[6].mxu1  ;;  %v5718_v51 = vpop.eup %5717  ;;  %v4729_v18 = vadd.f32 1.0, %v5716_v17 }
 0x477   : > { %v10401_v27 = vadd.f32 %v5376_v3, %v10311_v6  ;;  %v5378_v40 = vadd.f32 %v5339_v5, %v10158_v26  ;;  %v4490_v33 = vpop.f32.mrb[7].mxu1  ;;  %v5720_v61 = vpop.eup %5719  ;;  %5721 = vrcp.f32 %v4731_v50  ;;  %v4732_v7 = vadd.f32 1.0, %v5718_v51 }
 0x478   : > { %v10405_v16 = vadd.f32 %v5377_v49, %v10311_v6  ;;  %v5379_v23 = vadd.f32 %v4490_v33, %v10165_v20  ;;  %5723 = vrcp.f32 %v4729_v18  ;;  %v4730_v19 = vadd.f32 1.0, %v5720_v61 }
 0x479   : > { %v4639_v53 = vsub.f32 0.0, %v10401_v27  ;;  %v10410_v34 = vadd.f32 %v5378_v40, %v10311_v6  ;;  %5725 = vrcp.f32 %v4732_v7 }
 0x47a   : > { %v4637_v35 = vsub.f32 0.0, %v10405_v16  ;;  %v10414_v26 = vadd.f32 %v5379_v23, %v10311_v6  ;;  %5727 = vrcp.f32 %v4730_v19 }
 0x47b   : > { %v4689_v31 = vmul.f32 1.442695, %v4639_v53  ;;  %v4640_v48 = vsub.f32 0.0, %v10410_v34 }
 0x47c   : > { %v4685_v56 = vmul.f32 1.442695, %v4637_v35  ;;  %v4638_v20 = vsub.f32 0.0, %v10414_v26 }
 0x47d   : > { %5729 = vpow2.f32 %v4689_v31  ;;  %v4691_v1 = vmul.f32 1.442695, %v4640_v48 }
 0x47e   : > { %5731 = vpow2.f32 %v4685_v56  ;;  %v4687_v2 = vmul.f32 1.442695, %v4638_v20 }
 0x47f   : > { %5733 = vpow2.f32 %v4691_v1 }
 0x480   : > { %5735 = vpow2.f32 %v4687_v2 }
 0x481   : > { %v5722_v63 = vpop.eup %5721 }
 0x482   : > { %v5724_v60 = vpop.eup %5723  ;;  %v4795_v13 = vmul.f32 %v5722_v63, %v10373_v24 }
 0x483   : > { %v5726_v42 = vpop.eup %5725  ;;  %v4793_v58 = vmul.f32 %v5724_v60, %v10377_v36 }
 0x484   : > { %v5728_v44 = vpop.eup %5727  ;;  %4827 = vst [vmem:[%s10336_s21 + $0x70] sm:$0xff] %v4795_v13  ;;  %v4796_v41 = vmul.f32 %v5726_v42, %v10382_v14 }
 0x485   : > { %4825 = vst [vmem:[%s10336_s21 + $0x60] sm:$0xff] %v4793_v58  ;;  %v4794_v37 = vmul.f32 %v5728_v44, %v10386_v4 }
 0x486   : > { %4828 = vst [vmem:[%s10336_s21 + $0x78] sm:$0xff] %v4796_v41 }
 0x487   : > { %v5730_v55 = vpop.eup %5729  ;;  %4826 = vst [vmem:[%s10336_s21 + $0x68] sm:$0xff] %v4794_v37 }
 0x488   : > { %v5732_v8 = vpop.eup %5731  ;;  %v4735_v39 = vadd.f32 1.0, %v5730_v55 }
 0x489   : > { %v5342_v28 = vpop.f32.mrb[8].mxu1  ;;  %v5734_v57 = vpop.eup %5733  ;;  %v4733_v47 = vadd.f32 1.0, %v5732_v8 }
 0x48a   : > { %v5380_v24 = vadd.f32 %v5342_v28, %v10264_v0  ;;  %v4503_v29 = vpop.f32.mrb[9].mxu1  ;;  %v5736_v59 = vpop.eup %5735  ;;  %5737 = vrcp.f32 %v4735_v39  ;;  %v4736_v36 = vadd.f32 1.0, %v5734_v57 }
 0x48b   : > { %v5381_v45 = vadd.f32 %v4503_v29, %v10270_v15  ;;  %v5343_v14 = vpop.f32.mrb[10].mxu1  ;;  %5739 = vrcp.f32 %v4733_v47  ;;  %v4734_v30 = vadd.f32 1.0, %v5736_v59 }
 0x48c   : > { %v10429_v4 = vadd.f32 %v5380_v24, %v10311_v6  ;;  %v5382_v43 = vadd.f32 %v5343_v14, %v10272_v25  ;;  %v4506_v32 = vpop.f32.mrb[11].mxu1  ;;  %5741 = vrcp.f32 %v4736_v36 }
 0x48d   : > { %v10433_v38 = vadd.f32 %v5381_v45, %v10311_v6  ;;  %v5383_v0 = vadd.f32 %v4506_v32, %v10276_v11  ;;  %5743 = vrcp.f32 %v4734_v30 }
 0x48e   : > { %v4643_v3 = vsub.f32 0.0, %v10429_v4  ;;  %v10438_v15 = vadd.f32 %v5382_v43, %v10311_v6 }
 0x48f   : > { %v4641_v10 = vsub.f32 0.0, %v10433_v38  ;;  %v10442_v17 = vadd.f32 %v5383_v0, %v10311_v6 }
 0x490   : > { %v4697_v50 = vmul.f32 1.442695, %v4643_v3  ;;  %v4644_v25 = vsub.f32 0.0, %v10438_v15 }
 0x491   : > { %v4693_v49 = vmul.f32 1.442695, %v4641_v10  ;;  %v4642_v5 = vsub.f32 0.0, %v10442_v17 }
 0x492   : > { %5745 = vpow2.f32 %v4697_v50  ;;  %v4699_v11 = vmul.f32 1.442695, %v4644_v25 }
 0x493   : > { %5747 = vpow2.f32 %v4693_v49  ;;  %v4695_v51 = vmul.f32 1.442695, %v4642_v5 }
 0x494   : > { %5749 = vpow2.f32 %v4699_v11  ;;  %v5738_v18 = vpop.eup %5737 }
 0x495   : > { %5751 = vpow2.f32 %v4695_v51  ;;  %v5740_v40 = vpop.eup %5739  ;;  %v4799_v33 = vmul.f32 %v5738_v18, %v10401_v27 }
 0x496   : > { %v5742_v61 = vpop.eup %5741  ;;  %v4797_v7 = vmul.f32 %v5740_v40, %v10405_v16 }
 0x497   : > { %v5744_v23 = vpop.eup %5743  ;;  %4831 = vst [vmem:[%s10336_s21 + $0x90] sm:$0xff] %v4799_v33  ;;  %v4800_v19 = vmul.f32 %v5742_v61, %v10410_v34 }
 0x498   : > { %4829 = vst [vmem:[%s10336_s21 + $0x80] sm:$0xff] %v4797_v7  ;;  %v4798_v53 = vmul.f32 %v5744_v23, %v10414_v26 }
 0x499   : > { %4832 = vst [vmem:[%s10336_s21 + $0x98] sm:$0xff] %v4800_v19 }
 0x49a   : > { %4830 = vst [vmem:[%s10336_s21 + $0x88] sm:$0xff] %v4798_v53 }
 0x49c   : > { %v5346_v35 = vpop.f32.mrb[12].mxu1  ;;  %v5746_v56 = vpop.eup %5745 }
 0x49d   : > { %v5384_v31 = vadd.f32 %v5346_v35, %v10284_v54  ;;  %v4519_v48 = vpop.f32.mrb[13].mxu1  ;;  %v5748_v1 = vpop.eup %5747  ;;  %v4739_v2 = vadd.f32 1.0, %v5746_v56 }
 0x49e   : > { %v5385_v20 = vadd.f32 %v4519_v48, %v10286_v46  ;;  %v5347_v27 = vpop.f32.mrb[14].mxu1  ;;  %v5750_v60 = vpop.eup %5749  ;;  %v4737_v26 = vadd.f32 1.0, %v5748_v1 }
 0x49f   : > { %v10457_v16 = vadd.f32 %v5384_v31, %v10311_v6  ;;  %v5386_v34 = vadd.f32 %v5347_v27, %v10288_v12  ;;  %v4522_v63 = vpop.f32.mrb[15].mxu1  ;;  %v5752_v42 = vpop.eup %5751  ;;  %5753 = vrcp.f32 %v4739_v2  ;;  %v4740_v58 = vadd.f32 1.0, %v5750_v60 }
 0x4a0   : > { %v10461_v13 = vadd.f32 %v5385_v20, %v10311_v6  ;;  %v5387_v54 = vadd.f32 %v4522_v63, %v10290_v9  ;;  %5755 = vrcp.f32 %v4737_v26  ;;  %v4738_v41 = vadd.f32 1.0, %v5752_v42 }
 0x4a1   : > { %v4647_v46 = vsub.f32 0.0, %v10457_v16  ;;  %v10466_v44 = vadd.f32 %v5386_v34, %v10311_v6  ;;  %5757 = vrcp.f32 %v4740_v58 }
 0x4a2   : > { %v4645_v12 = vsub.f32 0.0, %v10461_v13  ;;  %v10470_v37 = vadd.f32 %v5387_v54, %v10311_v6  ;;  %5759 = vrcp.f32 %v4738_v41 }
 0x4a3   : > { %v4705_v55 = vmul.f32 1.442695, %v4647_v46  ;;  %v4648_v8 = vsub.f32 0.0, %v10466_v44 }
 0x4a4   : > { %v4701_v9 = vmul.f32 1.442695, %v4645_v12  ;;  %v4646_v39 = vsub.f32 0.0, %v10470_v37  ;;  %v5350_v28 = vpop.f32.mrb[16].mxu1 }
 0x4a5   : > { %5761 = vpow2.f32 %v4705_v55  ;;  %v4707_v57 = vmul.f32 1.442695, %v4648_v8  ;;  %v5388_v47 = vadd.f32 %v5350_v28, %v10292_v22  ;;  %v4535_v24 = vpop.f32.mrb[17].mxu1 }
 0x4a6   : > { %5763 = vpow2.f32 %v4701_v9  ;;  %v4703_v29 = vmul.f32 1.442695, %v4646_v39  ;;  %v5389_v59 = vadd.f32 %v4535_v24, %v10294_v21  ;;  %v5351_v36 = vpop.f32.mrb[18].mxu1 }
 0x4a7   : > { %5765 = vpow2.f32 %v4707_v57  ;;  %v10477_v45 = vadd.f32 %v5388_v47, %v10311_v6  ;;  %v5390_v14 = vadd.f32 %v5351_v36, %v10296_v52  ;;  %v4538_v30 = vpop.f32.mrb[19].mxu1 }
 0x4a8   : > { %5767 = vpow2.f32 %v4703_v29  ;;  %v10481_v43 = vadd.f32 %v5389_v59, %v10311_v6  ;;  %v5391_v32 = vadd.f32 %v4538_v30, %v10298_v62 }
 0x4a9   : > { %v4651_v22 = vsub.f32 0.0, %v10477_v45  ;;  %v10486_v0 = vadd.f32 %v5390_v14, %v10311_v6  ;;  %v5754_v10 = vpop.eup %5753 }
 0x4aa   : > { %v4649_v21 = vsub.f32 0.0, %v10481_v43  ;;  %v10490_v3 = vadd.f32 %v5391_v32, %v10311_v6  ;;  %v5756_v25 = vpop.eup %5755  ;;  %v4803_v49 = vmul.f32 %v5754_v10, %v10429_v4 }
 0x4ab   : > { %v4713_v52 = vmul.f32 1.442695, %v4651_v22  ;;  %v4652_v50 = vsub.f32 0.0, %v10486_v0  ;;  %v5758_v11 = vpop.eup %5757  ;;  %v4801_v51 = vmul.f32 %v5756_v25, %v10433_v38 }
 0x4ac   : > { %v4709_v62 = vmul.f32 1.442695, %v4649_v21  ;;  %v4650_v5 = vsub.f32 0.0, %v10490_v3  ;;  %v5760_v6 = vpop.eup %5759  ;;  %4835 = vst [vmem:[%s10336_s21 + $0xb0] sm:$0xff] %v4803_v49  ;;  %v4804_v40 = vmul.f32 %v5758_v11, %v10438_v15 }
 0x4ad   : > { %5769 = vpow2.f32 %v4713_v52  ;;  %v4715_v18 = vmul.f32 1.442695, %v4652_v50  ;;  %4833 = vst [vmem:[%s10336_s21 + $0xa0] sm:$0xff] %v4801_v51  ;;  %v4802_v4 = vmul.f32 %v5760_v6, %v10442_v17 }
 0x4ae   : > { %5771 = vpow2.f32 %v4709_v62  ;;  %v4711_v33 = vmul.f32 1.442695, %v4650_v5  ;;  %4836 = vst [vmem:[%s10336_s21 + $0xb8] sm:$0xff] %v4804_v40 }
 0x4af   : > { %v5762_v61 = vpop.eup %5761  ;;  %5773 = vpow2.f32 %v4715_v18  ;;  %4834 = vst [vmem:[%s10336_s21 + $0xa8] sm:$0xff] %v4802_v4 }
 0x4b0   : > { %v5764_v7 = vpop.eup %5763  ;;  %v4743_v23 = vadd.f32 1.0, %v5762_v61  ;;  %5775 = vpow2.f32 %v4711_v33 }
 0x4b1   : > { %v5766_v19 = vpop.eup %5765  ;;  %v4741_v38 = vadd.f32 1.0, %v5764_v7 }
 0x4b2   : > { %v5768_v53 = vpop.eup %5767  ;;  %5777 = vrcp.f32 %v4743_v23  ;;  %v4744_v35 = vadd.f32 1.0, %v5766_v19 }
 0x4b3   : > { %5779 = vrcp.f32 %v4741_v38  ;;  %v4742_v31 = vadd.f32 1.0, %v5768_v53 }
 0x4b4   : > { %5781 = vrcp.f32 %v4744_v35 }
 0x4b5   : > { %5783 = vrcp.f32 %v4742_v31 }
 0x4b7   : > { %v5770_v15 = vpop.eup %5769 }
 0x4b8   : > { %v5772_v48 = vpop.eup %5771  ;;  %v4747_v56 = vadd.f32 1.0, %v5770_v15 }
 0x4b9   : > { %v5774_v17 = vpop.eup %5773  ;;  %v4745_v20 = vadd.f32 1.0, %v5772_v48 }
 0x4ba   : > { %v5776_v27 = vpop.eup %5775  ;;  %5785 = vrcp.f32 %v4747_v56  ;;  %v4748_v1 = vadd.f32 1.0, %v5774_v17 }
 0x4bb   : > { %5787 = vrcp.f32 %v4745_v20  ;;  %v4746_v2 = vadd.f32 1.0, %v5776_v27 }
 0x4bc   : > { %v5778_v34 = vpop.eup %5777  ;;  %5789 = vrcp.f32 %v4748_v1 }
 0x4bd   : > { %v5780_v63 = vpop.eup %5779  ;;  %v4807_v60 = vmul.f32 %v5778_v34, %v10457_v16  ;;  %5791 = vrcp.f32 %v4746_v2 }
 0x4be   : > { %v5782_v26 = vpop.eup %5781  ;;  %v4805_v54 = vmul.f32 %v5780_v63, %v10461_v13 }
 0x4bf   : > { %v5784_v42 = vpop.eup %5783  ;;  %4839 = vst [vmem:[%s10336_s21 + $0xd0] sm:$0xff] %v4807_v60  ;;  %v4808_v58 = vmul.f32 %v5782_v26, %v10466_v44 }
 0x4c0   : > { %4837 = vst [vmem:[%s10336_s21 + $0xc0] sm:$0xff] %v4805_v54  ;;  %v4806_v46 = vmul.f32 %v5784_v42, %v10470_v37 }
 0x4c1   : > { %4840 = vst [vmem:[%s10336_s21 + $0xd8] sm:$0xff] %v4808_v58 }
 0x4c2   : > { %4838 = vst [vmem:[%s10336_s21 + $0xc8] sm:$0xff] %v4806_v46 }
 0x4c4   : > { %v5786_v41 = vpop.eup %5785 }
 0x4c5   : > { %v5788_v16 = vpop.eup %5787  ;;  %v4811_v13 = vmul.f32 %v5786_v41, %v10477_v45 }
 0x4c6   : > { %v5790_v12 = vpop.eup %5789  ;;  %v4809_v55 = vmul.f32 %v5788_v16, %v10481_v43 }
 0x4c7   : > { %v5792_v44 = vpop.eup %5791  ;;  %4843 = vst [vmem:[%s10336_s21 + $0xf0] sm:$0xff] %v4811_v13  ;;  %v4812_v8 = vmul.f32 %v5790_v12, %v10486_v0 }
 0x4c8   : > { %4841 = vst [vmem:[%s10336_s21 + $0xe0] sm:$0xff] %v4809_v55  ;;  %v4810_v37 = vmul.f32 %v5792_v44, %v10490_v3 }
 0x4c9   : > { %4844 = vst [vmem:[%s10336_s21 + $0xf8] sm:$0xff] %v4812_v8 }
 0x4ca   : > { %4842 = vst [vmem:[%s10336_s21 + $0xe8] sm:$0xff] %v4810_v37 }
 0x4cb   : > { %5811 = shalt.err (!%p5808_p3)
}
 0x4cc   : > { %s5812_s18 = scalar_lea.hbm %s10519_s26, 4096  ;;  %s5816_s21 = scalar_lea.hbm %s10578_s8, 8192 }
 0x4cd   : > { %p5813_p4 = scmp.ne.s32.totalorder %s10519_s26, %s5812_s18  ;;  %p5817_p9 = scmp.lt.u32.totalorder %s10519_s26, %s10578_s8 }
 0x4ce   : > { %p5818_p10 = scmp.lt.u32.totalorder %s5816_s21, %s5812_s18  ;;  %p5820_p12 = scmp.lt.u32.totalorder %s5812_s18, %s10519_s26 }
 0x4cf   : > { %p5814_p7 = pnand %p5813_p4, %p5948_p5 }
 0x4d0   : > { %p5819_p11 = por %p5818_p10, %p5817_p9 }
 0x4d1   : > { %p5815_p8 = pneg %p5814_p7 }
 0x4d2   : > { %p5821_p13 = por %p5820_p12, %p5819_p11 }
 0x4d4   : > { %p5822_p0 = pnand %p5821_p13, %p5815_p8 }
 0x4d6   : > { %5825 = shalt.err (!%p5822_p0)
}
 0x4d7   : > { %s5863_s25 = smov 128   ;;  %s5864_s12 = smov 8  }
 0x4d8   : > { %5456 = dma.vmem_to_hbm [thread:$0]  (%p5948_p5), %s10521_s23, 4096, %s10519_s26, %s10529_s9, %s5863_s25, %s5863_s25, %s5864_s12  }
 0x4d9 PF: > { %p5462_p1 = scmp.ge.s32.totalorder %s5860_s30, 2  ;;  %s4874_s13 = sand.u32 1, %s5848_s27  }
 0x4da   : > { %s4875_s10 = scalar_lea.sflag [#allocation3], %s4874_s13 }
 0x4db   : > { %p5459_p2 = pnand %p5462_p1, %p5952_p6 }
 0x4dd   : > { %5843 = dma.done.wait (!%p5459_p2), %s4875_s10, 4096  }
 0x4de   : > { %5845 = vsyncadd (!%p5459_p2), %s4875_s10, 4294963200  ;;  %p18_p3 = scmp.ge.s32.totalorder %s5935_s11, 4   ;;  %s12257_s27 = smov %s5852_s28 }
 0x4df   : > { %s12258_s28 = smov %s5856_s29  ;;  %s12259_s29 = smov %s5946_s14 }
 0x4e0   : > { %s12260_s30 = smov %s5935_s11  ;;  %20 = sbr.rel (!%p18_p3) target bundleno = 3 (0x3), region = 87 }
 0x4e7   :  { %4880 = vsyncpa [#allocation3], 1 }
 0x4e8   :  { %4882 = vsyncpa [#allocation3 + $0x1], 1 }

</bundles_post_ra>
